<compile_context>
chip_gen: v6e
topology: v6e:2x2x1
jax: 0.10.0
libtpu: 0.0.40
codegen_flags: <defaults>
</compile_context>

<pallas_src>
import jax
import jax.numpy as jnp
import numpy as np
from jax.experimental import pallas as pl
from jax.experimental.pallas import tpu as pltpu

_LH = 8  # left halo width in W inside the scratch -> sublane-aligned interior store
_RH = 8  # right halo width -> right border strip is an aligned 8-wide store


def _residual_block_kernel(x_ref, w1_ref, b1_ref, w2_ref, b2_ref, out_ref, pad_sc):
    """Processes Nb batch images per grid step.

    x_ref  : (Nb, H, W, C)            unpadded NHWC input block
    w*_ref : (9*C, C) bf16            conv weights, rows ordered (dy, dx, c_in)
    b*_ref : (1, C)  f32              conv biases
    out_ref: (Nb, H, W, C)
    pad_sc : VMEM (Nb, H+2, _LH+W+_RH, C) f32 zero-bordered conv input
    """
    Nb, H, W, C = x_ref.shape
    Wp = pad_sc.shape[2]
    M = Nb * H * W

    # Weights/biases arrive already in their compute dtype (casts hoisted to
    # the wrapper — they are grid-invariant).
    w1 = w1_ref[...]        # bf16 (9C, C)
    w2 = w2_ref[...]        # bf16 (9C, C)
    b1 = b1_ref[...]        # f32  (1, C)
    b2 = b2_ref[...]        # f32  (1, C)

    def conv3x3(w2d, b):
        # One fused MXU matmul per conv (K = 9*C).  The +-1 dx taps come from
        # XLU rolls of the full padded row followed by ALIGNED window slices
        # (no misaligned sublane slice copies); dy taps slice the major H axis
        # which is tile-aligned.  Halo columns/rows are zero, so rolled-in
        # wrap-around values are never read (window starts at _LH >= 1 and
        # ends _RH-1 short of the right edge).
        xp = pad_sc[...]                                       # (Nb, H+2, Wp, C) f32
        xs = (pltpu.roll(xp, shift=1, axis=2),                 # dx = 0 -> read col-1
              xp,                                              # dx = 1
              pltpu.roll(xp, shift=Wp - 1, axis=2))            # dx = 2 -> read col+1
        cols = [
            xs[dx][:, dy:dy + H, _LH:_LH + W, :].reshape(M, C)
            for dy in range(3) for dx in range(3)
        ]
        col = jnp.concatenate(cols, axis=-1)                   # (M, 9*C) f32
        # bf16 MXU operands, f32 accumulation; bias add stays f32.
        return jnp.dot(col.astype(jnp.bfloat16), w2d,
                       preferred_element_type=jnp.float32) + b

    # Zero ONLY the halo border each step (interior is fully overwritten).
    # Per-step zeroing keeps the "parallel" batch axis core-safe.
    pad_sc[:, :, 0:_LH, :] = jnp.zeros((Nb, H + 2, _LH, C), jnp.float32)
    pad_sc[:, :, _LH + W:, :] = jnp.zeros((Nb, H + 2, Wp - _LH - W, C), jnp.float32)
    pad_sc[:, 0:1, _LH:_LH + W, :] = jnp.zeros((Nb, 1, W, C), jnp.float32)
    pad_sc[:, H + 1:H + 2, _LH:_LH + W, :] = jnp.zeros((Nb, 1, W, C), jnp.float32)

    x = x_ref[...].astype(jnp.float32)                         # (Nb, H, W, C), loaded once

    # conv1 + relu  (interior write starts at sublane-aligned W offset _LH).
    pad_sc[:, 1:H + 1, _LH:_LH + W, :] = x
    y1 = jnp.maximum(conv3x3(w1, b1), 0.0)                     # (M, C) f32

    # conv2: reuse the same scratch (borders untouched by the interior write).
    pad_sc[:, 1:H + 1, _LH:_LH + W, :] = y1.reshape(Nb, H, W, C)
    y2 = conv3x3(w2, b2)                                       # (M, C) f32

    # Residual add + relu in f32, reading x straight from the unpadded block.
    out = jnp.maximum(x.reshape(M, C) + y2, 0.0)
    out_ref[...] = out.reshape(Nb, H, W, C).astype(out_ref.dtype)


def _pick_images_per_step(N, H, W, C):
    """Pack images per grid step to amortize per-step overhead while keeping
    >= 2 grid steps (v7x has 2 TensorCores) and a conservative VMEM budget."""
    def step_bytes(nb):
        m = nb * H * W
        col = m * 9 * C * (4 + 2)                        # f32 im2col + bf16 copy
        pad = nb * (H + 2) * (_LH + W + _RH) * C * 4     # scratch
        io = 2 * 2 * nb * H * W * C * 4                  # double-buffered in/out blocks
        return col + pad + io

    nb = max(1, N // 2)                                  # keep >= 2 grid steps
    while nb > 1 and (N % nb or step_bytes(nb) > (8 << 20)):
        nb -= 1
    return nb


def residual_block_nhwc(x_nhwc, w1, b1, w2, b2, *, images_per_step=None):
    """x_nhwc: (N,H,W,C); w: (3,3,C,C) HWIO; b: (1,C). Returns (N,H,W,C)."""
    N, H, W, C = x_nhwc.shape
    nb = images_per_step if images_per_step is not None else _pick_images_per_step(N, H, W, C)
    assert N % nb == 0, (N, nb)
    Wp = _LH + W + _RH

    # Hoisted out of the kernel: weights pre-reshaped to (9C, C) with rows
    # ordered (dy, dx, c_in) — matching the kernel's im2col column order —
    # and pre-cast to the bf16 MXU operand dtype; biases kept in f32.
    w1_2d = w1.reshape(9 * C, C).astype(jnp.bfloat16)
    w2_2d = w2.reshape(9 * C, C).astype(jnp.bfloat16)
    b1_f = b1.reshape(1, C).astype(jnp.float32)
    b2_f = b2.reshape(1, C).astype(jnp.float32)

    return pl.pallas_call(
        _residual_block_kernel,
        out_shape=jax.ShapeDtypeStruct((N, H, W, C), x_nhwc.dtype),
        grid_spec=pltpu.PrefetchScalarGridSpec(
            num_scalar_prefetch=0,
            grid=(N // nb,),
            in_specs=[
                pl.BlockSpec((nb, H, W, C), lambda n: (n, 0, 0, 0)),
                pl.BlockSpec((9 * C, C), lambda n: (0, 0)),
                pl.BlockSpec((1, C), lambda n: (0, 0)),
                pl.BlockSpec((9 * C, C), lambda n: (0, 0)),
                pl.BlockSpec((1, C), lambda n: (0, 0)),
            ],
            out_specs=pl.BlockSpec((nb, H, W, C), lambda n: (n, 0, 0, 0)),
            scratch_shapes=[pltpu.VMEM((nb, H + 2, Wp, C), jnp.float32)],
        ),
        compiler_params=pltpu.CompilerParams(
            dimension_semantics=("parallel",)),
    )(x_nhwc, w1_2d, b1_f, w2_2d, b2_f)


def residual_block_nchw(x_nchw, params):
    """PyTorch-compatible entry point: NCHW in, NCHW out."""
    w1, b1, w2, b2 = params
    x_nhwc = jnp.transpose(x_nchw, (0, 2, 3, 1))
    y_nhwc = residual_block_nhwc(x_nhwc, w1, b1, w2, b2)
    return jnp.transpose(y_nhwc, (0, 3, 1, 2))


def _reference_nchw(x_nchw, params, *, matmul_dtype=jnp.bfloat16):
    """Pure-JAX reference mirroring torch.nn semantics.

    `matmul_dtype=bf16` matches the kernel's MXU operand precision (bf16
    products, f32 accumulation, f32 bias/residual/relu); pass jnp.float32 to
    get the exact-f32 PyTorch numbers.
    """
    w1, b1, w2, b2 = params  # HWIO weights, (1,C) biases

    def conv(x, w, b):
        y = jax.lax.conv_general_dilated(
            x.astype(matmul_dtype), w.astype(matmul_dtype),
            window_strides=(1, 1), padding=((1, 1), (1, 1)),
            dimension_numbers=("NCHW", "HWIO", "NCHW"),
            preferred_element_type=jnp.float32)
        return y + b.reshape(1, -1, 1, 1).astype(jnp.float32)

    y = jax.nn.relu(conv(x_nchw, w1, b1))
    y = conv(y, w2, b2)
    return jax.nn.relu(x_nchw.astype(jnp.float32) + y)


def init_params(key, channels):
    """Deterministic synthetic params (Conv2d(channels, channels, 3, padding=1) x2)."""
    k1, k2, k3, k4 = jax.random.split(key, 4)
    # OIHW (PyTorch) -> HWIO (kernel layout)
    w1_oihw = jax.random.normal(k1, (channels, channels, 3, 3), jnp.float32) * 0.1
    w2_oihw = jax.random.normal(k2, (channels, channels, 3, 3), jnp.float32) * 0.1
    w1 = jnp.transpose(w1_oihw, (2, 3, 1, 0))
    w2 = jnp.transpose(w2_oihw, (2, 3, 1, 0))
    b1 = (jax.random.normal(k3, (channels,), jnp.float32) * 0.1).reshape(1, channels)
    b2 = (jax.random.normal(k4, (channels,), jnp.float32) * 0.1).reshape(1, channels)
    return (w1, b1, w2, b2)


if __name__ == "__main__":
    N, C, H, W = 2, 4, 16, 16
    key = jax.random.PRNGKey(0)
    kx, kp = jax.random.split(key)
    x = jax.random.normal(kx, (N, C, H, W), jnp.float32)   # NCHW, like PyTorch
    params = init_params(kp, C)

    out = jax.block_until_ready(residual_block_nchw(x, params))
    # Compare against a bf16-operand / f32-accumulate reference (same precision
    # as the kernel's MXU path); differences are only summation order, so 1e-2
    # is a wide margin while still catching any tap/offset/weight-layout bug.
    ref = jax.block_until_ready(_reference_nchw(x, params))
    np.testing.assert_allclose(np.asarray(out), np.asarray(ref), rtol=1e-2, atol=1e-2)

    print("KERNEL_OK")
</pallas_src>

<mosaic_0001>
module attributes {stable_mosaic.version = 11 : i64} {
  func.func @_residual_block_kernel(%arg0: i32, %arg1: memref<1x16x16x4xf32, #tpu.memory_space<vmem>>, %arg2: memref<36x4xbf16, #tpu.memory_space<vmem>>, %arg3: memref<1x4xf32, #tpu.memory_space<vmem>>, %arg4: memref<36x4xbf16, #tpu.memory_space<vmem>>, %arg5: memref<1x4xf32, #tpu.memory_space<vmem>>, %arg6: memref<1x16x16x4xf32, #tpu.memory_space<vmem>>, %arg7: memref<1x18x32x4xf32, #tpu.memory_space<vmem>>) attributes {dimension_semantics = [#tpu.dimension_semantics<parallel>], iteration_bounds = array<i64: 2>, scalar_prefetch = 0 : i64, scratch_operands = 1 : i64, tpu.core_type = #tpu.core_type<tc>, window_params = [{transform_indices = @transform_0, window_bounds = array<i64: 1, 16, 16, 4>}, {pipeline_mode = #tpu.pipeline_mode<synchronous>, transform_indices = @transform_1, window_bounds = array<i64: 36, 4>}, {pipeline_mode = #tpu.pipeline_mode<synchronous>, transform_indices = @transform_2, window_bounds = array<i64: 1, 4>}, {pipeline_mode = #tpu.pipeline_mode<synchronous>, transform_indices = @transform_3, window_bounds = array<i64: 36, 4>}, {pipeline_mode = #tpu.pipeline_mode<synchronous>, transform_indices = @transform_4, window_bounds = array<i64: 1, 4>}, {transform_indices = @transform_5, window_bounds = array<i64: 1, 16, 16, 4>}]} {
    %c0 = arith.constant 0 : index
    %c0_0 = arith.constant 0 : index
    %0 = vector.load %arg2[%c0, %c0_0] : memref<36x4xbf16, #tpu.memory_space<vmem>>, vector<36x4xbf16>
    %c0_1 = arith.constant 0 : index
    %c0_2 = arith.constant 0 : index
    %1 = vector.load %arg4[%c0_1, %c0_2] : memref<36x4xbf16, #tpu.memory_space<vmem>>, vector<36x4xbf16>
    %c0_3 = arith.constant 0 : index
    %c0_4 = arith.constant 0 : index
    %2 = vector.load %arg3[%c0_3, %c0_4] : memref<1x4xf32, #tpu.memory_space<vmem>>, vector<1x4xf32>
    %c0_5 = arith.constant 0 : index
    %c0_6 = arith.constant 0 : index
    %3 = vector.load %arg5[%c0_5, %c0_6] : memref<1x4xf32, #tpu.memory_space<vmem>>, vector<1x4xf32>
    %cst = arith.constant 0.000000e+00 : f32
    %4 = vector.broadcast %cst : f32 to vector<1x18x8x4xf32>
    %c0_7 = arith.constant 0 : index
    %c0_8 = arith.constant 0 : index
    %c0_9 = arith.constant 0 : index
    %c0_10 = arith.constant 0 : index
    %5 = vector.load %arg7[%c0_7, %c0_8, %c0_9, %c0_10] : memref<1x18x32x4xf32, #tpu.memory_space<vmem>>, vector<1x18x8x4xf32>
    tpu.vector_store %arg7[%c0_7, %c0_8, %c0_9, %c0_10], %4 {strides = array<i32>} : memref<1x18x32x4xf32, #tpu.memory_space<vmem>>, vector<1x18x8x4xf32>,
    %cst_11 = arith.constant 0.000000e+00 : f32
    %6 = vector.broadcast %cst_11 : f32 to vector<1x18x8x4xf32>
    %c0_12 = arith.constant 0 : index
    %c0_13 = arith.constant 0 : index
    %c24 = arith.constant 24 : index
    %c0_14 = arith.constant 0 : index
    %7 = vector.load %arg7[%c0_12, %c0_13, %c24, %c0_14] : memref<1x18x32x4xf32, #tpu.memory_space<vmem>>, vector<1x18x8x4xf32>
    tpu.vector_store %arg7[%c0_12, %c0_13, %c24, %c0_14], %6 {strides = array<i32>} : memref<1x18x32x4xf32, #tpu.memory_space<vmem>>, vector<1x18x8x4xf32>,
    %cst_15 = arith.constant 0.000000e+00 : f32
    %8 = vector.broadcast %cst_15 : f32 to vector<1x1x16x4xf32>
    %c0_16 = arith.constant 0 : index
    %c0_17 = arith.constant 0 : index
    %c8 = arith.constant 8 : index
    %c0_18 = arith.constant 0 : index
    %9 = vector.load %arg7[%c0_16, %c0_17, %c8, %c0_18] : memref<1x18x32x4xf32, #tpu.memory_space<vmem>>, vector<1x1x16x4xf32>
    tpu.vector_store %arg7[%c0_16, %c0_17, %c8, %c0_18], %8 {strides = array<i32>} : memref<1x18x32x4xf32, #tpu.memory_space<vmem>>, vector<1x1x16x4xf32>,
    %cst_19 = arith.constant 0.000000e+00 : f32
    %10 = vector.broadcast %cst_19 : f32 to vector<1x1x16x4xf32>
    %c0_20 = arith.constant 0 : index
    %c17 = arith.constant 17 : index
    %c8_21 = arith.constant 8 : index
    %c0_22 = arith.constant 0 : index
    %11 = vector.load %arg7[%c0_20, %c17, %c8_21, %c0_22] : memref<1x18x32x4xf32, #tpu.memory_space<vmem>>, vector<1x1x16x4xf32>
    tpu.vector_store %arg7[%c0_20, %c17, %c8_21, %c0_22], %10 {strides = array<i32>} : memref<1x18x32x4xf32, #tpu.memory_space<vmem>>, vector<1x1x16x4xf32>,
    %c0_23 = arith.constant 0 : index
    %c0_24 = arith.constant 0 : index
    %c0_25 = arith.constant 0 : index
    %c0_26 = arith.constant 0 : index
    %12 = vector.load %arg1[%c0_23, %c0_24, %c0_25, %c0_26] : memref<1x16x16x4xf32, #tpu.memory_space<vmem>>, vector<1x16x16x4xf32>
    %c0_27 = arith.constant 0 : index
    %c1 = arith.constant 1 : index
    %c8_28 = arith.constant 8 : index
    %c0_29 = arith.constant 0 : index
    %13 = vector.load %arg7[%c0_27, %c1, %c8_28, %c0_29] : memref<1x18x32x4xf32, #tpu.memory_space<vmem>>, vector<1x16x16x4xf32>
    tpu.vector_store %arg7[%c0_27, %c1, %c8_28, %c0_29], %12 {strides = array<i32>} : memref<1x18x32x4xf32, #tpu.memory_space<vmem>>, vector<1x16x16x4xf32>,
    %c0_30 = arith.constant 0 : index
    %c0_31 = arith.constant 0 : index
    %c0_32 = arith.constant 0 : index
    %c0_33 = arith.constant 0 : index
    %14 = vector.load %arg7[%c0_30, %c0_31, %c0_32, %c0_33] : memref<1x18x32x4xf32, #tpu.memory_space<vmem>>, vector<1x18x32x4xf32>
    %c1_i32 = arith.constant 1 : i32
    %15 = tpu.dynamic_rotate %14 by %c1_i32 dim 2 : vector<1x18x32x4xf32>, i32 -> vector<1x18x32x4xf32>
    %c31_i32 = arith.constant 31 : i32
    %16 = tpu.dynamic_rotate %14 by %c31_i32 dim 2 : vector<1x18x32x4xf32>, i32 -> vector<1x18x32x4xf32>
    %17 = vector.extract_strided_slice %15 {offsets = [0, 0, 8, 0], sizes = [1, 16, 16, 4], strides = [1, 1, 1, 1]} : vector<1x18x32x4xf32> to vector<1x16x16x4xf32>
    %18 = vector.shape_cast %17 : vector<1x16x16x4xf32> to vector<256x4xf32>
    %19 = vector.extract_strided_slice %14 {offsets = [0, 0, 8, 0], sizes = [1, 16, 16, 4], strides = [1, 1, 1, 1]} : vector<1x18x32x4xf32> to vector<1x16x16x4xf32>
    %20 = vector.shape_cast %19 : vector<1x16x16x4xf32> to vector<256x4xf32>
    %21 = vector.extract_strided_slice %16 {offsets = [0, 0, 8, 0], sizes = [1, 16, 16, 4], strides = [1, 1, 1, 1]} : vector<1x18x32x4xf32> to vector<1x16x16x4xf32>
    %22 = vector.shape_cast %21 : vector<1x16x16x4xf32> to vector<256x4xf32>
    %23 = vector.extract_strided_slice %15 {offsets = [0, 1, 8, 0], sizes = [1, 16, 16, 4], strides = [1, 1, 1, 1]} : vector<1x18x32x4xf32> to vector<1x16x16x4xf32>
    %24 = vector.shape_cast %23 : vector<1x16x16x4xf32> to vector<256x4xf32>
    %25 = vector.extract_strided_slice %14 {offsets = [0, 1, 8, 0], sizes = [1, 16, 16, 4], strides = [1, 1, 1, 1]} : vector<1x18x32x4xf32> to vector<1x16x16x4xf32>
    %26 = vector.shape_cast %25 : vector<1x16x16x4xf32> to vector<256x4xf32>
    %27 = vector.extract_strided_slice %16 {offsets = [0, 1, 8, 0], sizes = [1, 16, 16, 4], strides = [1, 1, 1, 1]} : vector<1x18x32x4xf32> to vector<1x16x16x4xf32>
    %28 = vector.shape_cast %27 : vector<1x16x16x4xf32> to vector<256x4xf32>
    %29 = vector.extract_strided_slice %15 {offsets = [0, 2, 8, 0], sizes = [1, 16, 16, 4], strides = [1, 1, 1, 1]} : vector<1x18x32x4xf32> to vector<1x16x16x4xf32>
    %30 = vector.shape_cast %29 : vector<1x16x16x4xf32> to vector<256x4xf32>
    %31 = vector.extract_strided_slice %14 {offsets = [0, 2, 8, 0], sizes = [1, 16, 16, 4], strides = [1, 1, 1, 1]} : vector<1x18x32x4xf32> to vector<1x16x16x4xf32>
    %32 = vector.shape_cast %31 : vector<1x16x16x4xf32> to vector<256x4xf32>
    %33 = vector.extract_strided_slice %16 {offsets = [0, 2, 8, 0], sizes = [1, 16, 16, 4], strides = [1, 1, 1, 1]} : vector<1x18x32x4xf32> to vector<1x16x16x4xf32>
    %34 = vector.shape_cast %33 : vector<1x16x16x4xf32> to vector<256x4xf32>
    %35 = tpu.concatenate %18, %20, %22, %24, %26, %28, %30, %32, %34 in 1 : vector<256x4xf32>, vector<256x4xf32>, vector<256x4xf32>, vector<256x4xf32>, vector<256x4xf32>, vector<256x4xf32>, vector<256x4xf32>, vector<256x4xf32>, vector<256x4xf32> -> vector<256x36xf32>
    %36 = arith.truncf %35 : vector<256x36xf32> to vector<256x36xbf16>
    %cst_34 = arith.constant dense<0.000000e+00> : vector<256x4xf32>
    %37 = tpu.matmul %36, %0, %cst_34 {dimension_numbers = #tpu.dot_dimension_numbers<[1], [0], [0], [1], [0, 0, 1, 1], [], []>} : vector<256x36xbf16>, vector<36x4xbf16>, vector<256x4xf32> -> vector<256x4xf32>
    %38 = vector.broadcast %2 : vector<1x4xf32> to vector<256x4xf32>
    %39 = arith.addf %37, %38 : vector<256x4xf32>
    %cst_35 = arith.constant 0.000000e+00 : f32
    %40 = vector.broadcast %cst_35 : f32 to vector<256x4xf32>
    %41 = arith.maximumf %39, %40 : vector<256x4xf32>
    %42 = vector.shape_cast %41 : vector<256x4xf32> to vector<1x16x16x4xf32>
    %c0_36 = arith.constant 0 : index
    %c1_37 = arith.constant 1 : index
    %c8_38 = arith.constant 8 : index
    %c0_39 = arith.constant 0 : index
    %43 = vector.load %arg7[%c0_36, %c1_37, %c8_38, %c0_39] : memref<1x18x32x4xf32, #tpu.memory_space<vmem>>, vector<1x16x16x4xf32>
    tpu.vector_store %arg7[%c0_36, %c1_37, %c8_38, %c0_39], %42 {strides = array<i32>} : memref<1x18x32x4xf32, #tpu.memory_space<vmem>>, vector<1x16x16x4xf32>,
    %c0_40 = arith.constant 0 : index
    %c0_41 = arith.constant 0 : index
    %c0_42 = arith.constant 0 : index
    %c0_43 = arith.constant 0 : index
    %44 = vector.load %arg7[%c0_40, %c0_41, %c0_42, %c0_43] : memref<1x18x32x4xf32, #tpu.memory_space<vmem>>, vector<1x18x32x4xf32>
    %c1_i32_44 = arith.constant 1 : i32
    %45 = tpu.dynamic_rotate %44 by %c1_i32_44 dim 2 : vector<1x18x32x4xf32>, i32 -> vector<1x18x32x4xf32>
    %c31_i32_45 = arith.constant 31 : i32
    %46 = tpu.dynamic_rotate %44 by %c31_i32_45 dim 2 : vector<1x18x32x4xf32>, i32 -> vector<1x18x32x4xf32>
    %47 = vector.extract_strided_slice %45 {offsets = [0, 0, 8, 0], sizes = [1, 16, 16, 4], strides = [1, 1, 1, 1]} : vector<1x18x32x4xf32> to vector<1x16x16x4xf32>
    %48 = vector.shape_cast %47 : vector<1x16x16x4xf32> to vector<256x4xf32>
    %49 = vector.extract_strided_slice %44 {offsets = [0, 0, 8, 0], sizes = [1, 16, 16, 4], strides = [1, 1, 1, 1]} : vector<1x18x32x4xf32> to vector<1x16x16x4xf32>
    %50 = vector.shape_cast %49 : vector<1x16x16x4xf32> to vector<256x4xf32>
    %51 = vector.extract_strided_slice %46 {offsets = [0, 0, 8, 0], sizes = [1, 16, 16, 4], strides = [1, 1, 1, 1]} : vector<1x18x32x4xf32> to vector<1x16x16x4xf32>
    %52 = vector.shape_cast %51 : vector<1x16x16x4xf32> to vector<256x4xf32>
    %53 = vector.extract_strided_slice %45 {offsets = [0, 1, 8, 0], sizes = [1, 16, 16, 4], strides = [1, 1, 1, 1]} : vector<1x18x32x4xf32> to vector<1x16x16x4xf32>
    %54 = vector.shape_cast %53 : vector<1x16x16x4xf32> to vector<256x4xf32>
    %55 = vector.extract_strided_slice %44 {offsets = [0, 1, 8, 0], sizes = [1, 16, 16, 4], strides = [1, 1, 1, 1]} : vector<1x18x32x4xf32> to vector<1x16x16x4xf32>
    %56 = vector.shape_cast %55 : vector<1x16x16x4xf32> to vector<256x4xf32>
    %57 = vector.extract_strided_slice %46 {offsets = [0, 1, 8, 0], sizes = [1, 16, 16, 4], strides = [1, 1, 1, 1]} : vector<1x18x32x4xf32> to vector<1x16x16x4xf32>
    %58 = vector.shape_cast %57 : vector<1x16x16x4xf32> to vector<256x4xf32>
    %59 = vector.extract_strided_slice %45 {offsets = [0, 2, 8, 0], sizes = [1, 16, 16, 4], strides = [1, 1, 1, 1]} : vector<1x18x32x4xf32> to vector<1x16x16x4xf32>
    %60 = vector.shape_cast %59 : vector<1x16x16x4xf32> to vector<256x4xf32>
    %61 = vector.extract_strided_slice %44 {offsets = [0, 2, 8, 0], sizes = [1, 16, 16, 4], strides = [1, 1, 1, 1]} : vector<1x18x32x4xf32> to vector<1x16x16x4xf32>
    %62 = vector.shape_cast %61 : vector<1x16x16x4xf32> to vector<256x4xf32>
    %63 = vector.extract_strided_slice %46 {offsets = [0, 2, 8, 0], sizes = [1, 16, 16, 4], strides = [1, 1, 1, 1]} : vector<1x18x32x4xf32> to vector<1x16x16x4xf32>
    %64 = vector.shape_cast %63 : vector<1x16x16x4xf32> to vector<256x4xf32>
    %65 = tpu.concatenate %48, %50, %52, %54, %56, %58, %60, %62, %64 in 1 : vector<256x4xf32>, vector<256x4xf32>, vector<256x4xf32>, vector<256x4xf32>, vector<256x4xf32>, vector<256x4xf32>, vector<256x4xf32>, vector<256x4xf32>, vector<256x4xf32> -> vector<256x36xf32>
    %66 = arith.truncf %65 : vector<256x36xf32> to vector<256x36xbf16>
    %cst_46 = arith.constant dense<0.000000e+00> : vector<256x4xf32>
    %67 = tpu.matmul %66, %1, %cst_46 {dimension_numbers = #tpu.dot_dimension_numbers<[1], [0], [0], [1], [0, 0, 1, 1], [], []>} : vector<256x36xbf16>, vector<36x4xbf16>, vector<256x4xf32> -> vector<256x4xf32>
    %68 = vector.broadcast %3 : vector<1x4xf32> to vector<256x4xf32>
    %69 = arith.addf %67, %68 : vector<256x4xf32>
    %70 = vector.shape_cast %12 : vector<1x16x16x4xf32> to vector<256x4xf32>
    %71 = arith.addf %70, %69 : vector<256x4xf32>
    %cst_47 = arith.constant 0.000000e+00 : f32
    %72 = vector.broadcast %cst_47 : f32 to vector<256x4xf32>
    %73 = arith.maximumf %71, %72 : vector<256x4xf32>
    %74 = vector.shape_cast %73 : vector<256x4xf32> to vector<1x16x16x4xf32>
    %c0_48 = arith.constant 0 : index
    %c0_49 = arith.constant 0 : index
    %c0_50 = arith.constant 0 : index
    %c0_51 = arith.constant 0 : index
    %75 = vector.load %arg6[%c0_48, %c0_49, %c0_50, %c0_51] : memref<1x16x16x4xf32, #tpu.memory_space<vmem>>, vector<1x16x16x4xf32>
    tpu.vector_store %arg6[%c0_48, %c0_49, %c0_50, %c0_51], %74 {strides = array<i32>} : memref<1x16x16x4xf32, #tpu.memory_space<vmem>>, vector<1x16x16x4xf32>,
    return
  }
  func.func @transform_0(%arg0: i32) -> (i32, i32, i32, i32) {
    %c0_i32 = arith.constant 0 : i32
    %c0_i32_0 = arith.constant 0 : i32
    %c0_i32_1 = arith.constant 0 : i32
    %c0_i32_2 = arith.constant 0 : i32
    return %arg0, %c0_i32, %c0_i32_0, %c0_i32_1 : i32, i32, i32, i32
  }
  func.func @transform_1(%arg0: i32) -> (i32, i32) {
    %c0_i32 = arith.constant 0 : i32
    %c0_i32_0 = arith.constant 0 : i32
    %c0_i32_1 = arith.constant 0 : i32
    return %c0_i32, %c0_i32_0 : i32, i32
  }
  func.func @transform_2(%arg0: i32) -> (i32, i32) {
    %c0_i32 = arith.constant 0 : i32
    %c0_i32_0 = arith.constant 0 : i32
    %c0_i32_1 = arith.constant 0 : i32
    return %c0_i32, %c0_i32_0 : i32, i32
  }
  func.func @transform_3(%arg0: i32) -> (i32, i32) {
    %c0_i32 = arith.constant 0 : i32
    %c0_i32_0 = arith.constant 0 : i32
    %c0_i32_1 = arith.constant 0 : i32
    return %c0_i32, %c0_i32_0 : i32, i32
  }
  func.func @transform_4(%arg0: i32) -> (i32, i32) {
    %c0_i32 = arith.constant 0 : i32
    %c0_i32_0 = arith.constant 0 : i32
    %c0_i32_1 = arith.constant 0 : i32
    return %c0_i32, %c0_i32_0 : i32, i32
  }
  func.func @transform_5(%arg0: i32) -> (i32, i32, i32, i32) {
    %c0_i32 = arith.constant 0 : i32
    %c0_i32_0 = arith.constant 0 : i32
    %c0_i32_1 = arith.constant 0 : i32
    %c0_i32_2 = arith.constant 0 : i32
    return %arg0, %c0_i32, %c0_i32_0, %c0_i32_1 : i32, i32, i32, i32
  }
}

</mosaic_0001>

<bundles_post_ra>
// kernel: tpu_custom_call.1
= control target key start
LH: loop header
LB: loop body
LE: loop exit
PB: predicated region body
PF: predicated region fallthrough
CT: control target
= control target key end

     0   :  { %s5359_s18 = smov 0   ;;  %s8910_s0 = inlined_call_operand.vmem [shape: f32[2,16,16,4], index: 0, kind: input, shape index: {}]   ;;  %s8911_s1 = inlined_call_operand.vmem [shape: bf16[36,4], index: 1, kind: input, shape index: {}]   ;;  %s8912_s2 = inlined_call_operand.vmem [shape: f32[1,4], index: 2, kind: input, shape index: {}]   ;;  %s8913_s3 = inlined_call_operand.vmem [shape: bf16[36,4], index: 3, kind: input, shape index: {}]   ;;  %s8914_s4 = inlined_call_operand.vmem [shape: f32[1,4], index: 4, kind: input, shape index: {}]   ;;  %s8915_s5 = inlined_call_operand.vmem [shape: f32[2,16,16,4], index: 5, kind: output, shape index: {}]  }
   0x1 LB: > { %s3835_s19 = sadd.s32 4294967295, %s5318_s18   ;;  %p3839_p0 = scmp.ge.s32.totalorder %s5318_s18, 1  ;;  %s5318_s18 = sphi %s5359_s18, %s15_s18  }
   0x2   : > { %p187_p1 = scmp.lt.s32.totalorder %s5318_s18, 3 }
   0x4   : > { %p188_p2 = pnand %p3839_p0, %p187_p1 }
   0x6   : > { %191 = sbr.rel (%p188_p2) target bundleno = 1165 (0x48d), region = 40 }
   0xb   : > { %vm238_vm0 = vcmask 31744   ;;  %p5369_p3 = scmp.lt.s32.totalorder %s3835_s19, 1  ;;  %v5320_v0 = vmov 0.0   ;;  %v471_v1 = vlaneseq  ;;  %s5321_s25 = smov 4   ;;  %vm1824_vm3 = vcmask 1041408  }
   0xc   : > { %275 = vst.msk [vmem:[#allocation2 + $0x8] sm:$0xff] %vm238_vm0, %v5320_v0  ;;  %276 = vst.msk [vmem:[#allocation2 + $0x10] sm:$0xff] %vm238_vm0, %v5320_v0  ;;  %s5322_s26 = smov 8   ;;  %s5323_s27 = smov 12   ;;  %vm1507_vm4 = vcmask 64512   ;;  %vm1540_vm5 = vcmask 97280  }
   0xd   : > { %239 = vst.msk [vmem:[#allocation2] sm:$0xff] %vm238_vm0, %v5320_v0  ;;  %240 = vst.msk [vmem:[#allocation2 + $0x20] sm:$0xff] %vm238_vm0, %v5320_v0  ;;  %s9445_s19 = smov (!%p5369_p3, %s3835_s19), 1  ;;  %v5464_v11 = vshrl.u32 %v471_v1, 7  ;;  %s5324_s28 = smov 16   ;;  %vm1573_vm6 = vcmask 130048  }
   0xe   : > { %241 = vst.msk [vmem:[#allocation2 + $0x40] sm:$0xff] %vm238_vm0, %v5320_v0  ;;  %242 = vst.msk [vmem:[#allocation2 + $0x60] sm:$0xff] %vm238_vm0, %v5320_v0  ;;  %s3886_s21 = sshll.u32 %s9445_s19, 8  ;;  %s5325_s29 = smov 20   ;;  %vm1606_vm7 = vcmask 162816   ;;  %vm1639_vm8 = vcmask 195584  }
   0xf   : > { %243 = vst.msk [vmem:[#allocation2 + $0x80] sm:$0xff] %vm238_vm0, %v5320_v0  ;;  %244 = vst.msk [vmem:[#allocation2 + $0xa0] sm:$0xff] %vm238_vm0, %v5320_v0  ;;  %s5425_s24 = scalar_lea.vmem %s8910_s0, %s3886_s21  ;;  %vm473_vm1 = vcmp.lt.s32.totalorder %v5464_v11, 1  ;;  %vm564_vm2 = vcmp.lt.s32.totalorder %v5464_v11, 7  ;;  %s5326_s30 = smov 24   ;;  %vm1672_vm9 = vcmask 228352  }
  0x10   : > { %245 = vst.msk [vmem:[#allocation2 + $0xc0] sm:$0xff] %vm238_vm0, %v5320_v0  ;;  %246 = vst.msk [vmem:[#allocation2 + $0xe0] sm:$0xff] %vm238_vm0, %v5320_v0  ;;  %v5428_v2 = vld [vmem:[%s5425_s24 + $0x10] sm:$0xff]  ;;  %v5431_v3 = vld [vmem:[%s5425_s24 + $0x18] sm:$0xff]  ;;  %s5327_s8 = smov 28   ;;  %s5328_s13 = smov 32  }
  0x11   : > { %247 = vst.msk [vmem:[#allocation2 + $0x100] sm:$0xff] %vm238_vm0, %v5320_v0  ;;  %248 = vst.msk [vmem:[#allocation2 + $0x120] sm:$0xff] %vm238_vm0, %v5320_v0  ;;  %v5434_v4 = vld [vmem:[%s5425_s24] sm:$0xff]  ;;  %v5441_v5 = vld [vmem:[%s5425_s24 + $0x8] sm:$0xff]  ;;  %vm1705_vm10 = vcmask 261120   ;;  %vm1775_vm11 = vcmask 293888  }
  0x12   : > { %249 = vst.msk [vmem:[#allocation2 + $0x140] sm:$0xff] %vm238_vm0, %v5320_v0  ;;  %250 = vst.msk [vmem:[#allocation2 + $0x160] sm:$0xff] %vm238_vm0, %v5320_v0  ;;  %v5446_v6 = vld [vmem:[%s5425_s24 + $0x20] sm:$0xff]  ;;  %v5449_v7 = vld [vmem:[%s5425_s24 + $0x28] sm:$0xff] }
  0x13   : > { %251 = vst.msk [vmem:[#allocation2 + $0x180] sm:$0xff] %vm238_vm0, %v5320_v0  ;;  %252 = vst.msk [vmem:[#allocation2 + $0x1a0] sm:$0xff] %vm238_vm0, %v5320_v0  ;;  %v5451_v8 = vld [vmem:[#allocation2 + $0x8] sm:$0xff]  ;;  %v5453_v9 = vld [vmem:[#allocation2 + $0x10] sm:$0xff] }
  0x14   : > { %253 = vst.msk [vmem:[#allocation2 + $0x1c0] sm:$0xff] %vm238_vm0, %v5320_v0  ;;  %254 = vst.msk [vmem:[#allocation2 + $0x1e0] sm:$0xff] %vm238_vm0, %v5320_v0  ;;  %v5462_v10 = vld [vmem:[%s5425_s24 + $0x30] sm:$0xff]  ;;  %v453_v12 = vrot.slane %v5453_v9, 7  ;;  %v4021_v13 = vpack.i.bf16 %v5453_v9, %v5451_v8  ;;  %v8916_v14 = vrot.slane %v5451_v8, 7  ;;  %v5471_v15 = vld [vmem:[%s5425_s24 + $0x38] sm:$0xff] }
  0x15   : > { %255 = vst.msk [vmem:[#allocation2 + $0x200] sm:$0xff] %vm238_vm0, %v5320_v0  ;;  %256 = vst.msk [vmem:[#allocation2 + $0x220] sm:$0xff] %vm238_vm0, %v5320_v0  ;;  %v5476_v16 = vld [vmem:[%s5425_s24 + $0x40] sm:$0xff]  ;;  %v5479_v17 = vld [vmem:[%s5425_s24 + $0x48] sm:$0xff] }
  0x16   : > { %257 = vst.msk [vmem:[#allocation2 + $0x18] sm:$0xff] %vm238_vm0, %v5320_v0  ;;  %258 = vst.msk [vmem:[#allocation2 + $0x38] sm:$0xff] %vm238_vm0, %v5320_v0  ;;  %v5488_v18 = vld [vmem:[%s5425_s24 + $0x50] sm:$0xff]  ;;  %v5491_v19 = vld [vmem:[%s5425_s24 + $0x58] sm:$0xff]  ;;  %4022 = vrot.lane.b32.xlu0 %v4021_v13, %s5321_s25  ;;  %v5517_v24 = vsel %vm473_vm1, %v8916_v14, %v453_v12 }
  0x17   : > { %259 = vst.msk [vmem:[#allocation2 + $0x58] sm:$0xff] %vm238_vm0, %v5320_v0  ;;  %260 = vst.msk [vmem:[#allocation2 + $0x78] sm:$0xff] %vm238_vm0, %v5320_v0  ;;  %v5494_v20 = vld [vmem:[%s5425_s24 + $0x60] sm:$0xff]  ;;  %v5503_v21 = vld [vmem:[%s5425_s24 + $0x68] sm:$0xff] }
  0x18   : > { %261 = vst.msk [vmem:[#allocation2 + $0x98] sm:$0xff] %vm238_vm0, %v5320_v0  ;;  %262 = vst.msk [vmem:[#allocation2 + $0xb8] sm:$0xff] %vm238_vm0, %v5320_v0  ;;  %v5508_v22 = vld [vmem:[%s5425_s24 + $0x70] sm:$0xff]  ;;  %v5511_v23 = vld [vmem:[%s5425_s24 + $0x78] sm:$0xff] }
  0x19   : > { %263 = vst.msk [vmem:[#allocation2 + $0xd8] sm:$0xff] %vm238_vm0, %v5320_v0  ;;  %264 = vst.msk [vmem:[#allocation2 + $0xf8] sm:$0xff] %vm238_vm0, %v5320_v0  ;;  %v5526_v25 = vld [vmem:[%s5425_s24 + $0x80] sm:$0xff]  ;;  %v5529_v26 = vld [vmem:[%s5425_s24 + $0x88] sm:$0xff] }
  0x1a   : > { %265 = vst.msk [vmem:[#allocation2 + $0x118] sm:$0xff] %vm238_vm0, %v5320_v0  ;;  %266 = vst.msk [vmem:[#allocation2 + $0x138] sm:$0xff] %vm238_vm0, %v5320_v0  ;;  %v5532_v27 = vld [vmem:[%s5425_s24 + $0x90] sm:$0xff]  ;;  %v5539_v28 = vld [vmem:[%s5425_s24 + $0x98] sm:$0xff] }
  0x1b   : > { %267 = vst.msk [vmem:[#allocation2 + $0x158] sm:$0xff] %vm238_vm0, %v5320_v0  ;;  %268 = vst.msk [vmem:[#allocation2 + $0x178] sm:$0xff] %vm238_vm0, %v5320_v0  ;;  %v5544_v29 = vld [vmem:[%s5425_s24 + $0xa0] sm:$0xff]  ;;  %v5547_v30 = vld [vmem:[%s5425_s24 + $0xa8] sm:$0xff] }
  0x1c   : > { %269 = vst.msk [vmem:[#allocation2 + $0x198] sm:$0xff] %vm238_vm0, %v5320_v0  ;;  %270 = vst.msk [vmem:[#allocation2 + $0x1b8] sm:$0xff] %vm238_vm0, %v5320_v0  ;;  %v5578_v40 = vld [vmem:[%s5425_s24 + $0xb0] sm:$0xff]  ;;  %v5581_v41 = vld [vmem:[%s5425_s24 + $0xb8] sm:$0xff] }
  0x1d   : > { %271 = vst.msk [vmem:[#allocation2 + $0x1d8] sm:$0xff] %vm238_vm0, %v5320_v0  ;;  %272 = vst.msk [vmem:[#allocation2 + $0x1f8] sm:$0xff] %vm238_vm0, %v5320_v0  ;;  %v5630_v55 = vld [vmem:[%s5425_s24 + $0xc0] sm:$0xff]  ;;  %v5633_v56 = vld [vmem:[%s5425_s24 + $0xc8] sm:$0xff] }
  0x1e   : > { %273 = vst.msk [vmem:[#allocation2 + $0x218] sm:$0xff] %vm238_vm0, %v5320_v0  ;;  %274 = vst.msk [vmem:[#allocation2 + $0x238] sm:$0xff] %vm238_vm0, %v5320_v0  ;;  %v5636_v57 = vld [vmem:[%s5425_s24 + $0xd0] sm:$0xff]  ;;  %v5643_v58 = vld [vmem:[%s5425_s24 + $0xd8] sm:$0xff] }
  0x1f   : > { %278 = vst.msk [vmem:[#allocation2 + $0x228] sm:$0xff] %vm238_vm0, %v5320_v0  ;;  %279 = vst.msk [vmem:[#allocation2 + $0x230] sm:$0xff] %vm238_vm0, %v5320_v0  ;;  %v5648_v59 = vld [vmem:[%s5425_s24 + $0xe0] sm:$0xff]  ;;  %v5651_v60 = vld [vmem:[%s5425_s24 + $0xe8] sm:$0xff] }
  0x20   : > { %9095 = vst [vmem:[#allocation3_spill] sm:$0xff] %v5428_v2  ;;  %9096 = vst [vmem:[#allocation4_spill] sm:$0xff] %v5431_v3 }
  0x21   : > { %9097 = vst [vmem:[#allocation5_spill] sm:$0xff] %v5434_v4  ;;  %315 = vst.msk [vmem:[#allocation2 + $0x48] sm:$0xff] %vm238_vm0, %v5428_v2  ;;  %v364_v2 = vld [vmem:[#allocation2 + $0x98] sm:$0xff] }
  0x22   : > { %316 = vst.msk [vmem:[#allocation2 + $0x50] sm:$0xff] %vm238_vm0, %v5431_v3  ;;  %9098 = vst [vmem:[#allocation6_spill] sm:$0xff] %v5441_v5 }
  0x23   : > { %313 = vst.msk [vmem:[#allocation2 + $0x28] sm:$0xff] %vm238_vm0, %v5434_v4  ;;  %9099 = vst [vmem:[#allocation7_spill] sm:$0xff] %v5446_v6  ;;  %v360_v4 = vld [vmem:[#allocation2 + $0x78] sm:$0xff] }
  0x24   : > { %9100 = vst [vmem:[#allocation8_spill] sm:$0xff] %v5449_v7  ;;  %9101 = vst [vmem:[#allocation9_spill] sm:$0xff] %v5451_v8 }
  0x25   : > { %314 = vst.msk [vmem:[#allocation2 + $0x30] sm:$0xff] %vm238_vm0, %v5441_v5  ;;  %317 = vst.msk [vmem:[#allocation2 + $0x68] sm:$0xff] %vm238_vm0, %v5446_v6 }
  0x26   : > { %318 = vst.msk [vmem:[#allocation2 + $0x70] sm:$0xff] %vm238_vm0, %v5449_v7  ;;  %9102 = vst [vmem:[#allocation10_spill] sm:$0xff] %v5462_v10 }
  0x27   : > { %9103 = vst [vmem:[#allocation11_spill] sm:$0xff] %v5464_v11  ;;  %9104 = vst [vmem:[#allocation12_spill] sm:$0xff] %v5471_v15 }
  0x28   : > { %319 = vst.msk [vmem:[#allocation2 + $0x88] sm:$0xff] %vm238_vm0, %v5462_v10  ;;  %9105 = vst [vmem:[#allocation13_spill] sm:$0xff] %v5476_v16  ;;  %v5549_v31 = vld [vmem:[#allocation2 + $0x48] sm:$0xff] }
  0x29   : > { %9106 = vst [vmem:[#allocation14_spill] sm:$0xff] %v5479_v17  ;;  %320 = vst.msk [vmem:[#allocation2 + $0x90] sm:$0xff] %vm238_vm0, %v5471_v15  ;;  %v5551_v32 = vld [vmem:[#allocation2 + $0x50] sm:$0xff] }
  0x2a   : > { %321 = vst.msk [vmem:[#allocation2 + $0xa8] sm:$0xff] %vm238_vm0, %v5476_v16  ;;  %322 = vst.msk [vmem:[#allocation2 + $0xb0] sm:$0xff] %vm238_vm0, %v5479_v17  ;;  %v5553_v33 = vld [vmem:[#allocation2 + $0x28] sm:$0xff]  ;;  %v5563_v34 = vpack.i.bf16 %v5551_v32, %v5549_v31  ;;  %v5731_v17 = vld [vmem:[%s5425_s24 + $0xf0] sm:$0xff] }
  0x2b   : > { %9107 = vst [vmem:[#allocation15_spill] sm:$0xff] %v5488_v18  ;;  %9108 = vst [vmem:[#allocation16_spill] sm:$0xff] %v5491_v19  ;;  %v511_v7 = vrot.slane %v5553_v33, 1 }
  0x2c   : > { %9109 = vst [vmem:[#allocation17_spill] sm:$0xff] %v5494_v20  ;;  %323 = vst.msk [vmem:[#allocation2 + $0xc8] sm:$0xff] %vm238_vm0, %v5488_v18  ;;  %v5565_v35 = vld [vmem:[#allocation2 + $0x30] sm:$0xff]  ;;  %v5567_v36 = vld [vmem:[#allocation2 + $0x68] sm:$0xff]  ;;  %4032 = vrot.lane.b32.xlu1 %v5563_v34, %s5321_s25 }
  0x2d   : > { %324 = vst.msk [vmem:[#allocation2 + $0xd0] sm:$0xff] %vm238_vm0, %v5491_v19  ;;  %9110 = vst [vmem:[#allocation18_spill] sm:$0xff] %v5503_v21  ;;  %v5569_v37 = vld [vmem:[#allocation2 + $0x70] sm:$0xff]  ;;  %v5573_v38 = vpack.i.bf16 %v5565_v35, %v5553_v33  ;;  %v5734_v19 = vld [vmem:[%s5425_s24 + $0xf8] sm:$0xff]  ;;  %v529_v15 = vrot.slane %v5565_v35, 1 }
  0x2e   : > { %325 = vst.msk [vmem:[#allocation2 + $0xe8] sm:$0xff] %vm238_vm0, %v5494_v20  ;;  %9111 = vst [vmem:[#allocation19_spill] sm:$0xff] %v5508_v22  ;;  %v5587_v42 = vpack.i.bf16 %v5569_v37, %v5567_v36 }
  0x2f   : > { %9112 = vst [vmem:[#allocation20_spill] sm:$0xff] %v5511_v23  ;;  %9113 = vst [vmem:[#allocation21_spill] sm:$0xff] %v5517_v24  ;;  %v5575_v39 = vld [vmem:[#allocation2 + $0x88] sm:$0xff]  ;;  %4027 = vrot.lane.b32.xlu0 %v5573_v38, %s5321_s25  ;;  %v549_v24 = vrot.slane %v360_v4, 1 }
  0x30   : > { %326 = vst.msk [vmem:[#allocation2 + $0xf0] sm:$0xff] %vm238_vm0, %v5503_v21  ;;  %327 = vst.msk [vmem:[#allocation2 + $0x108] sm:$0xff] %vm238_vm0, %v5508_v22  ;;  %v5589_v43 = vld [vmem:[#allocation2 + $0x90] sm:$0xff]  ;;  %4037 = vrot.lane.b32.xlu1 %v5587_v42, %s5321_s25  ;;  %v352_v21 = vld [vmem:[#allocation2 + $0x38] sm:$0xff]  ;;  %v530_v22 = vrot.slane %v5551_v32, 1 }
  0x31   : > { %328 = vst.msk [vmem:[#allocation2 + $0x110] sm:$0xff] %vm238_vm0, %v5511_v23  ;;  %9114 = vst [vmem:[#allocation22_spill] sm:$0xff] %v5526_v25  ;;  %v5599_v44 = vpack.i.bf16 %v5589_v43, %v5575_v39  ;;  %v5601_v45 = vld [vmem:[#allocation2 + $0xa8] sm:$0xff]  ;;  %v5603_v46 = vld [vmem:[#allocation2 + $0xb0] sm:$0xff]  ;;  %v547_v6 = vrot.slane %v352_v21, 1 }
  0x32   : > { %9115 = vst [vmem:[#allocation23_spill] sm:$0xff] %v5529_v26  ;;  %9116 = vst [vmem:[#allocation24_spill] sm:$0xff] %v5532_v27  ;;  %v5615_v50 = vpack.i.bf16 %v5603_v46, %v5601_v45  ;;  %v356_v23 = vld [vmem:[#allocation2 + $0x58] sm:$0xff] }
  0x33   : > { %329 = vst.msk [vmem:[#allocation2 + $0x128] sm:$0xff] %vm238_vm0, %v5526_v25  ;;  %330 = vst.msk [vmem:[#allocation2 + $0x130] sm:$0xff] %vm238_vm0, %v5529_v26  ;;  %v5605_v47 = vld [vmem:[#allocation2 + $0xc8] sm:$0xff]  ;;  %4042 = vrot.lane.b32.xlu0 %v5599_v44, %s5321_s25  ;;  %v510_v26 = vrot.slane %v5451_v8, 1  ;;  %v548_v3 = vrot.slane %v356_v23, 1 }
  0x34   : > { %9117 = vst [vmem:[#allocation25_spill] sm:$0xff] %v5539_v28  ;;  %331 = vst.msk [vmem:[#allocation2 + $0x148] sm:$0xff] %vm238_vm0, %v5532_v27  ;;  %v5607_v48 = vld [vmem:[#allocation2 + $0xd0] sm:$0xff]  ;;  %4047 = vrot.lane.b32.xlu1 %v5615_v50, %s5321_s25 }
  0x35   : > { %9118 = vst [vmem:[#allocation26_spill] sm:$0xff] %v5544_v29  ;;  %9119 = vst [vmem:[#allocation27_spill] sm:$0xff] %v5547_v30  ;;  %v5609_v49 = vld [vmem:[#allocation2 + $0xe8] sm:$0xff]  ;;  %v5627_v54 = vpack.i.bf16 %v5607_v48, %v5605_v47  ;;  %v567_v8 = vsel %vm564_vm2, %v530_v22, %v548_v3  ;;  %v516_v3 = vrot.slane %v5605_v47, 1 }
  0x36   : > { %332 = vst.msk [vmem:[#allocation2 + $0x150] sm:$0xff] %vm238_vm0, %v5539_v28  ;;  %333 = vst.msk [vmem:[#allocation2 + $0x168] sm:$0xff] %vm238_vm0, %v5544_v29  ;;  %v9238_v11 = vld [vmem:[#allocation21_spill] sm:$0xff] }
  0x37   : > { %334 = vst.msk [vmem:[#allocation2 + $0x170] sm:$0xff] %vm238_vm0, %v5547_v30  ;;  %9120 = vst [vmem:[#allocation28_spill] sm:$0xff] %v5578_v40  ;;  %v5617_v51 = vld [vmem:[#allocation2 + $0xf0] sm:$0xff]  ;;  %v5619_v52 = vld [vmem:[#allocation2 + $0x108] sm:$0xff]  ;;  %4052 = vrot.lane.b32.xlu0 %v5627_v54, %s5321_s25 }
  0x38   : > { %9121 = vst [vmem:[#allocation29_spill] sm:$0xff] %v5581_v41  ;;  %9122 = vst [vmem:[#allocation30_spill] sm:$0xff] %v5587_v42  ;;  %v5621_v53 = vld [vmem:[#allocation2 + $0x110] sm:$0xff]  ;;  %v5663_v61 = vpack.i.bf16 %v5617_v51, %v5609_v49  ;;  %v396_v42 = vld [vmem:[#allocation2 + $0x198] sm:$0xff] }
  0x39   : > { %335 = vst.msk [vmem:[#allocation2 + $0x188] sm:$0xff] %vm238_vm0, %v5578_v40  ;;  %336 = vst.msk [vmem:[#allocation2 + $0x190] sm:$0xff] %vm238_vm0, %v5581_v41  ;;  %v5669_v62 = vpack.i.bf16 %v5621_v53, %v5619_v52  ;;  %v528_v40 = vrot.slane %v5453_v9, 1  ;;  %v512_v9 = vrot.slane %v5549_v31, 1 }
  0x3a   : > { %9123 = vst [vmem:[#allocation31_spill] sm:$0xff] %v5599_v44  ;;  %9124 = vst [vmem:[#allocation32_spill] sm:$0xff] %v5615_v50  ;;  %v5671_v63 = vld [vmem:[#allocation2 + $0x128] sm:$0xff]  ;;  %v5673_v0 = vld [vmem:[#allocation2 + $0x130] sm:$0xff]  ;;  %4057 = vrot.lane.b32.xlu1 %v5663_v61, %s5321_s25 }
  0x3b   : > { %9125 = vst [vmem:[#allocation33_spill] sm:$0xff] %v5627_v54  ;;  %9126 = vst [vmem:[#allocation34_spill] sm:$0xff] %v5630_v55  ;;  %v5675_v1 = vld [vmem:[#allocation2 + $0x148] sm:$0xff]  ;;  %v5683_v13 = vpack.i.bf16 %v5673_v0, %v5671_v63  ;;  %4062 = vrot.lane.b32.xlu0 %v5669_v62, %s5321_s25  ;;  %v583_v5 = vsel %vm564_vm2, %v510_v26, %v528_v40  ;;  %v566_v26 = vsel %vm564_vm2, %v529_v15, %v547_v6 }
  0x3c   : > { %9127 = vst [vmem:[#allocation35_spill] sm:$0xff] %v5633_v56  ;;  %9128 = vst [vmem:[#allocation36_spill] sm:$0xff] %v5636_v57 }
  0x3d   : > { %337 = vst.msk [vmem:[#allocation2 + $0x1a8] sm:$0xff] %vm238_vm0, %v5630_v55  ;;  %338 = vst.msk [vmem:[#allocation2 + $0x1b0] sm:$0xff] %vm238_vm0, %v5633_v56  ;;  %v5677_v12 = vld [vmem:[#allocation2 + $0x150] sm:$0xff]  ;;  %v348_v55 = vld [vmem:[#allocation2 + $0x18] sm:$0xff] }
  0x3e   : > { %9129 = vst [vmem:[#allocation37_spill] sm:$0xff] %v5643_v58  ;;  %339 = vst.msk [vmem:[#allocation2 + $0x1c8] sm:$0xff] %vm238_vm0, %v5636_v57  ;;  %v5689_v14 = vpack.i.bf16 %v5677_v12, %v5675_v1  ;;  %4067 = vrot.lane.b32.xlu1 %v5683_v13, %s5321_s25  ;;  %v546_v27 = vrot.slane %v348_v55, 1 }
  0x3f   : > { %9130 = vst [vmem:[#allocation38_spill] sm:$0xff] %v5648_v59  ;;  %9131 = vst [vmem:[#allocation39_spill] sm:$0xff] %v5651_v60 }
  0x40   : > { %340 = vst.msk [vmem:[#allocation2 + $0x1d0] sm:$0xff] %vm238_vm0, %v5643_v58  ;;  %341 = vst.msk [vmem:[#allocation2 + $0x1e8] sm:$0xff] %vm238_vm0, %v5648_v59  ;;  %v5693_v59 = vld [vmem:[#allocation2 + $0x170] sm:$0xff]  ;;  %v5695_v56 = vld [vmem:[#allocation2 + $0x188] sm:$0xff]  ;;  %4072 = vrot.lane.b32.xlu0 %v5689_v14, %s5321_s25  ;;  %v565_v10 = vsel %vm564_vm2, %v528_v40, %v546_v27  ;;  %v531_v27 = vrot.slane %v5569_v37, 1  ;;  %v584_v40 = vsel %vm564_vm2, %v511_v7, %v529_v15 }
  0x41   : > { %342 = vst.msk [vmem:[#allocation2 + $0x1f0] sm:$0xff] %vm238_vm0, %v5651_v60  ;;  %9132 = vst [vmem:[#allocation40_spill] sm:$0xff] %v5663_v61  ;;  %v5691_v60 = vld [vmem:[#allocation2 + $0x168] sm:$0xff]  ;;  %v5697_v58 = vld [vmem:[#allocation2 + $0x190] sm:$0xff]  ;;  %v4101_v23 = vpack.i.bf16 %v565_v10, %v583_v5  ;;  %v533_v5 = vrot.slane %v5603_v46, 1  ;;  %v5780_v6 = vpack.i.bf16 %v566_v26, %v584_v40  ;;  %v534_v10 = vrot.slane %v5607_v48, 1 }
  0x42   : > { %9133 = vst [vmem:[#allocation41_spill] sm:$0xff] %v5669_v62  ;;  %9134 = vst [vmem:[#allocation42_spill] sm:$0xff] %v5683_v13  ;;  %v5703_v57 = vpack.i.bf16 %v5693_v59, %v5691_v60  ;;  %v5709_v30 = vpack.i.bf16 %v5697_v58, %v5695_v56  ;;  %v568_v7 = vsel %vm564_vm2, %v531_v27, %v549_v24  ;;  %v518_v40 = vrot.slane %v5619_v52, 1 }
  0x43   : > { %9135 = vst [vmem:[#allocation43_spill] sm:$0xff] %v5689_v14  ;;  %9139 = vst [vmem:[#allocation47_spill] sm:$0xff] %v5731_v17  ;;  %v372_v14 = vld [vmem:[#allocation2 + $0xd8] sm:$0xff]  ;;  %v517_v24 = vrot.slane %v5609_v49, 1 }
  0x44   : > { %9136 = vst [vmem:[#allocation44_spill] sm:$0xff] %v5703_v57  ;;  %9137 = vst [vmem:[#allocation45_spill] sm:$0xff] %v5709_v30  ;;  %v5711_v41 = vld [vmem:[#allocation2 + $0x1a8] sm:$0xff]  ;;  %v5713_v29 = vld [vmem:[#allocation2 + $0x1b0] sm:$0xff]  ;;  %4077 = vrot.lane.b32.xlu1 %v5703_v57, %s5321_s25  ;;  %4082 = vrot.lane.b32.xlu0 %v5709_v30, %s5321_s25  ;;  %v550_v30 = vrot.slane %v364_v2, 1 }
  0x45   : > { %v5717_v28 = vld [vmem:[#allocation2 + $0x1c8] sm:$0xff]  ;;  %v5726_v20 = vpack.i.bf16 %v5713_v29, %v5711_v41  ;;  %9140 = vst [vmem:[#allocation48_spill] sm:$0xff] %v5734_v19  ;;  %343 = vst.msk [vmem:[#allocation2 + $0x208] sm:$0xff] %vm238_vm0, %v5731_v17  ;;  %v585_v17 = vsel %vm564_vm2, %v512_v9, %v530_v22  ;;  %v514_v9 = vrot.slane %v5575_v39, 1  ;;  %v368_v57 = vld [vmem:[#allocation2 + $0xb8] sm:$0xff] }
  0x46   : > { %344 = vst.msk [vmem:[#allocation2 + $0x210] sm:$0xff] %vm238_vm0, %v5734_v19  ;;  %v513_v19 = vrot.slane %v5567_v36, 1  ;;  %9143 = vst [vmem:[#allocation51_spill] sm:$0xff] %v5780_v6  ;;  %v5786_v2 = vpack.i.bf16 %v567_v8, %v585_v17  ;;  %v551_v15 = vrot.slane %v368_v57, 1  ;;  %v380_v17 = vld [vmem:[#allocation2 + $0x118] sm:$0xff]  ;;  %v535_v57 = vrot.slane %v5617_v51, 1 }
  0x47   : > { %v5719_v25 = vld [vmem:[#allocation2 + $0x1d0] sm:$0xff]  ;;  %9138 = vst [vmem:[#allocation46_spill] sm:$0xff] %v5726_v20  ;;  %v5742_v16 = vld [vmem:[#allocation2 + $0x1e8] sm:$0xff]  ;;  %v554_v54 = vrot.slane %v380_v17, 1  ;;  %v540_v17 = vrot.slane %v5697_v58, 1 }
  0x48   : > { %v5740_v55 = vpack.i.bf16 %v5719_v25, %v5717_v28  ;;  %v5744_v18 = vld [vmem:[#allocation2 + $0x1f0] sm:$0xff]  ;;  %4087 = vrot.lane.b32.xlu1 %v5726_v20, %s5321_s25  ;;  %v532_v20 = vrot.slane %v5589_v43, 1  ;;  %v586_v4 = vsel %vm564_vm2, %v513_v19, %v531_v27  ;;  %v552_v19 = vrot.slane %v372_v14, 1 }
  0x49   : > { %v5760_v21 = vpack.i.bf16 %v5744_v18, %v5742_v16  ;;  %v520_v14 = vrot.slane %v5675_v1, 1  ;;  %v538_v27 = vrot.slane %v5677_v12, 1  ;;  %v570_v62 = vsel %vm564_vm2, %v533_v5, %v551_v15  ;;  %v392_v15 = vld [vmem:[#allocation2 + $0x178] sm:$0xff] }
  0x4a   : > { %9141 = vst [vmem:[#allocation49_spill] sm:$0xff] %v5740_v55  ;;  %4092 = vrot.lane.b32.xlu0 %v5740_v55, %s5321_s25  ;;  %v515_v55 = vrot.slane %v5601_v45, 1  ;;  %v569_v22 = vsel %vm564_vm2, %v532_v20, %v550_v30  ;;  %v587_v26 = vsel %vm564_vm2, %v514_v9, %v532_v20  ;;  %v5803_v30 = vpack.i.bf16 %v568_v7, %v586_v4  ;;  %v388_v20 = vld [vmem:[#allocation2 + $0x158] sm:$0xff] }
  0x4b   : > { %9142 = vst [vmem:[#allocation50_spill] sm:$0xff] %v5760_v21  ;;  %v384_v9 = vld [vmem:[#allocation2 + $0x138] sm:$0xff]  ;;  %v5810_v13 = vpack.i.bf16 %v569_v22, %v587_v26  ;;  %v537_v4 = vrot.slane %v5673_v0, 1  ;;  %v571_v7 = vsel %vm564_vm2, %v534_v10, %v552_v19  ;;  %v556_v50 = vrot.slane %v388_v20, 1 }
  0x4c   : > { %4097 = vrot.lane.b32.xlu1 %v5760_v21, %s5321_s25  ;;  %v376_v21 = vld [vmem:[#allocation2 + $0xf8] sm:$0xff]  ;;  %v588_v8 = vsel %vm564_vm2, %v515_v55, %v533_v5  ;;  %v519_v55 = vrot.slane %v5671_v63, 1  ;;  %v555_v44 = vrot.slane %v384_v9, 1  ;;  %v590_v5 = vsel %vm564_vm2, %v517_v24, %v535_v57 }
  0x4d   : > { %v553_v61 = vrot.slane %v376_v21, 1  ;;  %v5821_v22 = vpack.i.bf16 %v570_v62, %v588_v8  ;;  %v521_v26 = vrot.slane %v5691_v60, 1  ;;  %v593_v62 = vsel %vm564_vm2, %v520_v14, %v538_v27 }
  0x4e   : > { %4102 = vrot.lane.b32.xlu0 %v4101_v23, %s5322_s26  ;;  %v536_v23 = vrot.slane %v5621_v53, 1  ;;  %v592_v19 = vsel %vm564_vm2, %v519_v55, %v537_v4  ;;  %v522_v8 = vrot.slane %v5695_v56, 1  ;;  %v558_v24 = vrot.slane %v396_v42, 1  ;;  %v404_v42 = vld [vmem:[#allocation2 + $0x1d8] sm:$0xff] }
  0x4f   : > { %v557_v20 = vrot.slane %v392_v15, 1  ;;  %v542_v15 = vrot.slane %v5719_v25, 1 }
  0x50   : > { %4107 = vrot.lane.b32.xlu1 %v5780_v6, %s5322_s26  ;;  %v589_v6 = vsel %vm564_vm2, %v516_v3, %v534_v10  ;;  %v591_v21 = vsel %vm564_vm2, %v518_v40, %v536_v23  ;;  %v572_v10 = vsel %vm564_vm2, %v535_v57, %v553_v61  ;;  %v573_v40 = vsel %vm564_vm2, %v536_v23, %v554_v54  ;;  %v400_v23 = vld [vmem:[#allocation2 + $0x1b8] sm:$0xff] }
  0x51   : > { %v5830_v3 = vpack.i.bf16 %v571_v7, %v589_v6  ;;  %v575_v6 = vsel %vm564_vm2, %v538_v27, %v556_v50  ;;  %v574_v61 = vsel %vm564_vm2, %v537_v4, %v555_v44  ;;  %v539_v57 = vrot.slane %v5693_v59, 1  ;;  %v408_v4 = vld [vmem:[#allocation2 + $0x1f8] sm:$0xff]  ;;  %v349_v7 = vld [vmem:[#allocation2 + $0x20] sm:$0xff] }
  0x52   : > { %4112 = vrot.lane.b32.xlu0 %v5786_v2, %s5322_s26  ;;  %v5849_v14 = vpack.i.bf16 %v572_v10, %v590_v5  ;;  %v5853_v54 = vpack.i.bf16 %v573_v40, %v591_v21  ;;  %v436_v50 = vrot.slane %v5553_v33, 7  ;;  %v5856_v27 = vpack.i.bf16 %v575_v6, %v593_v62 }
  0x53   : > { %v5858_v44 = vpack.i.bf16 %v574_v61, %v592_v19  ;;  %v577_v9 = vsel %vm564_vm2, %v540_v17, %v558_v24  ;;  %v595_v55 = vsel %vm564_vm2, %v522_v8, %v540_v17  ;;  %v576_v21 = vsel %vm564_vm2, %v539_v57, %v557_v20  ;;  %v353_v61 = vld [vmem:[#allocation2 + $0x40] sm:$0xff] }
  0x54   : > { %4117 = vrot.lane.b32.xlu1 %v5803_v30, %s5322_s26  ;;  %9144 = vst [vmem:[#allocation52_spill] sm:$0xff] %v5853_v54  ;;  %v594_v5 = vsel %vm564_vm2, %v521_v26, %v539_v57  ;;  %v524_v33 = vrot.slane %v5717_v28, 1  ;;  %v560_v10 = vrot.slane %v404_v42, 1  ;;  %v523_v62 = vrot.slane %v5711_v41, 1  ;;  %v357_v42 = vld [vmem:[#allocation2 + $0x60] sm:$0xff] }
  0x55   : > { %v541_v19 = vrot.slane %v5713_v29, 1  ;;  %v559_v40 = vrot.slane %v400_v23, 1  ;;  %v525_v8 = vrot.slane %v5742_v16, 1  ;;  %v543_v26 = vrot.slane %v5744_v18, 1 }
  0x56   : > { %4122 = vrot.lane.b32.xlu0 %v5810_v13, %s5322_s26  ;;  %v561_v17 = vrot.slane %v408_v4, 1  ;;  %v418_v24 = vrot.slane %v349_v7, 7  ;;  %v454_v6 = vrot.slane %v5565_v35, 7  ;;  %v5879_v57 = vpack.i.bf16 %v577_v9, %v595_v55  ;;  %v361_v9 = vld [vmem:[#allocation2 + $0x80] sm:$0xff] }
  0x57   : > { %v5881_v20 = vpack.i.bf16 %v576_v21, %v594_v5  ;;  %v579_v23 = vsel %vm564_vm2, %v542_v15, %v560_v10  ;;  %v578_v4 = vsel %vm564_vm2, %v541_v19, %v559_v40  ;;  %v596_v35 = vsel %vm564_vm2, %v523_v62, %v541_v19 }
  0x58   : > { %4127 = vrot.lane.b32.xlu1 %v5821_v22, %s5322_s26  ;;  %v580_v55 = vsel %vm564_vm2, %v543_v26, %v561_v17  ;;  %v598_v7 = vsel %vm564_vm2, %v525_v8, %v543_v26  ;;  %v5901_v21 = vsel %vm473_vm1, %v418_v24, %v436_v50  ;;  %v419_v5 = vrot.slane %v353_v61, 7 }
  0x59   : > { %9145 = vst [vmem:[#allocation53_spill] sm:$0xff] %v5901_v21  ;;  %v455_v10 = vrot.slane %v5551_v32, 7  ;;  %v420_v62 = vrot.slane %v357_v42, 7  ;;  %v438_v19 = vrot.slane %v5567_v36, 7  ;;  %v456_v40 = vrot.slane %v5569_v37, 7  ;;  %v365_v32 = vld [vmem:[#allocation2 + $0xa0] sm:$0xff] }
  0x5a   : > { %4132 = vrot.lane.b32.xlu0 %v5830_v3, %s5322_s26  ;;  %v421_v17 = vrot.slane %v361_v9, 7  ;;  %v439_v8 = vrot.slane %v5575_v39, 7  ;;  %v5914_v26 = vpack.i.bf16 %v578_v4, %v596_v35  ;;  %v5921_v24 = vpack.i.bf16 %v580_v55, %v598_v7  ;;  %v369_v39 = vld [vmem:[#allocation2 + $0xc0] sm:$0xff]  ;;  %v5947_v4 = vld [vmem:[#allocation2 + $0x210] sm:$0xff]  ;;  %v412_v35 = vld [vmem:[#allocation2 + $0x218] sm:$0xff] }
  0x5b   : > { %v5939_v61 = vsel %vm473_vm1, %v420_v62, %v438_v19  ;;  %v422_v55 = vrot.slane %v365_v32, 7  ;;  %v440_v7 = vrot.slane %v5601_v45, 7  ;;  %v562_v32 = vrot.slane %v412_v35, 1  ;;  %v377_v35 = vld [vmem:[#allocation2 + $0x100] sm:$0xff] }
  0x5c   : > { %4137 = vrot.lane.b32.xlu1 %v5849_v14, %s5322_s26  ;;  %9148 = vst [vmem:[#allocation56_spill] sm:$0xff] %v5939_v61  ;;  %v5943_v42 = vsel %vm473_vm1, %v421_v17, %v439_v8 }
  0x5d   : > { %9149 = vst [vmem:[#allocation57_spill] sm:$0xff] %v5943_v42 }
  0x5e   : > { %4142 = vrot.lane.b32.xlu0 %v5853_v54, %s5322_s26  ;;  %v597_v54 = vsel %vm564_vm2, %v524_v33, %v542_v15  ;;  %v5905_v33 = vsel %vm473_vm1, %v436_v50, %v454_v6  ;;  %v437_v15 = vrot.slane %v5549_v31, 7  ;;  %v457_v50 = vrot.slane %v5589_v43, 7  ;;  %v409_v6 = vld [vmem:[#allocation2 + $0x200] sm:$0xff] }
  0x5f   : > { %9146 = vst [vmem:[#allocation54_spill] sm:$0xff] %v5905_v33  ;;  %v5919_v31 = vpack.i.bf16 %v579_v23, %v597_v54  ;;  %v4181_v36 = vpack.i.bf16 %v5905_v33, %v5901_v21  ;;  %v5935_v54 = vsel %vm473_vm1, %v438_v19, %v456_v40  ;;  %v5945_v23 = vld [vmem:[#allocation2 + $0x208] sm:$0xff]  ;;  %v544_v19 = vrot.slane %v5947_v4, 1  ;;  %v373_v40 = vld [vmem:[#allocation2 + $0xe0] sm:$0xff] }
  0x60   : > { %4147 = vrot.lane.b32.xlu1 %v5858_v44, %s5322_s26  ;;  %v5927_v37 = vsel %vm473_vm1, %v437_v15, %v455_v10  ;;  %v5931_v43 = vsel %vm473_vm1, %v419_v5, %v437_v15  ;;  %9147 = vst [vmem:[#allocation55_spill] sm:$0xff] %v5935_v54  ;;  %v5953_v9 = vsel %vm473_vm1, %v439_v8, %v457_v50  ;;  %v458_v5 = vrot.slane %v5603_v46, 7 }
  0x61   : > { %9150 = vst [vmem:[#allocation58_spill] sm:$0xff] %v5953_v9  ;;  %v423_v15 = vrot.slane %v369_v39, 7  ;;  %v441_v10 = vrot.slane %v5605_v47, 7  ;;  %v526_v62 = vrot.slane %v5945_v23, 1  ;;  %v433_v17 = vrot.slane %v409_v6, 7 }
  0x62   : > { %4152 = vrot.lane.b32.xlu0 %v5856_v27, %s5322_s26  ;;  %v451_v8 = vrot.slane %v5945_v23, 7  ;;  %v469_v50 = vrot.slane %v5947_v4, 7  ;;  %v5966_v45 = vpack.i.bf16 %v5927_v37, %v5931_v43  ;;  %v5970_v46 = vpack.i.bf16 %v5935_v54, %v5939_v61 }
  0x63   : > { %v459_v47 = vrot.slane %v5607_v48, 7  ;;  %v5977_v39 = vpack.i.bf16 %v5953_v9, %v5943_v42  ;;  %v5981_v6 = vsel %vm473_vm1, %v422_v55, %v440_v7  ;;  %v581_v33 = vsel %vm564_vm2, %v544_v19, %v562_v32  ;;  %v381_v9 = vld [vmem:[#allocation2 + $0x120] sm:$0xff] }
  0x64   : > { %4157 = vrot.lane.b32.xlu1 %v5881_v20, %s5322_s26  ;;  %9151 = vst [vmem:[#allocation59_spill] sm:$0xff] %v5981_v6  ;;  %v599_v61 = vsel %vm564_vm2, %v526_v62, %v544_v19  ;;  %v5990_v48 = vsel %vm473_vm1, %v440_v7, %v458_v5  ;;  %v5994_v42 = vsel %vm473_vm1, %v423_v15, %v441_v10  ;;  %v424_v55 = vrot.slane %v373_v40, 7  ;;  %v385_v40 = vld [vmem:[#allocation2 + $0x140] sm:$0xff] }
  0x65   : > { %9152 = vst [vmem:[#allocation60_spill] sm:$0xff] %v5994_v42  ;;  %v5996_v54 = vpack.i.bf16 %v581_v33, %v599_v61  ;;  %v442_v32 = vrot.slane %v5609_v49, 7  ;;  %v460_v21 = vrot.slane %v5617_v51, 7  ;;  %v490_v62 = vsel %vm473_vm1, %v451_v8, %v469_v50 }
  0x66   : > { %4162 = vrot.lane.b32.xlu0 %v5879_v57, %s5322_s26  ;;  %v6006_v7 = vsel %vm473_vm1, %v441_v10, %v459_v47  ;;  %v425_v5 = vrot.slane %v377_v35, 7  ;;  %v443_v15 = vrot.slane %v5619_v52, 7  ;;  %v461_v49 = vrot.slane %v5621_v53, 7 }
  0x67   : > { %9153 = vst [vmem:[#allocation61_spill] sm:$0xff] %v6006_v7  ;;  %v426_v51 = vrot.slane %v381_v9, 7  ;;  %v444_v33 = vrot.slane %v5671_v63, 7  ;;  %v462_v61 = vrot.slane %v5673_v0, 7  ;;  %v6020_v10 = vpack.i.bf16 %v5990_v48, %v5981_v6  ;;  %v389_v9 = vld [vmem:[#allocation2 + $0x160] sm:$0xff] }
  0x68   : > { %4167 = vrot.lane.b32.xlu1 %v5914_v26, %s5322_s26  ;;  %v6024_v52 = vsel %vm473_vm1, %v442_v32, %v460_v21  ;;  %v6028_v53 = vsel %vm473_vm1, %v424_v55, %v442_v32  ;;  %v6032_v63 = vpack.i.bf16 %v6006_v7, %v5994_v42  ;;  %v6036_v0 = vsel %vm473_vm1, %v425_v5, %v443_v15  ;;  %v397_v5 = vld [vmem:[#allocation2 + $0x1a0] sm:$0xff] }
  0x69   : > { %9154 = vst [vmem:[#allocation62_spill] sm:$0xff] %v6024_v52  ;;  %9155 = vst [vmem:[#allocation63_spill] sm:$0xff] %v6028_v53  ;;  %v6043_v21 = vsel %vm473_vm1, %v443_v15, %v461_v49  ;;  %v6047_v50 = vsel %vm473_vm1, %v444_v33, %v462_v61  ;;  %v6051_v47 = vsel %vm473_vm1, %v426_v51, %v444_v33  ;;  %v463_v35 = vrot.slane %v5677_v12, 7 }
  0x6a   : > { %4172 = vrot.lane.b32.xlu0 %v5919_v31, %s5322_s26  ;;  %9156 = vst [vmem:[#allocation64_spill] sm:$0xff] %v6036_v0  ;;  %9157 = vst [vmem:[#allocation65_spill] sm:$0xff] %v6043_v21  ;;  %v428_v55 = vrot.slane %v389_v9, 7  ;;  %v446_v32 = vrot.slane %v5691_v60, 7  ;;  %v6064_v15 = vpack.i.bf16 %v6043_v21, %v6036_v0  ;;  %v6068_v12 = vpack.i.bf16 %v6047_v50, %v6051_v47  ;;  %v9184_v21 = vld [vmem:[#allocation50_spill] sm:$0xff] }
  0x6b   : > { %9158 = vst [vmem:[#allocation66_spill] sm:$0xff] %v6047_v50  ;;  %9159 = vst [vmem:[#allocation67_spill] sm:$0xff] %v6051_v47  ;;  %v447_v51 = vrot.slane %v5695_v56, 7  ;;  %v465_v33 = vrot.slane %v5697_v58, 7  ;;  %v430_v9 = vrot.slane %v397_v5, 7  ;;  %v405_v56 = vld [vmem:[#allocation2 + $0x1e0] sm:$0xff]  ;;  %v6216_v0 = vpack.i.bf16 %v5947_v4, %v5945_v23 }
  0x6c   : > { %4177 = vrot.lane.b32.xlu1 %v5921_v24, %s5322_s26  ;;  %v449_v5 = vrot.slane %v5717_v28, 7  ;;  %v416_v47 = vld [vmem:[#allocation2 + $0x238] sm:$0xff]  ;;  %v9183_v50 = vld [vmem:[#allocation49_spill] sm:$0xff] }
  0x6e   : > { %4182 = vrot.lane.b32.xlu0 %v4181_v36, %s5323_s27  ;;  %v508_v36 = vsel %vm473_vm1, %v433_v17, %v451_v8  ;;  %v427_v17 = vrot.slane %v385_v40, 7  ;;  %v445_v8 = vrot.slane %v5675_v1, 7  ;;  %v6058_v1 = vpack.i.bf16 %v6024_v52, %v6028_v53 }
  0x6f   : > { %v6009_v19 = vpack.i.bf16 %v490_v62, %v508_v36  ;;  %v464_v62 = vrot.slane %v5693_v59, 7  ;;  %v393_v36 = vld [vmem:[#allocation2 + $0x180] sm:$0xff]  ;;  %v6090_v40 = vsel %vm473_vm1, %v428_v55, %v446_v32  ;;  %v6106_v55 = vsel %vm473_vm1, %v447_v51, %v465_v33 }
  0x70   : > { %4187 = vrot.lane.b32.xlu1 %v5966_v45, %s5323_s27  ;;  %v6072_v49 = vsel %vm473_vm1, %v427_v17, %v445_v8  ;;  %v6078_v59 = vsel %vm473_vm1, %v445_v8, %v463_v35  ;;  %v429_v60 = vrot.slane %v393_v36, 7  ;;  %9163 = vst [vmem:[#allocation71_spill] sm:$0xff] %v6090_v40  ;;  %v448_v17 = vrot.slane %v5711_v41, 7  ;;  %v401_v35 = vld [vmem:[#allocation2 + $0x1c0] sm:$0xff]  ;;  %9164 = vst [vmem:[#allocation72_spill] sm:$0xff] %v6106_v55 }
  0x71   : > { %9160 = vst [vmem:[#allocation68_spill] sm:$0xff] %v6072_v49  ;;  %9161 = vst [vmem:[#allocation69_spill] sm:$0xff] %v6078_v59  ;;  %v6086_v61 = vsel %vm473_vm1, %v446_v32, %v464_v62  ;;  %v466_v8 = vrot.slane %v5713_v29, 7  ;;  %v6098_v58 = vpack.i.bf16 %v6078_v59, %v6072_v49  ;;  %v431_v36 = vrot.slane %v401_v35, 7  ;;  %v9173_v35 = vld [vmem:[#allocation31_spill] sm:$0xff]  ;;  %v6208_v49 = vld [vmem:[#allocation2 + $0x228] sm:$0xff] }
  0x72   : > { %4192 = vrot.lane.b32.xlu0 %v5970_v46, %s5323_s27  ;;  %9162 = vst [vmem:[#allocation70_spill] sm:$0xff] %v6086_v61  ;;  %v6102_v62 = vpack.i.bf16 %v6086_v61, %v6090_v40  ;;  %v6110_v41 = vsel %vm473_vm1, %v429_v60, %v447_v51  ;;  %v6116_v32 = vsel %vm473_vm1, %v430_v9, %v448_v17  ;;  %v467_v40 = vrot.slane %v5719_v25, 7  ;;  %v6210_v59 = vld [vmem:[#allocation2 + $0x230] sm:$0xff] }
  0x73   : > { %9165 = vst [vmem:[#allocation73_spill] sm:$0xff] %v6110_v41  ;;  %9166 = vst [vmem:[#allocation74_spill] sm:$0xff] %v6116_v32  ;;  %v6122_v33 = vsel %vm473_vm1, %v448_v17, %v466_v8  ;;  %v432_v61 = vrot.slane %v405_v56, 7  ;;  %v450_v60 = vrot.slane %v5742_v16, 7  ;;  %v468_v51 = vrot.slane %v5744_v18, 7  ;;  %v9174_v56 = vld [vmem:[#allocation32_spill] sm:$0xff] }
  0x74   : > { %4197 = vrot.lane.b32.xlu1 %v5977_v39, %s5323_s27  ;;  %9167 = vst [vmem:[#allocation75_spill] sm:$0xff] %v6122_v33  ;;  %v6130_v9 = vpack.i.bf16 %v6106_v55, %v6110_v41  ;;  %v6136_v25 = vpack.i.bf16 %v6122_v33, %v6116_v32  ;;  %v6140_v28 = vsel %vm473_vm1, %v449_v5, %v467_v40  ;;  %v9181_v32 = vld [vmem:[#allocation45_spill] sm:$0xff]  ;;  %v9182_v33 = vld [vmem:[#allocation46_spill] sm:$0xff]  ;;  %v563_v53 = vrot.slane %v416_v47, 1 }
  0x75   : > { %9168 = vst [vmem:[#allocation76_spill] sm:$0xff] %v6140_v28  ;;  %v6144_v16 = vsel %vm473_vm1, %v431_v36, %v449_v5  ;;  %v6148_v18 = vsel %vm473_vm1, %v450_v60, %v468_v51  ;;  %v6152_v17 = vsel %vm473_vm1, %v432_v61, %v450_v60  ;;  %v9172_v61 = vld [vmem:[#allocation30_spill] sm:$0xff]  ;;  %v9175_v36 = vld [vmem:[#allocation33_spill] sm:$0xff]  ;;  %v9176_v5 = vld [vmem:[#allocation40_spill] sm:$0xff] }
  0x76   : > { %4202 = vrot.lane.b32.xlu0 %v6020_v10, %s5323_s27  ;;  %9169 = vst [vmem:[#allocation77_spill] sm:$0xff] %v6144_v16  ;;  %9170 = vst [vmem:[#allocation78_spill] sm:$0xff] %v6148_v18  ;;  %v6158_v8 = vpack.i.bf16 %v6140_v28, %v6144_v16  ;;  %v6164_v40 = vpack.i.bf16 %v6148_v18, %v6152_v17  ;;  %v9178_v60 = vld [vmem:[#allocation42_spill] sm:$0xff]  ;;  %v9180_v18 = vld [vmem:[#allocation44_spill] sm:$0xff] }
  0x77   : > { %9171 = vst [vmem:[#allocation79_spill] sm:$0xff] %v6152_v17  ;;  %v9179_v17 = vld [vmem:[#allocation43_spill] sm:$0xff] }
  0x78   : > { %4207 = vrot.lane.b32.xlu1 %v6032_v63, %s5323_s27 }
  0x7a   : > { %4212 = vrot.lane.b32.xlu0 %v6058_v1, %s5323_s27 }
  0x7c   : > { %4217 = vrot.lane.b32.xlu1 %v6064_v15, %s5323_s27 }
  0x7e   : > { %4222 = vrot.lane.b32.xlu0 %v6068_v12, %s5323_s27 }
  0x80   : > { %4227 = vrot.lane.b32.xlu1 %v6098_v58, %s5323_s27 }
  0x82   : > { %4232 = vrot.lane.b32.xlu0 %v6102_v62, %s5323_s27 }
  0x84   : > { %4237 = vrot.lane.b32.xlu1 %v6130_v9, %s5323_s27 }
  0x86   : > { %4242 = vrot.lane.b32.xlu0 %v6136_v25, %s5323_s27 }
  0x88   : > { %4247 = vrot.lane.b32.xlu1 %v6158_v8, %s5323_s27  ;;  %v6190_v51 = vpop.permute.xlu0 %4022 }
  0x8a   : > { %4252 = vrot.lane.b32.xlu0 %v6164_v40, %s5323_s27 }
  0x8c   : > { %4257 = vrot.lane.b32.xlu1 %v6009_v19, %s5323_s27 }
  0x8e   : > { %4262 = vrot.lane.b32.xlu0 %v5573_v38, %s5324_s28  ;;  %v9177_v38 = vld [vmem:[#allocation41_spill] sm:$0xff] }
  0x90   : > { %4267 = vrot.lane.b32.xlu1 %v5563_v34, %s5324_s28 }
  0x92   : > { %4272 = vrot.lane.b32.xlu0 %v9172_v61, %s5324_s28 }
  0x94   : > { %4277 = vrot.lane.b32.xlu1 %v9173_v35, %s5324_s28 }
  0x96   : > { %4282 = vrot.lane.b32.xlu0 %v9174_v56, %s5324_s28 }
  0x98   : > { %4287 = vrot.lane.b32.xlu1 %v9175_v36, %s5324_s28 }
  0x9a   : > { %4292 = vrot.lane.b32.xlu0 %v9176_v5, %s5324_s28 }
  0x9c   : > { %4297 = vrot.lane.b32.xlu1 %v9177_v38, %s5324_s28 }
  0x9e   : > { %4302 = vrot.lane.b32.xlu0 %v9178_v60, %s5324_s28  ;;  %v6196_v16 = vpop.permute.xlu1 %4032 }
  0xa0   : > { %4307 = vrot.lane.b32.xlu1 %v9179_v17, %s5324_s28 }
  0xa1   : > { %v6198_v28 = vpop.permute.xlu0 %4027 }
  0xa2   : > { %4312 = vrot.lane.b32.xlu0 %v9180_v18, %s5324_s28  ;;  %v6204_v41 = vpop.permute.xlu1 %4037 }
  0xa4   : > { %4317 = vrot.lane.b32.xlu1 %v9181_v32, %s5324_s28  ;;  %v527_v32 = vrot.slane %v6208_v49, 1 }
  0xa5   : > { %v6206_v55 = vpop.permute.xlu0 %4042 }
  0xa6   : > { %4322 = vrot.lane.b32.xlu0 %v9182_v33, %s5324_s28  ;;  %v545_v33 = vrot.slane %v6210_v59, 1  ;;  %v6222_v52 = vpop.permute.xlu1 %4047 }
  0xa8   : > { %4327 = vrot.lane.b32.xlu1 %v9183_v50, %s5324_s28  ;;  %v6226_v42 = vsel %vm564_vm2, %v527_v32, %v545_v33  ;;  %v6232_v23 = vsel %vm564_vm2, %v545_v33, %v563_v53  ;;  %v9185_v50 = vld [vmem:[#allocation51_spill] sm:$0xff] }
  0xa9   : > { %v6228_v7 = vpop.permute.xlu0 %4052 }
  0xaa   : > { %4332 = vrot.lane.b32.xlu0 %v9184_v21, %s5324_s28 }
  0xac   : > { %4337 = vrot.lane.b32.xlu1 %v6216_v0, %s5324_s28  ;;  %v6240_v47 = vpop.permute.xlu1 %4057 }
  0xad   : > { %v6242_v32 = vpop.permute.xlu0 %4062 }
  0xae   : > { %4342 = vrot.lane.b32.xlu0 %v9185_v50, %s5325_s29  ;;  %9186 = vst [vmem:[#allocation30_spill] sm:$0xff] %v6242_v32 }
  0xb0   : > { %4347 = vrot.lane.b32.xlu1 %v5786_v2, %s5325_s29  ;;  %v6248_v53 = vpop.permute.xlu1 %4067 }
  0xb1   : > { %9187 = vst [vmem:[#allocation31_spill] sm:$0xff] %v6248_v53 }
  0xb2   : > { %4352 = vrot.lane.b32.xlu0 %v5803_v30, %s5325_s29  ;;  %v6250_v33 = vpop.permute.xlu0 %4072 }
  0xb3   : > { %9188 = vst [vmem:[#allocation32_spill] sm:$0xff] %v6250_v33  ;;  %v9193_v33 = vld [vmem:[#allocation52_spill] sm:$0xff] }
  0xb4   : > { %4357 = vrot.lane.b32.xlu1 %v5810_v13, %s5325_s29 }
  0xb6   : > { %4362 = vrot.lane.b32.xlu0 %v5821_v22, %s5325_s29  ;;  %v6256_v50 = vpop.permute.xlu1 %4077  ;;  %v6258_v4 = vpop.permute.xlu0 %4082 }
  0xb7   : > { %9189 = vst [vmem:[#allocation33_spill] sm:$0xff] %v6256_v50  ;;  %9190 = vst [vmem:[#allocation40_spill] sm:$0xff] %v6258_v4 }
  0xb8   : > { %4367 = vrot.lane.b32.xlu1 %v5830_v3, %s5325_s29 }
  0xba   : > { %4372 = vrot.lane.b32.xlu0 %v5849_v14, %s5325_s29  ;;  %v6264_v32 = vpop.permute.xlu1 %4087 }
  0xbb   : > { %9191 = vst [vmem:[#allocation41_spill] sm:$0xff] %v6264_v32 }
  0xbc   : > { %v6266_v53 = vpop.permute.xlu0 %4092  ;;  %4377 = vrot.lane.b32.xlu1 %v9193_v33, %s5325_s29 }
  0xbd   : > { %9192 = vst [vmem:[#allocation42_spill] sm:$0xff] %v6266_v53 }
  0xbe   : > { %4382 = vrot.lane.b32.xlu0 %v5858_v44, %s5325_s29  ;;  %v6272_v6 = vpop.permute.xlu1 %4097 }
  0xbf   : > { %9194 = vst [vmem:[#allocation43_spill] sm:$0xff] %v6272_v6 }
  0xc0   : > { %v6274_v50 = vpop.permute.xlu0 %4102  ;;  %4387 = vrot.lane.b32.xlu1 %v5856_v27, %s5325_s29 }
  0xc1   : > { %9195 = vst [vmem:[#allocation44_spill] sm:$0xff] %v6274_v50 }
  0xc2   : > { %4392 = vrot.lane.b32.xlu0 %v5881_v20, %s5325_s29  ;;  %v6280_v4 = vpop.permute.xlu1 %4107 }
  0xc3   : > { %9196 = vst [vmem:[#allocation45_spill] sm:$0xff] %v6280_v4 }
  0xc4   : > { %v6282_v32 = vpop.permute.xlu0 %4112  ;;  %4397 = vrot.lane.b32.xlu1 %v5879_v57, %s5325_s29 }
  0xc6   : > { %4402 = vrot.lane.b32.xlu0 %v5914_v26, %s5325_s29  ;;  %v6288_v53 = vpop.permute.xlu1 %4117 }
  0xc7   : > { %9197 = vst [vmem:[#allocation46_spill] sm:$0xff] %v6288_v53 }
  0xc8   : > { %v6290_v6 = vpop.permute.xlu0 %4122  ;;  %4407 = vrot.lane.b32.xlu1 %v5919_v31, %s5325_s29 }
  0xc9   : > { %9198 = vst [vmem:[#allocation49_spill] sm:$0xff] %v6290_v6 }
  0xca   : > { %4412 = vrot.lane.b32.xlu0 %v5921_v24, %s5325_s29  ;;  %v6296_v50 = vpop.permute.xlu1 %4127 }
  0xcb   : > { %9199 = vst [vmem:[#allocation50_spill] sm:$0xff] %v6296_v50 }
  0xcc   : > { %v6298_v4 = vpop.permute.xlu0 %4132  ;;  %4417 = vrot.lane.b32.xlu1 %v5996_v54, %s5325_s29 }
  0xcd   : > { %9200 = vst [vmem:[#allocation51_spill] sm:$0xff] %v6298_v4 }
  0xce   : > { %4422 = vrot.lane.b32.xlu0 %v5966_v45, %s5326_s30  ;;  %v6304_v53 = vpop.permute.xlu1 %4137 }
  0xcf   : > { %9201 = vst [vmem:[#allocation52_spill] sm:$0xff] %v6304_v53 }
  0xd0   : > { %v6306_v6 = vpop.permute.xlu0 %4142  ;;  %4427 = vrot.lane.b32.xlu1 %v5970_v46, %s5326_s30 }
  0xd2   : > { %4432 = vrot.lane.b32.xlu0 %v5977_v39, %s5326_s30  ;;  %v6312_v50 = vpop.permute.xlu1 %4147 }
  0xd4   : > { %v6314_v4 = vpop.permute.xlu0 %4152  ;;  %4437 = vrot.lane.b32.xlu1 %v6020_v10, %s5326_s30 }
  0xd6   : > { %4442 = vrot.lane.b32.xlu0 %v6032_v63, %s5326_s30  ;;  %v6320_v45 = vpop.permute.xlu1 %4157  ;;  %v413_v63 = vld [vmem:[#allocation2 + $0x220] sm:$0xff] }
  0xd7   : > { %9202 = vst [vmem:[#allocation80_spill] sm:$0xff] %v6320_v45 }
  0xd8   : > { %v6322_v53 = vpop.permute.xlu0 %4162  ;;  %4447 = vrot.lane.b32.xlu1 %v6058_v1, %s5326_s30  ;;  %v434_v1 = vrot.slane %v413_v63, 7 }
  0xda   : > { %4452 = vrot.lane.b32.xlu0 %v6064_v15, %s5326_s30  ;;  %v6328_v46 = vpop.permute.xlu1 %4167  ;;  %v452_v15 = vrot.slane %v6208_v49, 7 }
  0xdb   : > { %9203 = vst [vmem:[#allocation81_spill] sm:$0xff] %v6328_v46 }
  0xdc   : > { %v6330_v39 = vpop.permute.xlu0 %4172  ;;  %4457 = vrot.lane.b32.xlu1 %v6068_v12, %s5326_s30 }
  0xdd   : > { %9204 = vst [vmem:[#allocation82_spill] sm:$0xff] %v6330_v39  ;;  %v470_v39 = vrot.slane %v6210_v59, 7 }
  0xde   : > { %4462 = vrot.lane.b32.xlu0 %v6098_v58, %s5326_s30  ;;  %v6336_v10 = vpop.permute.xlu1 %4177 }
  0xdf   : > { %v491_v58 = vsel %vm473_vm1, %v452_v15, %v470_v39  ;;  %v5301_v39 = vld [vmem:[%s8911_s1 + $0x10] ss:$0 sps:$4 sm:$0x33]  }
  0xe0   : > { %v6338_v45 = vpop.permute.xlu0 %4182  ;;  %4467 = vrot.lane.b32.xlu1 %v6102_v62, %s5326_s30  ;;  %v509_v62 = vsel %vm473_vm1, %v434_v1, %v452_v15  ;;  %4002 = vmatprep.subr.msk.bf16.mxu0 %vm1824_vm3, %v5301_v39  ;;  %v5302_v15 = vld [vmem:[%s8911_s1 + $0x8] sm:$0xff]  }
  0xe2   : > { %4472 = vrot.lane.b32.xlu0 %v6130_v9, %s5326_s30  ;;  %v6346_v12 = vpop.permute.xlu1 %4187 }
  0xe4   : > { %v6348_v46 = vpop.permute.xlu0 %4192  ;;  %4477 = vrot.lane.b32.xlu1 %v6136_v25, %s5326_s30 }
  0xe5   : > { %9205 = vst [vmem:[#allocation83_spill] sm:$0xff] %v6348_v46  ;;  %v4496_v46 = vpack.i.bf16 %v491_v58, %v509_v62  ;;  %v5303_v58 = vld [vmem:[%s8911_s1] sm:$0xff]  }
  0xe6   : > { %4482 = vrot.lane.b32.xlu0 %v6158_v8, %s5326_s30  ;;  %v6358_v9 = vpop.permute.xlu1 %4197 }
  0xe8   : > { %v6360_v63 = vpop.permute.xlu0 %4202  ;;  %4487 = vrot.lane.b32.xlu1 %v6164_v40, %s5326_s30  ;;  %v1826_v40 = vsel %vm1824_vm3, %v5301_v39, 0 }
  0xe9   : > { %3927 = vmatpush3.bf16.msra.mxu0 %v1826_v40 }
  0xea   : > { %4492 = vrot.lane.b32.xlu0 %v6009_v19, %s5326_s30  ;;  %v6366_v25 = vpop.permute.xlu1 %4207  ;;  %3928 = vmatprep.subr.bf16.mxu0 %v5302_v15 }
  0xec   : > { %v6368_v8 = vpop.permute.xlu0 %4212  ;;  %4497 = vrot.lane.b32.xlu1 %v4496_v46, %s5326_s30 }
  0xed   : > { %3929 = vmatpush3.bf16.msra.mxu0 %v5302_v15 }
  0xee   : > { %4502 = vrot.lane.b32.xlu0 %v5563_v34, %s5327_s8  ;;  %v6378_v19 = vpop.permute.xlu1 %4217  ;;  %3930 = vmatprep.subr.bf16.mxu0 %v5303_v58 }
  0xef   : > { %9206 = vst [vmem:[#allocation84_spill] sm:$0xff] %v6378_v19 }
  0xf0   : > { %v6380_v1 = vpop.permute.xlu0 %4222  ;;  %4507 = vrot.lane.b32.xlu1 %v9172_v61, %s5327_s8 }
  0xf1   : > { %9207 = vst [vmem:[#allocation85_spill] sm:$0xff] %v6380_v1  ;;  %3931 = vmatpush3.bf16.msra.mxu0 %v5303_v58 }
  0xf2   : > { %4512 = vrot.lane.b32.xlu0 %v9173_v35, %s5327_s8  ;;  %v6389_v34 = vpop.permute.xlu1 %4227 }
  0xf3   : > { %9208 = vst [vmem:[#allocation86_spill] sm:$0xff] %v6389_v34 }
  0xf4   : > { %v6391_v46 = vpop.permute.xlu0 %4232  ;;  %4517 = vrot.lane.b32.xlu1 %v9174_v56, %s5327_s8 }
  0xf5   : > { %9209 = vst [vmem:[#allocation87_spill] sm:$0xff] %v6391_v46  ;;  %v9286_v46 = vld [vmem:[#allocation79_spill] sm:$0xff] }
  0xf6   : > { %4522 = vrot.lane.b32.xlu0 %v9175_v36, %s5327_s8  ;;  %v6400_v61 = vpop.permute.xlu1 %4237 }
  0xf7   : > { %9210 = vst [vmem:[#allocation88_spill] sm:$0xff] %v6400_v61 }
  0xf8   : > { %v6402_v35 = vpop.permute.xlu0 %4242  ;;  %4527 = vrot.lane.b32.xlu1 %v9176_v5, %s5327_s8 }
  0xf9   : > { %9211 = vst [vmem:[#allocation89_spill] sm:$0xff] %v6402_v35 }
  0xfa   : > { %4532 = vrot.lane.b32.xlu0 %v9177_v38, %s5327_s8  ;;  %v6408_v62 = vpop.permute.xlu1 %4247 }
  0xfb   : > { %9212 = vst [vmem:[#allocation90_spill] sm:$0xff] %v6408_v62  ;;  %v9283_v62 = vld [vmem:[#allocation46_spill] sm:$0xff] }
  0xfc   : > { %v6410_v39 = vpop.permute.xlu0 %4252  ;;  %4537 = vrot.lane.b32.xlu1 %v9178_v60, %s5327_s8  ;;  %v4120_v35 = vunpack.i.h.bf16 %v9283_v62 }
  0xfd   : > { %9213 = vst [vmem:[#allocation91_spill] sm:$0xff] %v6410_v39 }
  0xfe   : > { %4542 = vrot.lane.b32.xlu0 %v5786_v2, %s5328_s13  ;;  %v6416_v56 = vpop.permute.xlu1 %4257 }
  0xff   : > { %9214 = vst [vmem:[#allocation92_spill] sm:$0xff] %v6416_v56  ;;  %v9266_v56 = vld [vmem:[#allocation69_spill] sm:$0xff] }
 0x100   : > { %v6418_v36 = vpop.permute.xlu0 %4262  ;;  %4547 = vrot.lane.b32.xlu1 %v5803_v30, %s5328_s13 }
 0x101   : > { %9215 = vst [vmem:[#allocation93_spill] sm:$0xff] %v6418_v36  ;;  %v9280_v36 = vld [vmem:[#allocation45_spill] sm:$0xff] }
 0x102   : > { %4552 = vrot.lane.b32.xlu0 %v5810_v13, %s5328_s13  ;;  %v6424_v5 = vpop.permute.xlu1 %4267  ;;  %v4109_v39 = vunpack.i.l.bf16 %v9280_v36 }
 0x103   : > { %9216 = vst [vmem:[#allocation94_spill] sm:$0xff] %v6424_v5 }
 0x104   : > { %v6426_v38 = vpop.permute.xlu0 %4272  ;;  %4557 = vrot.lane.b32.xlu1 %v5821_v22, %s5328_s13 }
 0x105   : > { %9217 = vst [vmem:[#allocation95_spill] sm:$0xff] %v6426_v38 }
 0x106   : > { %4562 = vrot.lane.b32.xlu0 %v5830_v3, %s5328_s13  ;;  %v6432_v2 = vpop.permute.xlu1 %4277 }
 0x107   : > { %9218 = vst [vmem:[#allocation96_spill] sm:$0xff] %v6432_v2  ;;  %v9269_v2 = vld [vmem:[#allocation70_spill] sm:$0xff] }
 0x108   : > { %v6434_v60 = vpop.permute.xlu0 %4282  ;;  %4567 = vrot.lane.b32.xlu1 %v5849_v14, %s5328_s13  ;;  %v5307_v14 = vld [vmem:[#allocation2 + $0x188] sm:$0xff] }
 0x109   : > { %9219 = vst [vmem:[#allocation97_spill] sm:$0xff] %v6434_v60  ;;  %v9264_v60 = vld [vmem:[#allocation66_spill] sm:$0xff] }
 0x10a   : > { %4572 = vrot.lane.b32.xlu0 %v9193_v33, %s5328_s13  ;;  %v6440_v13 = vpop.permute.xlu1 %4287  ;;  %v5308_v33 = vld [vmem:[#allocation2 + $0x190] sm:$0xff] }
 0x10b   : > { %9220 = vst [vmem:[#allocation98_spill] sm:$0xff] %v6440_v13  ;;  %v4601_v40 = vpack.i.bf16 %v5308_v33, %v5307_v14  ;;  %v5311_v14 = vld [vmem:[#allocation2 + $0x1d0] sm:$0xff] }
 0x10c   : > { %v6442_v30 = vpop.permute.xlu0 %4292  ;;  %4577 = vrot.lane.b32.xlu1 %v5858_v44, %s5328_s13  ;;  %v5309_v44 = vld [vmem:[#allocation2 + $0x1a8] sm:$0xff] }
 0x10d   : > { %9221 = vst [vmem:[#allocation99_spill] sm:$0xff] %v6442_v30 }
 0x10e   : > { %4582 = vrot.lane.b32.xlu0 %v9179_v17, %s5327_s8  ;;  %v6448_v22 = vpop.permute.xlu1 %4297  ;;  %v4606_v17 = vpack.i.bf16 %v5713_v29, %v5309_v44 }
 0x10f   : > { %9222 = vst [vmem:[#allocation100_spill] sm:$0xff] %v6448_v22  ;;  %v9261_v22 = vld [vmem:[#allocation65_spill] sm:$0xff] }
 0x110   : > { %v6450_v3 = vpop.permute.xlu0 %4302  ;;  %4587 = vrot.lane.b32.xlu1 %v9180_v18, %s5327_s8 }
 0x111   : > { %9223 = vst [vmem:[#allocation101_spill] sm:$0xff] %v6450_v3 }
 0x112   : > { %4592 = vrot.lane.b32.xlu0 %v5856_v27, %s5328_s13  ;;  %v6456_v15 = vpop.permute.xlu1 %4307  ;;  %v5310_v27 = vld [vmem:[#allocation2 + $0x1c8] sm:$0xff] }
 0x113   : > { %9224 = vst [vmem:[#allocation102_spill] sm:$0xff] %v6456_v15  ;;  %v4621_v33 = vpack.i.bf16 %v5311_v14, %v5310_v27  ;;  %v4025_v14 = vunpack.i.h.bf16 %v6190_v51  ;;  %v9260_v15 = vld [vmem:[#allocation41_spill] sm:$0xff] }
 0x114   : > { %v6458_v58 = vpop.permute.xlu0 %4312  ;;  %4597 = vrot.lane.b32.xlu1 %v5881_v20, %s5328_s13 }
 0x115   : > { %9225 = vst [vmem:[#allocation103_spill] sm:$0xff] %v6458_v58 }
 0x116   : > { %4602 = vrot.lane.b32.xlu0 %v4601_v40, %s5327_s8  ;;  %v6464_v3 = vpop.permute.xlu1 %4317  ;;  %v345_v40 = vld [vmem:[#allocation2] sm:$0xff] }
 0x117   : > { %9226 = vst [vmem:[#allocation104_spill] sm:$0xff] %v6464_v3 }
 0x118   : > { %v6466_v18 = vpop.permute.xlu0 %4322  ;;  %4607 = vrot.lane.b32.xlu1 %v4606_v17, %s5327_s8 }
 0x119   : > { %9227 = vst [vmem:[#allocation105_spill] sm:$0xff] %v6466_v18 }
 0x11a   : > { %4612 = vrot.lane.b32.xlu0 %v5879_v57, %s5328_s13  ;;  %v6471_v58 = vpop.permute.xlu1 %4327  ;;  %v417_v57 = vrot.slane %v345_v40, 7 }
 0x11b   : > { %9228 = vst [vmem:[#allocation106_spill] sm:$0xff] %v6471_v58 }
 0x11c   : > { %v6473_v20 = vpop.permute.xlu0 %4332  ;;  %4617 = vrot.lane.b32.xlu1 %v5914_v26, %s5328_s13  ;;  %v4646_v26 = vpack.i.bf16 %v6210_v59, %v6208_v49  ;;  %v4030_v49 = vunpack.i.h.bf16 %v6198_v28  ;;  %v4040_v59 = vunpack.i.h.bf16 %v6204_v41 }
 0x11d   : > { %9229 = vst [vmem:[#allocation107_spill] sm:$0xff] %v6473_v20 }
 0x11e   : > { %4622 = vrot.lane.b32.xlu0 %v4621_v33, %s5327_s8  ;;  %v6478_v29 = vpop.permute.xlu1 %4337  ;;  %v4024_v33 = vunpack.i.l.bf16 %v6190_v51  ;;  %v4039_v51 = vunpack.i.l.bf16 %v6204_v41  ;;  %v4055_v41 = vunpack.i.h.bf16 %v6228_v7 }
 0x11f   : > { %9230 = vst [vmem:[#allocation108_spill] sm:$0xff] %v6478_v29  ;;  %v4035_v29 = vunpack.i.h.bf16 %v6196_v16 }
 0x120   : > { %v6480_v44 = vpop.permute.xlu0 %4342  ;;  %4627 = vrot.lane.b32.xlu1 %v9184_v21, %s5327_s8  ;;  %v9234_v21 = vld [vmem:[#allocation9_spill] sm:$0xff] }
 0x121   : > { %9231 = vst [vmem:[#allocation109_spill] sm:$0xff] %v6480_v44 }
 0x122   : > { %4632 = vrot.lane.b32.xlu0 %v5919_v31, %s5328_s13  ;;  %v6486_v17 = vpop.permute.xlu1 %4347  ;;  %v9235_v31 = vrot.slane %v9234_v21, 7 }
 0x123   : > { %9232 = vst [vmem:[#allocation110_spill] sm:$0xff] %v6486_v17 }
 0x124   : > { %v6488_v27 = vpop.permute.xlu0 %4352  ;;  %4637 = vrot.lane.b32.xlu1 %v5921_v24, %s5328_s13  ;;  %v492_v40 = vsel %vm473_vm1, %v417_v57, %v9235_v31  ;;  %v4029_v24 = vunpack.i.l.bf16 %v6198_v28  ;;  %v4044_v57 = vunpack.i.l.bf16 %v6206_v55  ;;  %v4050_v31 = vunpack.i.h.bf16 %v6222_v52 }
 0x125   : > { %9233 = vst [vmem:[#allocation111_spill] sm:$0xff] %v6488_v27  ;;  %v4034_v27 = vunpack.i.l.bf16 %v6196_v16  ;;  %v6517_v16 = vsel %vm238_vm0, %v492_v40, %v4024_v33  ;;  %v6521_v28 = vsel %vm238_vm0, %v9238_v11, %v4025_v14  ;;  %v9239_v33 = vld [vmem:[#allocation53_spill] sm:$0xff]  ;;  %v4054_v11 = vunpack.i.l.bf16 %v6228_v7  ;;  %v9241_v14 = vld [vmem:[#allocation54_spill] sm:$0xff] }
 0x126   : > { %4642 = vrot.lane.b32.xlu0 %v6216_v0, %s5327_s8  ;;  %v6505_v17 = vpop.permute.xlu1 %4357  ;;  %v4045_v0 = vunpack.i.h.bf16 %v6206_v55  ;;  %v6537_v40 = vsel %vm238_vm0, %v9239_v33, %v4029_v24  ;;  %v9246_v7 = vld [vmem:[#allocation57_spill] sm:$0xff] }
 0x127   : > { %9236 = vst [vmem:[#allocation9_spill] sm:$0xff] %v6505_v17  ;;  %v4049_v17 = vunpack.i.l.bf16 %v6222_v52  ;;  %v6529_v55 = vsel %vm238_vm0, %v5931_v43, %v4034_v27  ;;  %v9243_v27 = vld [vmem:[#allocation56_spill] sm:$0xff] }
 0x128   : > { %v6511_v21 = vpop.permute.xlu0 %4362  ;;  %4647 = vrot.lane.b32.xlu1 %v4646_v26, %s5327_s8  ;;  %v6533_v26 = vsel %vm238_vm0, %v5927_v37, %v4035_v29  ;;  %v6552_v37 = vsel %vm238_vm0, %v9243_v27, %v4039_v51  ;;  %v9244_v29 = vld [vmem:[#allocation58_spill] sm:$0xff]  ;;  %v9247_v51 = vpack.i.bf16 %v6232_v23, %v6226_v42  ;;  %v9249_v27 = vld [vmem:[#allocation61_spill] sm:$0xff]  ;;  %v9253_v23 = vld [vmem:[#allocation32_spill] sm:$0xff] }
 0x129   : > { %9237 = vst [vmem:[#allocation112_spill] sm:$0xff] %v6511_v21  ;;  %v6544_v21 = vsel %vm238_vm0, %v9241_v14, %v4030_v49  ;;  %v6556_v24 = vsel %vm238_vm0, %v9244_v29, %v4045_v0  ;;  %v6566_v49 = vsel %vm238_vm0, %v5990_v48, %v4050_v31  ;;  %v4059_v14 = vunpack.i.l.bf16 %v6240_v47  ;;  %v9248_v0 = vld [vmem:[#allocation59_spill] sm:$0xff]  ;;  %v9250_v29 = vld [vmem:[#allocation30_spill] sm:$0xff] }
 0x12a   : > { %4652 = vrot.lane.b32.xlu0 %v5996_v54, %s5328_s13  ;;  %v6540_v52 = vpop.permute.xlu1 %4367  ;;  %v9242_v54 = vld [vmem:[#allocation55_spill] sm:$0xff]  ;;  %v4065_v48 = vunpack.i.h.bf16 %v9250_v29  ;;  %v4064_v31 = vunpack.i.l.bf16 %v9250_v29  ;;  %v9256_v29 = vld [vmem:[#allocation40_spill] sm:$0xff] }
 0x12b   : > { %9240 = vst [vmem:[#allocation21_spill] sm:$0xff] %v6540_v52  ;;  %v6548_v43 = vsel %vm238_vm0, %v9242_v54, %v4040_v59  ;;  %v6562_v52 = vsel %vm238_vm0, %v9246_v7, %v4044_v57  ;;  %v4060_v59 = vunpack.i.h.bf16 %v6240_v47  ;;  %v6576_v54 = vsel %vm238_vm0, %v9248_v0, %v4049_v17  ;;  %v9251_v7 = vld [vmem:[#allocation60_spill] sm:$0xff]  ;;  %v9255_v0 = vld [vmem:[#allocation33_spill] sm:$0xff] }
 0x12c   : > { %v6558_v33 = vpop.permute.xlu0 %4372  ;;  %4657 = vrot.lane.b32.xlu1 %v9247_v51, %s5328_s13  ;;  %v6580_v57 = vsel %vm238_vm0, %v9249_v27, %v4055_v41  ;;  %v6586_v47 = vsel %vm238_vm0, %v9251_v7, %v4054_v11  ;;  %v4075_v51 = vunpack.i.h.bf16 %v9253_v23  ;;  %v4074_v41 = vunpack.i.l.bf16 %v9253_v23  ;;  %v9258_v11 = vld [vmem:[#allocation62_spill] sm:$0xff] }
 0x12d   : > { %9245 = vst [vmem:[#allocation53_spill] sm:$0xff] %v6558_v33  ;;  %v9252_v33 = vld [vmem:[#allocation31_spill] sm:$0xff]  ;;  %v4080_v27 = vunpack.i.h.bf16 %v9255_v0  ;;  %v4079_v20 = vunpack.i.l.bf16 %v9255_v0  ;;  %v4085_v58 = vunpack.i.h.bf16 %v9256_v29  ;;  %v6601_v7 = vsel %vm238_vm0, %v9258_v11, %v4060_v59  ;;  %v9262_v0 = vld [vmem:[#allocation64_spill] sm:$0xff]  ;;  %v9263_v59 = vld [vmem:[#allocation42_spill] sm:$0xff] }
 0x12e   : > { %v4070_v44 = vunpack.i.h.bf16 %v9252_v33  ;;  %v4069_v42 = vunpack.i.l.bf16 %v9252_v33  ;;  %v6591_v17 = vpop.permute.xlu1 %4377  ;;  %v9259_v33 = vld [vmem:[#allocation63_spill] sm:$0xff]  ;;  %v4090_v23 = vunpack.i.h.bf16 %v9260_v15  ;;  %v6611_v30 = vsel %vm238_vm0, %v9261_v22, %v4065_v48 }
 0x12f   : > { %9254 = vst [vmem:[#allocation54_spill] sm:$0xff] %v6591_v17  ;;  %v6605_v3 = vsel %vm238_vm0, %v9259_v33, %v4059_v14  ;;  %v4084_v17 = vunpack.i.l.bf16 %v9256_v29  ;;  %v6615_v13 = vsel %vm238_vm0, %v9262_v0, %v4064_v31  ;;  %v4095_v11 = vunpack.i.h.bf16 %v9263_v59  ;;  %v9265_v33 = vld [vmem:[#allocation67_spill] sm:$0xff]  ;;  %v9268_v0 = vld [vmem:[#allocation68_spill] sm:$0xff] }
 0x130   : > { %v6597_v18 = vpop.permute.xlu0 %4382  ;;  %v6621_v14 = vsel %vm238_vm0, %v9264_v60, %v4070_v44  ;;  %v6625_v29 = vsel %vm238_vm0, %v9265_v33, %v4069_v42  ;;  %v6629_v22 = vsel %vm238_vm0, %v9266_v56, %v4075_v51  ;;  %v4094_v48 = vunpack.i.l.bf16 %v9263_v59  ;;  %v9270_v44 = vld [vmem:[#allocation71_spill] sm:$0xff]  ;;  %v9271_v33 = vld [vmem:[#allocation72_spill] sm:$0xff]  ;;  %v9273_v59 = vld [vmem:[#allocation73_spill] sm:$0xff] }
 0x131   : > { %9257 = vst [vmem:[#allocation55_spill] sm:$0xff] %v6597_v18  ;;  %v4089_v18 = vunpack.i.l.bf16 %v9260_v15  ;;  %v6636_v15 = vsel %vm238_vm0, %v9268_v0, %v4074_v41  ;;  %v6640_v60 = vsel %vm238_vm0, %v9269_v2, %v4080_v27  ;;  %v6644_v42 = vsel %vm238_vm0, %v9270_v44, %v4079_v20  ;;  %v9274_v41 = vld [vmem:[#allocation75_spill] sm:$0xff]  ;;  %v9276_v20 = vld [vmem:[#allocation74_spill] sm:$0xff] }
 0x132   : > { %v6632_v31 = vpop.permute.xlu1 %4387  ;;  %v6648_v56 = vsel %vm238_vm0, %v9271_v33, %v4085_v58  ;;  %v6658_v0 = vsel %vm238_vm0, %v9274_v41, %v4090_v23  ;;  %v9275_v2 = vld [vmem:[#allocation43_spill] sm:$0xff]  ;;  %v9277_v58 = vld [vmem:[#allocation76_spill] sm:$0xff]  ;;  %v4115_v41 = vunpack.i.h.bf16 %v6282_v32 }
 0x133   : > { %9267 = vst [vmem:[#allocation56_spill] sm:$0xff] %v6632_v31  ;;  %v6654_v31 = vsel %vm238_vm0, %v9273_v59, %v4084_v17  ;;  %v4100_v27 = vunpack.i.h.bf16 %v9275_v2  ;;  %v4099_v38 = vunpack.i.l.bf16 %v9275_v2  ;;  %v6664_v44 = vsel %vm238_vm0, %v9276_v20, %v4089_v18  ;;  %v9279_v59 = vld [vmem:[#allocation77_spill] sm:$0xff] }
 0x134   : > { %v6650_v51 = vpop.permute.xlu0 %4392  ;;  %v6668_v33 = vsel %vm238_vm0, %v9277_v58, %v4095_v11  ;;  %v6674_v23 = vsel %vm238_vm0, %v9279_v59, %v4094_v48  ;;  %v4110_v2 = vunpack.i.h.bf16 %v9280_v36  ;;  %v4114_v20 = vunpack.i.l.bf16 %v6282_v32  ;;  %v9282_v11 = vld [vmem:[#allocation49_spill] sm:$0xff]  ;;  %v9285_v48 = vld [vmem:[#allocation78_spill] sm:$0xff] }
 0x135   : > { %9272 = vst [vmem:[#allocation58_spill] sm:$0xff] %v6650_v51  ;;  %v9278_v51 = vld [vmem:[#allocation44_spill] sm:$0xff]  ;;  %v4124_v58 = vunpack.i.l.bf16 %v9282_v11  ;;  %v6689_v59 = vsel %vm238_vm0, %v9285_v48, %v4100_v27  ;;  %v6693_v34 = vsel %vm238_vm0, %v9286_v46, %v4099_v38  ;;  %v4125_v36 = vunpack.i.h.bf16 %v9282_v11 }
 0x136   : > { %v4105_v5 = vunpack.i.h.bf16 %v9278_v51  ;;  %v4104_v17 = vunpack.i.l.bf16 %v9278_v51  ;;  %v6679_v18 = vpop.permute.xlu1 %4397  ;;  %v4119_v51 = vunpack.i.l.bf16 %v9283_v62  ;;  %v6709_v46 = vsel %vm1507_vm4, %v6533_v26, %v4115_v41 }
 0x137   : > { %9281 = vst [vmem:[#allocation57_spill] sm:$0xff] %v6679_v18  ;;  %v9287_v18 = vld [vmem:[#allocation50_spill] sm:$0xff]  ;;  %v6713_v38 = vsel %vm1507_vm4, %v6537_v40, %v4109_v39  ;;  %v6728_v26 = vsel %vm1507_vm4, %v6562_v52, %v4124_v58  ;;  %v6732_v39 = vsel %vm1507_vm4, %v6548_v43, %v4120_v35  ;;  %v9291_v52 = vld [vmem:[#allocation52_spill] sm:$0xff]  ;;  %v4149_v11 = vunpack.i.l.bf16 %v6312_v50 }
 0x138   : > { %v6685_v61 = vpop.permute.xlu0 %4402  ;;  %v4130_v32 = vunpack.i.h.bf16 %v9287_v18  ;;  %v6699_v1 = vsel %vm1507_vm4, %v6521_v28, %v4105_v5  ;;  %v6703_v62 = vsel %vm1507_vm4, %v6517_v16, %v4104_v17  ;;  %v4129_v27 = vunpack.i.l.bf16 %v9287_v18  ;;  %v9293_v58 = vld [vmem:[#allocation80_spill] sm:$0xff] }
 0x139   : > { %9284 = vst [vmem:[#allocation59_spill] sm:$0xff] %v6685_v61  ;;  %v9288_v61 = vld [vmem:[#allocation51_spill] sm:$0xff]  ;;  %v6717_v5 = vsel %vm1507_vm4, %v6544_v21, %v4110_v2  ;;  %v6724_v17 = vsel %vm1507_vm4, %v6529_v55, %v4114_v20  ;;  %v6736_v21 = vsel %vm1507_vm4, %v6552_v37, %v4119_v51  ;;  %v4140_v41 = vunpack.i.h.bf16 %v9291_v52 }
 0x13a   : > { %v4134_v19 = vunpack.i.l.bf16 %v9288_v61  ;;  %v4135_v28 = vunpack.i.h.bf16 %v9288_v61  ;;  %v6720_v16 = vpop.permute.xlu1 %4407  ;;  %v6742_v61 = vsel %vm1507_vm4, %v6556_v24, %v4125_v36  ;;  %v6746_v55 = vsel %vm1507_vm4, %v6566_v49, %v4130_v32  ;;  %v9294_v32 = vld [vmem:[#allocation81_spill] sm:$0xff] }
 0x13b   : > { %9289 = vst [vmem:[#allocation61_spill] sm:$0xff] %v6720_v16  ;;  %v4139_v2 = vunpack.i.l.bf16 %v9291_v52  ;;  %v6756_v43 = vsel %vm1507_vm4, %v6576_v54, %v4129_v27  ;;  %v4145_v37 = vunpack.i.h.bf16 %v6306_v6  ;;  %v4144_v24 = vunpack.i.l.bf16 %v6306_v6  ;;  %v9295_v52 = vld [vmem:[#allocation82_spill] sm:$0xff] }
 0x13c   : > { %v6738_v40 = vpop.permute.xlu0 %4412  ;;  %v6752_v35 = vsel %vm1507_vm4, %v6586_v47, %v4134_v19  ;;  %v6762_v49 = vsel %vm1507_vm4, %v6580_v57, %v4135_v28  ;;  %v4154_v18 = vunpack.i.l.bf16 %v6314_v4  ;;  %v4150_v20 = vunpack.i.h.bf16 %v6312_v50 }
 0x13d   : > { %9290 = vst [vmem:[#allocation30_spill] sm:$0xff] %v6738_v40  ;;  %v4155_v54 = vunpack.i.h.bf16 %v6314_v4  ;;  %v4164_v47 = vunpack.i.l.bf16 %v6322_v53  ;;  %v4160_v51 = vunpack.i.h.bf16 %v9293_v58  ;;  %v4159_v6 = vunpack.i.l.bf16 %v9293_v58 }
 0x13e   : > { %v6767_v19 = vpop.permute.xlu1 %4417  ;;  %v6777_v57 = vsel %vm1507_vm4, %v6601_v7, %v4140_v41  ;;  %v6781_v50 = vsel %vm1507_vm4, %v6605_v3, %v4139_v2  ;;  %v4165_v36 = vunpack.i.h.bf16 %v6322_v53  ;;  %v4170_v4 = vunpack.i.h.bf16 %v9294_v32 }
 0x13f   : > { %9292 = vst [vmem:[#allocation60_spill] sm:$0xff] %v6767_v19  ;;  %v6787_v27 = vsel %vm1507_vm4, %v6615_v13, %v4144_v24  ;;  %v6791_v28 = vsel %vm1507_vm4, %v6611_v30, %v4145_v37  ;;  %v4174_v58 = vunpack.i.l.bf16 %v9295_v52  ;;  %v4169_v7 = vunpack.i.l.bf16 %v9294_v32  ;;  %v9321_v19 = vld [vmem:[#allocation104_spill] sm:$0xff] }
 0x140   : > { %v6773_v48 = vpop.permute.xlu0 %4422  ;;  %v6797_v3 = vsel %vm1507_vm4, %v6636_v15, %v4154_v18  ;;  %v6801_v53 = vsel %vm1507_vm4, %v6621_v14, %v4150_v20  ;;  %v6805_v13 = vsel %vm1507_vm4, %v6625_v29, %v4149_v11  ;;  %v4175_v41 = vunpack.i.h.bf16 %v9295_v52 }
 0x141   : > { %v6812_v2 = vsel %vm1507_vm4, %v6629_v22, %v4155_v54  ;;  %v6816_v15 = vsel %vm1507_vm4, %v6654_v31, %v4164_v47  ;;  %v6820_v14 = vsel %vm1507_vm4, %v6640_v60, %v4160_v51  ;;  %v6824_v29 = vsel %vm1507_vm4, %v6644_v42, %v4159_v6  ;;  %v9296_v54 = vld [vmem:[#allocation83_spill] sm:$0xff] }
 0x142   : > { %v6808_v30 = vpop.permute.xlu1 %4427  ;;  %v6830_v24 = vsel %vm1507_vm4, %v6648_v56, %v4165_v36  ;;  %v6834_v22 = vsel %vm1507_vm4, %v6658_v0, %v4170_v4  ;;  %v4180_v31 = vunpack.i.h.bf16 %v6336_v10  ;;  %v4179_v18 = vunpack.i.l.bf16 %v6336_v10 }
 0x143   : > { %v6840_v60 = vsel %vm1507_vm4, %v6674_v23, %v4174_v58  ;;  %v6844_v42 = vsel %vm1507_vm4, %v6664_v44, %v4169_v7  ;;  %v4185_v20 = vunpack.i.h.bf16 %v6338_v45  ;;  %v4184_v56 = vunpack.i.l.bf16 %v6338_v45 }
 0x144   : > { %v6826_v37 = vpop.permute.xlu0 %4432  ;;  %v6850_v0 = vsel %vm1507_vm4, %v6668_v33, %v4175_v41  ;;  %v4190_v11 = vunpack.i.h.bf16 %v6346_v12  ;;  %v4189_v10 = vunpack.i.l.bf16 %v6346_v12  ;;  %v4195_v47 = vunpack.i.h.bf16 %v9296_v54 }
 0x145   : > { %v4194_v51 = vunpack.i.l.bf16 %v9296_v54  ;;  %v4200_v44 = vunpack.i.h.bf16 %v6358_v9  ;;  %v4199_v6 = vunpack.i.l.bf16 %v6358_v9  ;;  %v4205_v45 = vunpack.i.h.bf16 %v6360_v63 }
 0x146   : > { %v6855_v23 = vpop.permute.xlu1 %4437  ;;  %v6865_v33 = vsel %vm1507_vm4, %v6689_v59, %v4180_v31  ;;  %v6869_v12 = vsel %vm1507_vm4, %v6693_v34, %v4179_v18  ;;  %v4204_v32 = vunpack.i.l.bf16 %v6360_v63  ;;  %v4209_v4 = vunpack.i.l.bf16 %v6366_v25 }
 0x147   : > { %9297 = vst [vmem:[#allocation31_spill] sm:$0xff] %v6865_v33  ;;  %9298 = vst [vmem:[#allocation32_spill] sm:$0xff] %v6869_v12  ;;  %v6875_v52 = vsel %vm1540_vm5, %v6699_v1, %v4185_v20  ;;  %v6879_v9 = vsel %vm1540_vm5, %v6703_v62, %v4184_v56  ;;  %v4210_v58 = vunpack.i.h.bf16 %v6366_v25  ;;  %v4215_v59 = vunpack.i.h.bf16 %v6368_v8  ;;  %v9300_v20 = vld [vmem:[#allocation85_spill] sm:$0xff]  ;;  %v9313_v12 = vld [vmem:[#allocation98_spill] sm:$0xff] }
 0x148   : > { %v6861_v36 = vpop.permute.xlu0 %4442  ;;  %v6885_v34 = vsel %vm1540_vm5, %v6713_v38, %v4189_v10  ;;  %v6889_v63 = vsel %vm1540_vm5, %v6717_v5, %v4190_v11  ;;  %v6893_v1 = vsel %vm1540_vm5, %v6709_v46, %v4195_v47  ;;  %v4214_v7 = vunpack.i.l.bf16 %v6368_v8  ;;  %v9301_v11 = vld [vmem:[#allocation86_spill] sm:$0xff]  ;;  %v9302_v47 = vld [vmem:[#allocation87_spill] sm:$0xff] }
 0x149   : > { %v6900_v25 = vsel %vm1540_vm5, %v6724_v17, %v4194_v51  ;;  %v6904_v38 = vsel %vm1540_vm5, %v6736_v21, %v4199_v6  ;;  %v6908_v5 = vsel %vm1540_vm5, %v6732_v39, %v4200_v44  ;;  %v6912_v46 = vsel %vm1540_vm5, %v6742_v61, %v4205_v45  ;;  %v9299_v21 = vld [vmem:[#allocation84_spill] sm:$0xff] }
 0x14a   : > { %v6896_v62 = vpop.permute.xlu1 %4447  ;;  %v6918_v8 = vsel %vm1540_vm5, %v6728_v26, %v4204_v32  ;;  %v6922_v17 = vsel %vm1540_vm5, %v6756_v43, %v4209_v4  ;;  %v4220_v31 = vunpack.i.h.bf16 %v9299_v21  ;;  %v4219_v18 = vunpack.i.l.bf16 %v9299_v21  ;;  %v9303_v44 = vld [vmem:[#allocation88_spill] sm:$0xff]  ;;  %v9304_v32 = vld [vmem:[#allocation89_spill] sm:$0xff]  ;;  %v9305_v21 = vld [vmem:[#allocation90_spill] sm:$0xff] }
 0x14b   : > { %v6928_v39 = vsel %vm1540_vm5, %v6746_v55, %v4210_v58  ;;  %v6932_v61 = vsel %vm1540_vm5, %v6762_v49, %v4215_v59  ;;  %v4225_v56 = vunpack.i.h.bf16 %v9300_v20  ;;  %v4224_v26 = vunpack.i.l.bf16 %v9300_v20 }
 0x14c   : > { %v6914_v41 = vpop.permute.xlu0 %4452  ;;  %v6938_v43 = vsel %vm1540_vm5, %v6752_v35, %v4214_v7  ;;  %v4230_v10 = vunpack.i.h.bf16 %v9301_v11  ;;  %v4229_v54 = vunpack.i.l.bf16 %v9301_v11  ;;  %v4235_v55 = vunpack.i.h.bf16 %v9302_v47 }
 0x14d   : > { %v4234_v49 = vunpack.i.l.bf16 %v9302_v47  ;;  %v4240_v6 = vunpack.i.h.bf16 %v9303_v44  ;;  %v4239_v45 = vunpack.i.l.bf16 %v9303_v44  ;;  %v4245_v4 = vunpack.i.h.bf16 %v9304_v32 }
 0x14e   : > { %v6943_v51 = vpop.permute.xlu1 %4457  ;;  %v6953_v35 = vsel %vm1540_vm5, %v6781_v50, %v4219_v18  ;;  %v6957_v59 = vsel %vm1540_vm5, %v6777_v57, %v4220_v31  ;;  %v4244_v7 = vunpack.i.l.bf16 %v9304_v32  ;;  %v4249_v20 = vunpack.i.l.bf16 %v9305_v21  ;;  %v9306_v50 = vld [vmem:[#allocation91_spill] sm:$0xff] }
 0x14f   : > { %v6963_v11 = vsel %vm1540_vm5, %v6791_v28, %v4225_v56  ;;  %v6967_v47 = vsel %vm1540_vm5, %v6787_v27, %v4224_v26  ;;  %v4250_v44 = vunpack.i.h.bf16 %v9305_v21  ;;  %v4255_v18 = vunpack.i.h.bf16 %v9306_v50  ;;  %v9309_v32 = vld [vmem:[#allocation95_spill] sm:$0xff]  ;;  %v9310_v21 = vld [vmem:[#allocation96_spill] sm:$0xff] }
 0x150   : > { %v6949_v58 = vpop.permute.xlu0 %4462  ;;  %v6973_v57 = vsel %vm1540_vm5, %v6805_v13, %v4229_v54  ;;  %v6977_v31 = vsel %vm1540_vm5, %v6801_v53, %v4230_v10  ;;  %v6981_v28 = vsel %vm1540_vm5, %v6812_v2, %v4235_v55  ;;  %v4254_v56 = vunpack.i.l.bf16 %v9306_v50 }
 0x151   : > { %v6988_v26 = vsel %vm1540_vm5, %v6797_v3, %v4234_v49  ;;  %v6992_v13 = vsel %vm1540_vm5, %v6824_v29, %v4239_v45  ;;  %v6996_v53 = vsel %vm1540_vm5, %v6820_v14, %v4240_v6  ;;  %v7000_v2 = vsel %vm1540_vm5, %v6830_v24, %v4245_v4  ;;  %v9307_v29 = vld [vmem:[#allocation93_spill] sm:$0xff]  ;;  %v9308_v6 = vld [vmem:[#allocation94_spill] sm:$0xff] }
 0x152   : > { %v6984_v27 = vpop.permute.xlu1 %4467  ;;  %v7006_v54 = vsel %vm1540_vm5, %v6816_v15, %v4244_v7  ;;  %v7010_v3 = vsel %vm1540_vm5, %v6844_v42, %v4249_v20  ;;  %v4265_v55 = vunpack.i.h.bf16 %v9307_v29  ;;  %v4264_v49 = vunpack.i.l.bf16 %v9307_v29  ;;  %v9312_v29 = vld [vmem:[#allocation97_spill] sm:$0xff] }
 0x153   : > { %v7016_v14 = vsel %vm1540_vm5, %v6834_v22, %v4250_v44  ;;  %v7020_v24 = vsel %vm1540_vm5, %v6850_v0, %v4255_v18  ;;  %v4270_v45 = vunpack.i.h.bf16 %v9308_v6  ;;  %v4269_v15 = vunpack.i.l.bf16 %v9308_v6 }
 0x154   : > { %v7002_v10 = vpop.permute.xlu0 %4472  ;;  %v7026_v42 = vsel %vm1540_vm5, %v6840_v60, %v4254_v56  ;;  %v4275_v4 = vunpack.i.h.bf16 %v9309_v32  ;;  %v4274_v7 = vunpack.i.l.bf16 %v9309_v32  ;;  %v4279_v20 = vunpack.i.l.bf16 %v9310_v21 }
 0x155   : > { %v4280_v18 = vunpack.i.h.bf16 %v9310_v21  ;;  %v4284_v6 = vunpack.i.l.bf16 %v9312_v29  ;;  %v7041_v60 = vsel %vm1573_vm6, %v6879_v9, %v4264_v49  ;;  %v7045_v56 = vsel %vm1573_vm6, %v6875_v52, %v4265_v55  ;;  %v9314_v9 = vld [vmem:[#allocation99_spill] sm:$0xff] }
 0x156   : > { %v7031_v22 = vpop.permute.xlu1 %4477  ;;  %v4285_v32 = vunpack.i.h.bf16 %v9312_v29  ;;  %v4289_v50 = vunpack.i.l.bf16 %v9313_v12  ;;  %v7051_v0 = vsel %vm1573_vm6, %v6885_v34, %v4269_v15  ;;  %v7055_v21 = vsel %vm1573_vm6, %v6889_v63, %v4270_v45  ;;  %v9316_v45 = vld [vmem:[#allocation100_spill] sm:$0xff] }
 0x157   : > { %v4290_v44 = vunpack.i.h.bf16 %v9313_v12  ;;  %v4294_v49 = vunpack.i.l.bf16 %v9314_v9  ;;  %v7061_v52 = vsel %vm1573_vm6, %v6900_v25, %v4274_v7  ;;  %v7065_v55 = vsel %vm1573_vm6, %v6893_v1, %v4275_v4 }
 0x158   : > { %v7037_v33 = vpop.permute.xlu0 %4482  ;;  %v7069_v34 = vsel %vm1573_vm6, %v6904_v38, %v4279_v20  ;;  %v4295_v15 = vunpack.i.h.bf16 %v9314_v9  ;;  %v7076_v12 = vsel %vm1573_vm6, %v6908_v5, %v4280_v18  ;;  %v7080_v25 = vsel %vm1573_vm6, %v6918_v8, %v4284_v6  ;;  %v9318_v5 = vld [vmem:[#allocation101_spill] sm:$0xff]  ;;  %v9319_v9 = vld [vmem:[#allocation102_spill] sm:$0xff] }
 0x159   : > { %v4300_v7 = vunpack.i.h.bf16 %v9316_v45  ;;  %v4299_v1 = vunpack.i.l.bf16 %v9316_v45  ;;  %v7088_v38 = vsel %vm1573_vm6, %v6912_v46, %v4285_v32  ;;  %v7092_v20 = vsel %vm1573_vm6, %v6922_v17, %v4289_v50  ;;  %v9320_v50 = vld [vmem:[#allocation103_spill] sm:$0xff] }
 0x15a   : > { %v7072_v63 = vpop.permute.xlu1 %4487  ;;  %v4305_v18 = vunpack.i.h.bf16 %v9318_v5  ;;  %v4304_v29 = vunpack.i.l.bf16 %v9318_v5  ;;  %v7098_v8 = vsel %vm1573_vm6, %v6928_v39, %v4290_v44  ;;  %v7102_v6 = vsel %vm1573_vm6, %v6938_v43, %v4294_v49 }
 0x15b   : > { %9315 = vst [vmem:[#allocation33_spill] sm:$0xff] %v7072_v63  ;;  %v4310_v46 = vunpack.i.h.bf16 %v9319_v9  ;;  %v4309_v32 = vunpack.i.l.bf16 %v9319_v9  ;;  %v7108_v17 = vsel %vm1573_vm6, %v6932_v61, %v4295_v15  ;;  %v4315_v45 = vunpack.i.h.bf16 %v9320_v50  ;;  %v9323_v61 = vld [vmem:[#allocation105_spill] sm:$0xff] }
 0x15c   : > { %v7084_v4 = vpop.permute.xlu0 %4492  ;;  %v4314_v5 = vunpack.i.l.bf16 %v9320_v50  ;;  %v7117_v43 = vsel %vm1573_vm6, %v6953_v35, %v4299_v1  ;;  %v7121_v44 = vsel %vm1573_vm6, %v6957_v59, %v4300_v7  ;;  %v4320_v49 = vunpack.i.h.bf16 %v9321_v19  ;;  %v9324_v1 = vld [vmem:[#allocation106_spill] sm:$0xff] }
 0x15d   : > { %9317 = vst [vmem:[#allocation40_spill] sm:$0xff] %v7084_v4  ;;  %v4319_v4 = vunpack.i.l.bf16 %v9321_v19  ;;  %v4324_v15 = vunpack.i.l.bf16 %v9323_v61  ;;  %v7129_v50 = vsel %vm1573_vm6, %v6967_v47, %v4304_v29  ;;  %v4325_v35 = vunpack.i.h.bf16 %v9323_v61  ;;  %v9325_v47 = vld [vmem:[#allocation107_spill] sm:$0xff] }
 0x15e   : > { %v7113_v39 = vpop.permute.xlu1 %4497  ;;  %v4329_v63 = vunpack.i.l.bf16 %v9324_v1  ;;  %v7139_v59 = vsel %vm1573_vm6, %v6973_v57, %v4309_v32  ;;  %v7143_v19 = vsel %vm1573_vm6, %v6977_v31, %v4310_v46  ;;  %v4330_v7 = vunpack.i.h.bf16 %v9324_v1 }
 0x15f   : > { %9322 = vst [vmem:[#allocation62_spill] sm:$0xff] %v7113_v39  ;;  %v7133_v39 = vsel %vm1573_vm6, %v6963_v11, %v4305_v18  ;;  %v4334_v29 = vunpack.i.l.bf16 %v9325_v47  ;;  %v7149_v11 = vsel %vm1573_vm6, %v6988_v26, %v4314_v5  ;;  %v7153_v18 = vsel %vm1573_vm6, %v6981_v28, %v4315_v45  ;;  %v9327_v5 = vld [vmem:[#allocation109_spill] sm:$0xff] }
 0x160   : > { %v7125_v9 = vpop.permute.xlu0 %4502  ;;  %v7157_v57 = vsel %vm1573_vm6, %v6992_v13, %v4319_v4  ;;  %v4335_v32 = vunpack.i.h.bf16 %v9325_v47  ;;  %v7164_v46 = vsel %vm1573_vm6, %v6996_v53, %v4320_v49  ;;  %v7168_v26 = vsel %vm1573_vm6, %v7006_v54, %v4324_v15  ;;  %v9330_v53 = vld [vmem:[#allocation110_spill] sm:$0xff]  ;;  %v9333_v47 = vld [vmem:[#allocation111_spill] sm:$0xff] }
 0x161   : > { %9326 = vst [vmem:[#allocation63_spill] sm:$0xff] %v7168_v26  ;;  %v4345_v28 = vunpack.i.h.bf16 %v9327_v5  ;;  %v4344_v45 = vunpack.i.l.bf16 %v9327_v5  ;;  %v7176_v13 = vsel %vm1573_vm6, %v7000_v2, %v4325_v35  ;;  %v7180_v4 = vsel %vm1573_vm6, %v7010_v3, %v4329_v63 }
 0x162   : > { %v7160_v31 = vpop.permute.xlu1 %4507  ;;  %9328 = vst [vmem:[#allocation41_spill] sm:$0xff] %v7176_v13  ;;  %9329 = vst [vmem:[#allocation65_spill] sm:$0xff] %v7180_v4  ;;  %v4350_v49 = vunpack.i.h.bf16 %v9330_v53  ;;  %v4349_v1 = vunpack.i.l.bf16 %v9330_v53  ;;  %v7186_v54 = vsel %vm1573_vm6, %v7016_v14, %v4330_v7  ;;  %v7190_v15 = vsel %vm1573_vm6, %v7026_v42, %v4334_v29  ;;  %v9336_v4 = vld [vmem:[#allocation9_spill] sm:$0xff] }
 0x163   : > { %9331 = vst [vmem:[#allocation64_spill] sm:$0xff] %v7186_v54  ;;  %9332 = vst [vmem:[#allocation42_spill] sm:$0xff] %v7190_v15  ;;  %v4355_v5 = vunpack.i.h.bf16 %v9333_v47  ;;  %v4354_v2 = vunpack.i.l.bf16 %v9333_v47  ;;  %v7196_v3 = vsel %vm1573_vm6, %v7020_v24, %v4335_v32  ;;  %v4359_v40 = vunpack.i.l.bf16 %v9336_v4  ;;  %v9337_v47 = vld [vmem:[#allocation112_spill] sm:$0xff] }
 0x164   : > { %v7172_v61 = vpop.permute.xlu0 %4512  ;;  %9334 = vst [vmem:[#allocation66_spill] sm:$0xff] %v7196_v3  ;;  %v1607_v42 = vsel %vm1606_vm7, %v7041_v60, %v4344_v45  ;;  %v1608_v7 = vsel %vm1606_vm7, %v7045_v56, %v4345_v28  ;;  %v4360_v29 = vunpack.i.h.bf16 %v9336_v4  ;;  %v4364_v24 = vunpack.i.l.bf16 %v9337_v47  ;;  %v9338_v3 = vld [vmem:[#allocation21_spill] sm:$0xff] }
 0x165   : > { %v1609_v35 = vsel %vm1606_vm7, %v7051_v0, %v4349_v1  ;;  %v1610_v53 = vsel %vm1606_vm7, %v7055_v21, %v4350_v49  ;;  %v4365_v63 = vunpack.i.h.bf16 %v9337_v47  ;;  %v4369_v60 = vunpack.i.l.bf16 %v9338_v3 }
 0x166   : > { %v7201_v14 = vpop.permute.xlu1 %4517  ;;  %v1611_v56 = vsel %vm1606_vm7, %v7061_v52, %v4354_v2  ;;  %v1612_v28 = vsel %vm1606_vm7, %v7065_v55, %v4355_v5  ;;  %v4370_v45 = vunpack.i.h.bf16 %v9338_v3  ;;  %v4424_v4 = vunpack.i.l.bf16 %v6773_v48 }
 0x167   : > { %v7225_v0 = vsel %vm1606_vm7, %v7069_v34, %v4359_v40  ;;  %v4425_v21 = vunpack.i.h.bf16 %v6773_v48  ;;  %v4430_v49 = vunpack.i.h.bf16 %v6808_v30  ;;  %v4429_v1 = vunpack.i.l.bf16 %v6808_v30 }
 0x168   : > { %v7209_v32 = vpop.permute.xlu0 %4522  ;;  %v7234_v52 = vsel %vm1606_vm7, %v7076_v12, %v4360_v29  ;;  %v7238_v55 = vsel %vm1606_vm7, %v7080_v25, %v4364_v24  ;;  %v4435_v40 = vunpack.i.h.bf16 %v6826_v37  ;;  %v4434_v34 = vunpack.i.l.bf16 %v6826_v37  ;;  %v9339_v12 = vld [vmem:[#allocation53_spill] sm:$0xff] }
 0x169   : > { %v7246_v30 = vsel %vm1606_vm7, %v7088_v38, %v4365_v63  ;;  %v7250_v5 = vsel %vm1606_vm7, %v7092_v20, %v4369_v60  ;;  %v4375_v2 = vunpack.i.h.bf16 %v9339_v12  ;;  %v4374_v3 = vunpack.i.l.bf16 %v9339_v12 }
 0x16a   : > { %v7230_v47 = vpop.permute.xlu1 %4527  ;;  %v7256_v25 = vsel %vm1606_vm7, %v7098_v8, %v4370_v45  ;;  %v4505_v37 = vunpack.i.h.bf16 %v7125_v9  ;;  %v4504_v29 = vunpack.i.l.bf16 %v7125_v9  ;;  %v1640_v24 = vsel %vm1639_vm8, %v1607_v42, %v4424_v4 }
 0x16b   : > { %v1642_v38 = vsel %vm1639_vm8, %v1609_v35, %v4429_v1  ;;  %v1643_v63 = vsel %vm1639_vm8, %v1610_v53, %v4430_v49  ;;  %v4509_v20 = vunpack.i.l.bf16 %v7160_v31  ;;  %v1641_v12 = vsel %vm1639_vm8, %v1608_v7, %v4425_v21 }
 0x16c   : > { %v7242_v48 = vpop.permute.xlu0 %4532  ;;  %v1644_v15 = vsel %vm1639_vm8, %v1611_v56, %v4434_v34  ;;  %v1645_v8 = vsel %vm1639_vm8, %v1612_v28, %v4435_v40  ;;  %v4440_v45 = vunpack.i.h.bf16 %v6855_v23  ;;  %v4510_v9 = vunpack.i.h.bf16 %v7160_v31 }
 0x16d   : > { %v4515_v42 = vunpack.i.h.bf16 %v7172_v61  ;;  %v4514_v35 = vunpack.i.l.bf16 %v7172_v61  ;;  %v4439_v49 = vunpack.i.l.bf16 %v6855_v23  ;;  %v4445_v1 = vunpack.i.h.bf16 %v6861_v36 }
 0x16e   : > { %v7264_v60 = vpop.permute.xlu1 %4537  ;;  %v1673_v7 = vsel %vm1672_vm9, %v1640_v24, %v4504_v29  ;;  %v1674_v56 = vsel %vm1672_vm9, %v1641_v12, %v4505_v37  ;;  %v4444_v28 = vunpack.i.l.bf16 %v6861_v36  ;;  %v1675_v21 = vsel %vm1672_vm9, %v1642_v38, %v4509_v20 }
 0x16f   : > { %v1676_v61 = vsel %vm1672_vm9, %v1643_v63, %v4510_v9  ;;  %v1677_v26 = vsel %vm1672_vm9, %v1644_v15, %v4514_v35  ;;  %v1678_v29 = vsel %vm1672_vm9, %v1645_v8, %v4515_v42  ;;  %v4520_v36 = vunpack.i.h.bf16 %v7201_v14 }
 0x170   : > { %v4543_v54 = vpop.permute.xlu0 %4542  ;;  %v4519_v38 = vunpack.i.l.bf16 %v7201_v14  ;;  %v4525_v63 = vunpack.i.h.bf16 %v7209_v32  ;;  %v4524_v42 = vunpack.i.l.bf16 %v7209_v32  ;;  %v1646_v32 = vsel %vm1639_vm8, %v7225_v0, %v4439_v49 }
 0x171   : > { %v4545_v53 = vunpack.i.h.bf16 %v4543_v54  ;;  %v4544_v4 = vunpack.i.l.bf16 %v4543_v54 }
 0x172   : > { %v4548_v31 = vpop.permute.xlu1 %4547 }
 0x173   : > { %v1706_v40 = vsel %vm1705_vm10, %v1673_v7, %v4544_v4  ;;  %v1707_v34 = vsel %vm1705_vm10, %v1674_v56, %v4545_v53  ;;  %v4550_v54 = vunpack.i.h.bf16 %v4548_v31  ;;  %v4549_v16 = vunpack.i.l.bf16 %v4548_v31 }
 0x174   : > { %v4553_v23 = vpop.permute.xlu0 %4552  ;;  %v1738_v13 = vpack.c.bf16 %v1707_v34, %v1706_v40  ;;  %v1647_v34 = vsel %vm1639_vm8, %v7234_v52, %v4440_v45 }
 0x175   : > { %v4555_v37 = vunpack.i.h.bf16 %v4553_v23  ;;  %v4554_v24 = vunpack.i.l.bf16 %v4553_v23  ;;  %v1708_v20 = vsel %vm1705_vm10, %v1675_v21, %v4549_v16  ;;  %v1709_v12 = vsel %vm1705_vm10, %v1676_v61, %v4550_v54  ;;  %v9341_v23 = vld [vmem:[#allocation55_spill] sm:$0xff] }
 0x176   : > { %3932 = vmatprep.mubr.msk.bf16.mxu0 %vm1775_vm11, %v1738_v13  ;;  %v4558_v35 = vpop.permute.xlu1 %4557  ;;  %v1739_v8 = vpack.c.bf16 %v1709_v12, %v1708_v20  ;;  %v1619_v16 = vsel %vm1606_vm7, %v7102_v6, %v4374_v3  ;;  %v1620_v13 = vsel %vm1606_vm7, %v7108_v17, %v4375_v2  ;;  %v1648_v6 = vsel %vm1639_vm8, %v7238_v55, %v4444_v28 }
 0x177   : > { %v1710_v9 = vsel %vm1705_vm10, %v1677_v26, %v4554_v24  ;;  %v1711_v15 = vsel %vm1705_vm10, %v1678_v29, %v4555_v37  ;;  %v4560_v53 = vunpack.i.h.bf16 %v4558_v35  ;;  %v4559_v4 = vunpack.i.l.bf16 %v4558_v35  ;;  %v9340_v26 = vld [vmem:[#allocation54_spill] sm:$0xff] }
 0x178   : > { %v4563_v7 = vpop.permute.xlu0 %4562  ;;  %v1740_v14 = vpack.c.bf16 %v1711_v15, %v1710_v9  ;;  %3933 = vmatmul.mubr.msk.bf16.vlgmr.msra.gmra.mxu0 %vm1775_vm11, %v1739_v8  ;;  %v4380_v31 = vunpack.i.h.bf16 %v9340_v26  ;;  %v4379_v40 = vunpack.i.l.bf16 %v9340_v26  ;;  %v1649_v17 = vsel %vm1639_vm8, %v7246_v30, %v4445_v1 }
 0x179   : > { %v4565_v56 = vunpack.i.h.bf16 %v4563_v7  ;;  %v4564_v21 = vunpack.i.l.bf16 %v4563_v7  ;;  %v1679_v2 = vsel %vm1672_vm9, %v1646_v32, %v4519_v38  ;;  %v1680_v3 = vsel %vm1672_vm9, %v1647_v34, %v4520_v36  ;;  %v9342_v32 = vld [vmem:[#allocation56_spill] sm:$0xff] }
 0x17a   : > { %3936 = vmatprep.mubr.msk.bf16.mxu0 %vm1775_vm11, %v1740_v14  ;;  %v4568_v61 = vpop.permute.xlu1 %4567  ;;  %v1681_v54 = vsel %vm1672_vm9, %v1648_v6, %v4524_v42  ;;  %v1682_v0 = vsel %vm1672_vm9, %v1649_v17, %v4525_v63  ;;  %v1712_v49 = vsel %vm1705_vm10, %v1679_v2, %v4559_v4  ;;  %v1713_v52 = vsel %vm1705_vm10, %v1680_v3, %v4560_v53 }
 0x17b   : > { %v4385_v29 = vunpack.i.h.bf16 %v9341_v23  ;;  %v4384_v55 = vunpack.i.l.bf16 %v9341_v23  ;;  %v1714_v30 = vsel %vm1705_vm10, %v1681_v54, %v4564_v21  ;;  %v1715_v1 = vsel %vm1705_vm10, %v1682_v0, %v4565_v56 }
 0x17c   : > { %v4573_v45 = vpop.permute.xlu0 %4572  ;;  %v4450_v28 = vunpack.i.h.bf16 %v6896_v62  ;;  %v4449_v37 = vunpack.i.l.bf16 %v6896_v62  ;;  %v4455_v24 = vunpack.i.h.bf16 %v6914_v41  ;;  %v4454_v36 = vunpack.i.l.bf16 %v6914_v41 }
 0x17d   : > { %v4530_v38 = vunpack.i.h.bf16 %v7230_v47  ;;  %v4529_v20 = vunpack.i.l.bf16 %v7230_v47  ;;  %v4535_v12 = vunpack.i.h.bf16 %v7242_v48  ;;  %v1741_v9 = vpack.c.bf16 %v1713_v52, %v1712_v49 }
 0x17e   : > { %v7326_v63 = vpop.permute.xlu1 %4577  ;;  %v4534_v15 = vunpack.i.l.bf16 %v7242_v48  ;;  %v4570_v35 = vunpack.i.h.bf16 %v4568_v61  ;;  %v4569_v8 = vunpack.i.l.bf16 %v4568_v61  ;;  %v1742_v53 = vpack.c.bf16 %v1715_v1, %v1714_v30 }
 0x17f   : > { %v1621_v62 = vsel %vm1606_vm7, %v7117_v43, %v4379_v40  ;;  %v1622_v41 = vsel %vm1606_vm7, %v7121_v44, %v4380_v31  ;;  %v4575_v4 = vunpack.i.h.bf16 %v4573_v45  ;;  %v4574_v7 = vunpack.i.l.bf16 %v4573_v45 }
 0x180   : > { %v4583_v42 = vpop.permute.xlu0 %4582  ;;  %3937 = vmatmul.mubr.msk.bf16.gmra.mxu0 %vm1775_vm11, %v1741_v9  ;;  %v1623_v47 = vsel %vm1606_vm7, %v7129_v50, %v4384_v55  ;;  %v1624_v48 = vsel %vm1606_vm7, %v7133_v39, %v4385_v29  ;;  %v1650_v14 = vsel %vm1639_vm8, %v7250_v5, %v4449_v37  ;;  %v1651_v56 = vsel %vm1639_vm8, %v7256_v25, %v4450_v28 }
 0x181   : > { %3940 = vmatprep.mubr.msk.bf16.mxu0 %vm1775_vm11, %v1742_v53  ;;  %v1652_v43 = vsel %vm1639_vm8, %v1619_v16, %v4454_v36  ;;  %v1653_v44 = vsel %vm1639_vm8, %v1620_v13, %v4455_v24  ;;  %v1683_v21 = vsel %vm1672_vm9, %v1650_v14, %v4529_v20  ;;  %v1684_v26 = vsel %vm1672_vm9, %v1651_v56, %v4530_v38 }
 0x182   : > { %v7347_v50 = vpop.permute.xlu1 %4587  ;;  %v1685_v39 = vsel %vm1672_vm9, %v1652_v43, %v4534_v15  ;;  %v1686_v31 = vsel %vm1672_vm9, %v1653_v44, %v4535_v12  ;;  %v1716_v5 = vsel %vm1705_vm10, %v1683_v21, %v4569_v8  ;;  %v1717_v25 = vsel %vm1705_vm10, %v1684_v26, %v4570_v35 }
 0x183   : > { %v4390_v34 = vunpack.i.h.bf16 %v9342_v32  ;;  %v4389_v16 = vunpack.i.l.bf16 %v9342_v32  ;;  %v1718_v13 = vsel %vm1705_vm10, %v1685_v39, %v4574_v7  ;;  %v1719_v6 = vsel %vm1705_vm10, %v1686_v31, %v4575_v4 }
 0x184   : > { %v4593_v40 = vpop.permute.xlu0 %4592  ;;  %v4460_v17 = vunpack.i.h.bf16 %v6943_v51  ;;  %v4459_v2 = vunpack.i.l.bf16 %v6943_v51  ;;  %v4465_v3 = vunpack.i.h.bf16 %v6949_v58  ;;  %v4464_v61 = vunpack.i.l.bf16 %v6949_v58  ;;  %v9343_v51 = vld [vmem:[#allocation58_spill] sm:$0xff] }
 0x185   : > { %v4540_v54 = vunpack.i.h.bf16 %v7264_v60  ;;  %v4539_v0 = vunpack.i.l.bf16 %v7264_v60  ;;  %v4580_v49 = vunpack.i.h.bf16 %v7326_v63  ;;  %v1743_v45 = vpack.c.bf16 %v1717_v25, %v1716_v5 }
 0x186   : > { %v7364_v52 = vpop.permute.xlu1 %4597  ;;  %v4579_v23 = vunpack.i.l.bf16 %v7326_v63  ;;  %v4585_v29 = vunpack.i.h.bf16 %v4583_v42  ;;  %v4584_v55 = vunpack.i.l.bf16 %v4583_v42  ;;  %v1744_v1 = vpack.c.bf16 %v1719_v6, %v1718_v13 }
 0x187   : > { %v4395_v28 = vunpack.i.h.bf16 %v9343_v51  ;;  %v4394_v37 = vunpack.i.l.bf16 %v9343_v51  ;;  %v4595_v58 = vunpack.i.h.bf16 %v4593_v40  ;;  %v4594_v24 = vunpack.i.l.bf16 %v4593_v40  ;;  %v9344_v40 = vld [vmem:[#allocation57_spill] sm:$0xff] }
 0x188   : > { %v4603_v30 = vpop.permute.xlu0 %4602  ;;  %3941 = vmatmul.mubr.msk.bf16.gmra.mxu0 %vm1775_vm11, %v1743_v45  ;;  %v1625_v60 = vsel %vm1606_vm7, %v7139_v59, %v4389_v16  ;;  %v1626_v36 = vsel %vm1606_vm7, %v7143_v19, %v4390_v34  ;;  %v1654_v38 = vsel %vm1639_vm8, %v1621_v62, %v4459_v2  ;;  %v1655_v20 = vsel %vm1639_vm8, %v1622_v41, %v4460_v17  ;;  %v9345_v16 = vld [vmem:[#allocation59_spill] sm:$0xff] }
 0x189   : > { %3944 = vmatprep.mubr.msk.bf16.mxu0 %vm1775_vm11, %v1744_v1  ;;  %v1656_v12 = vsel %vm1639_vm8, %v1623_v47, %v4464_v61  ;;  %v1657_v63 = vsel %vm1639_vm8, %v1624_v48, %v4465_v3  ;;  %v1687_v9 = vsel %vm1672_vm9, %v1654_v38, %v4539_v0  ;;  %v1688_v15 = vsel %vm1672_vm9, %v1655_v20, %v4540_v54 }
 0x18a   : > { %v7381_v35 = vpop.permute.xlu1 %4607  ;;  %v1720_v59 = vsel %vm1705_vm10, %v1687_v9, %v4579_v23  ;;  %v1721_v19 = vsel %vm1705_vm10, %v1688_v15, %v4580_v49  ;;  %v1689_v8 = vsel %vm1672_vm9, %v1656_v12, %v4584_v55  ;;  %v1690_v42 = vsel %vm1672_vm9, %v1657_v63, %v4585_v29  ;;  %v9346_v15 = vld [vmem:[#allocation63_spill] sm:$0xff] }
 0x18b   : > { %v1627_v62 = vsel %vm1606_vm7, %v7149_v11, %v4394_v37  ;;  %v1628_v41 = vsel %vm1606_vm7, %v7153_v18, %v4395_v28  ;;  %v1722_v4 = vsel %vm1705_vm10, %v1689_v8, %v4594_v24  ;;  %v1723_v7 = vsel %vm1705_vm10, %v1690_v42, %v4595_v58 }
 0x18c   : > { %v4613_v53 = vpop.permute.xlu0 %4612  ;;  %v4470_v47 = vunpack.i.h.bf16 %v6984_v27  ;;  %v4469_v48 = vunpack.i.l.bf16 %v6984_v27  ;;  %v4475_v14 = vunpack.i.h.bf16 %v7002_v10  ;;  %v4474_v56 = vunpack.i.l.bf16 %v7002_v10 }
 0x18d   : > { %v4590_v43 = vunpack.i.h.bf16 %v7347_v50  ;;  %v4589_v44 = vunpack.i.l.bf16 %v7347_v50  ;;  %v4600_v11 = vunpack.i.h.bf16 %v7364_v52  ;;  %v1745_v18 = vpack.c.bf16 %v1721_v19, %v1720_v59  ;;  %v9347_v19 = vld [vmem:[#allocation41_spill] sm:$0xff] }
 0x18e   : > { %v4618_v21 = vpop.permute.xlu1 %4617  ;;  %v4599_v26 = vunpack.i.l.bf16 %v7364_v52  ;;  %v4605_v39 = vunpack.i.h.bf16 %v4603_v30  ;;  %v4604_v31 = vunpack.i.l.bf16 %v4603_v30  ;;  %v1746_v25 = vpack.c.bf16 %v1723_v7, %v1722_v4 }
 0x18f   : > { %v4400_v27 = vunpack.i.h.bf16 %v9344_v40  ;;  %v4399_v32 = vunpack.i.l.bf16 %v9344_v40  ;;  %v4615_v34 = vunpack.i.h.bf16 %v4613_v53  ;;  %v4614_v10 = vunpack.i.l.bf16 %v4613_v53  ;;  %v9348_v53 = vld [vmem:[#allocation61_spill] sm:$0xff] }
 0x190   : > { %v4623_v5 = vpop.permute.xlu0 %4622  ;;  %3945 = vmatmul.mubr.msk.bf16.gmra.mxu0 %vm1775_vm11, %v1745_v18  ;;  %v4405_v50 = vunpack.i.h.bf16 %v9345_v16  ;;  %v4404_v13 = vunpack.i.l.bf16 %v9345_v16  ;;  %v1658_v6 = vsel %vm1639_vm8, %v1625_v60, %v4469_v48  ;;  %v1659_v17 = vsel %vm1639_vm8, %v1626_v36, %v4470_v47 }
 0x191   : > { %3948 = vmatprep.mubr.msk.bf16.mxu0 %vm1775_vm11, %v1746_v25  ;;  %v1660_v2 = vsel %vm1639_vm8, %v1627_v62, %v4474_v56  ;;  %v1661_v3 = vsel %vm1639_vm8, %v1628_v41, %v4475_v14  ;;  %v1691_v61 = vsel %vm1672_vm9, %v1658_v6, %v4589_v44  ;;  %v1692_v54 = vsel %vm1672_vm9, %v1659_v17, %v4590_v43 }
 0x192   : > { %v7413_v0 = vpop.permute.xlu1 %4627  ;;  %v1724_v49 = vsel %vm1705_vm10, %v1691_v61, %v4599_v26  ;;  %v1725_v52 = vsel %vm1705_vm10, %v1692_v54, %v4600_v11  ;;  %v1693_v45 = vsel %vm1672_vm9, %v1660_v2, %v4604_v31  ;;  %v1694_v23 = vsel %vm1672_vm9, %v1661_v3, %v4605_v39 }
 0x193   : > { %v1629_v55 = vsel %vm1606_vm7, %v7157_v57, %v4399_v32  ;;  %v1630_v30 = vsel %vm1606_vm7, %v7164_v46, %v4400_v27  ;;  %v1726_v1 = vsel %vm1705_vm10, %v1693_v45, %v4614_v10  ;;  %v1727_v51 = vsel %vm1705_vm10, %v1694_v23, %v4615_v34  ;;  %v9351_v27 = vld [vmem:[#allocation40_spill] sm:$0xff] }
 0x194   : > { %v4633_v29 = vpop.permute.xlu0 %4632  ;;  %v4480_v28 = vunpack.i.h.bf16 %v7031_v22  ;;  %v4479_v37 = vunpack.i.l.bf16 %v7031_v22  ;;  %v4485_v58 = vunpack.i.h.bf16 %v7037_v33  ;;  %v4484_v24 = vunpack.i.l.bf16 %v7037_v33  ;;  %v9353_v45 = vld [vmem:[#allocation64_spill] sm:$0xff] }
 0x195   : > { %v4610_v60 = vunpack.i.h.bf16 %v7381_v35  ;;  %v4609_v36 = vunpack.i.l.bf16 %v7381_v35  ;;  %v4620_v57 = vunpack.i.h.bf16 %v4618_v21  ;;  %v1747_v38 = vpack.c.bf16 %v1725_v52, %v1724_v49  ;;  %v9352_v49 = vld [vmem:[#allocation65_spill] sm:$0xff] }
 0x196   : > { %v4619_v20 = vunpack.i.l.bf16 %v4618_v21  ;;  %v4625_v46 = vunpack.i.h.bf16 %v4623_v5  ;;  %v4624_v12 = vunpack.i.l.bf16 %v4623_v5  ;;  %v1748_v9 = vpack.c.bf16 %v1727_v51, %v1726_v1  ;;  %v4638_v33 = vpop.permute.xlu1 %4637  ;;  %v9349_v21 = vld [vmem:[#allocation30_spill] sm:$0xff]  ;;  %v9350_v5 = vld [vmem:[#allocation33_spill] sm:$0xff] }
 0x197   : > { %v1631_v59 = vsel %vm1606_vm7, %v9346_v15, %v4404_v13  ;;  %v1632_v22 = vsel %vm1606_vm7, %v9347_v19, %v4405_v50  ;;  %v4635_v8 = vunpack.i.h.bf16 %v4633_v29  ;;  %v4634_v42 = vunpack.i.l.bf16 %v4633_v29  ;;  %v9355_v1 = vld [vmem:[#allocation66_spill] sm:$0xff] }
 0x198   : > { %v4643_v63 = vpop.permute.xlu0 %4642  ;;  %3949 = vmatmul.mubr.msk.bf16.gmra.mxu0 %vm1775_vm11, %v1747_v38  ;;  %v4410_v35 = vunpack.i.h.bf16 %v9348_v53  ;;  %v4409_v62 = vunpack.i.l.bf16 %v9348_v53  ;;  %v1662_v41 = vsel %vm1639_vm8, %v1629_v55, %v4479_v37  ;;  %v1663_v4 = vsel %vm1639_vm8, %v1630_v30, %v4480_v28  ;;  %v9354_v30 = vld [vmem:[#allocation42_spill] sm:$0xff] }
 0x199   : > { %3952 = vmatprep.mubr.msk.bf16.mxu0 %vm1775_vm11, %v1748_v9  ;;  %v1664_v7 = vsel %vm1639_vm8, %v1631_v59, %v4484_v24  ;;  %v1665_v47 = vsel %vm1639_vm8, %v1632_v22, %v4485_v58  ;;  %v1695_v48 = vsel %vm1672_vm9, %v1662_v41, %v4609_v36  ;;  %v1696_v14 = vsel %vm1672_vm9, %v1663_v4, %v4610_v60  ;;  %v9357_v22 = vld [vmem:[#allocation92_spill] sm:$0xff]  ;;  %v9362_v41 = vld [vmem:[#allocation62_spill] sm:$0xff] }
 0x19a   : > { %v1728_v56 = vsel %vm1705_vm10, %v1695_v48, %v4619_v20  ;;  %v1729_v43 = vsel %vm1705_vm10, %v1696_v14, %v4620_v57  ;;  %v1697_v44 = vsel %vm1672_vm9, %v1664_v7, %v4624_v12  ;;  %v1698_v11 = vsel %vm1672_vm9, %v1665_v47, %v4625_v46  ;;  %v4648_v6 = vpop.permute.xlu1 %4647  ;;  %v9356_v12 = vld [vmem:[#allocation60_spill] sm:$0xff] }
 0x19b   : > { %v4415_v18 = vunpack.i.h.bf16 %v9349_v21  ;;  %v4414_v26 = vunpack.i.l.bf16 %v9349_v21  ;;  %v1730_v39 = vsel %vm1705_vm10, %v1697_v44, %v4634_v42  ;;  %v1731_v31 = vsel %vm1705_vm10, %v1698_v11, %v4635_v8  ;;  %v9359_v42 = vld [vmem:[#allocation32_spill] sm:$0xff] }
 0x19c   : > { %v4490_v25 = vunpack.i.h.bf16 %v9350_v5  ;;  %v4489_v40 = vunpack.i.l.bf16 %v9350_v5  ;;  %v4495_v32 = vunpack.i.h.bf16 %v9351_v27  ;;  %v4494_v34 = vunpack.i.l.bf16 %v9351_v27  ;;  %v4653_v10 = vpop.permute.xlu0 %4652  ;;  %v9363_v47 = vld [vmem:[#allocation108_spill] sm:$0xff] }
 0x19d   : > { %v4630_v16 = vunpack.i.h.bf16 %v7413_v0  ;;  %v4629_v50 = vunpack.i.l.bf16 %v7413_v0  ;;  %v4640_v13 = vunpack.i.h.bf16 %v4638_v33  ;;  %v1749_v17 = vpack.c.bf16 %v1729_v43, %v1728_v56 }
 0x19e   : > { %v4639_v2 = vunpack.i.l.bf16 %v4638_v33  ;;  %v4645_v3 = vunpack.i.h.bf16 %v4643_v63  ;;  %v4644_v61 = vunpack.i.l.bf16 %v4643_v63  ;;  %v1750_v54 = vpack.c.bf16 %v1731_v31, %v1730_v39  ;;  %v4658_v19 = vpop.permute.xlu1 %4657 }
 0x19f   : > { %v1633_v52 = vsel %vm1606_vm7, %v9352_v49, %v4409_v62  ;;  %v1634_v23 = vsel %vm1606_vm7, %v9353_v45, %v4410_v35  ;;  %v4655_v29 = vunpack.i.h.bf16 %v4653_v10  ;;  %v4654_v55 = vunpack.i.l.bf16 %v4653_v10  ;;  %v9361_v35 = vld [vmem:[#allocation31_spill] sm:$0xff] }
 0x1a0   : > { %3953 = vmatmul.mubr.msk.bf16.gmra.mxu0 %vm1775_vm11, %v1749_v17  ;;  %v1635_v0 = vsel %vm1606_vm7, %v9354_v30, %v4414_v26  ;;  %v1636_v51 = vsel %vm1606_vm7, %v9355_v1, %v4415_v18  ;;  %v1666_v28 = vsel %vm1639_vm8, %v1633_v52, %v4489_v40  ;;  %v1667_v37 = vsel %vm1639_vm8, %v1634_v23, %v4490_v25  ;;  %v2056_v17 = vld [vmem:[#allocation2 + $0x18] sm:$0xff]  ;;  %v7530_v30 = vld [vmem:[%s8912_s2] ss:$0 sm:$0xff] }
 0x1a1   : > { %3956 = vmatprep.mubr.msk.bf16.mxu0 %vm1775_vm11, %v1750_v54  ;;  %v1668_v58 = vsel %vm1639_vm8, %v1635_v0, %v4494_v34  ;;  %v1669_v24 = vsel %vm1639_vm8, %v1636_v51, %v4495_v32  ;;  %v1699_v60 = vsel %vm1672_vm9, %v1666_v28, %v4629_v50  ;;  %v1700_v36 = vsel %vm1672_vm9, %v1667_v37, %v4630_v16  ;;  %v7510_v50 = vld [vmem:[#allocation2 + $0x8] sm:$0xff] }
 0x1a2   : > { %v1732_v57 = vsel %vm1705_vm10, %v1699_v60, %v4639_v2  ;;  %v1733_v38 = vsel %vm1705_vm10, %v1700_v36, %v4640_v13  ;;  %v1701_v20 = vsel %vm1672_vm9, %v1668_v58, %v4644_v61  ;;  %v1702_v46 = vsel %vm1672_vm9, %v1669_v24, %v4645_v3  ;;  %v2055_v13 = vld [vmem:[#allocation2 + $0x10] sm:$0xff] }
 0x1a3   : > { %v4420_v63 = vunpack.i.h.bf16 %v9356_v12  ;;  %v4419_v9 = vunpack.i.l.bf16 %v9356_v12  ;;  %v1734_v15 = vsel %vm1705_vm10, %v1701_v20, %v4654_v55  ;;  %v1735_v59 = vsel %vm1705_vm10, %v1702_v46, %v4655_v29 }
 0x1a4   : > { %v9358_v8 = vunpack.i.l.bf16 %v9357_v22  ;;  %v9360_v53 = vunpack.i.h.bf16 %v9357_v22  ;;  %v4500_v4 = vunpack.i.h.bf16 %v9362_v41  ;;  %v4499_v7 = vunpack.i.l.bf16 %v9362_v41 }
 0x1a5   : > { %v9364_v48 = vunpack.i.l.bf16 %v9363_v47  ;;  %v4650_v56 = vunpack.i.h.bf16 %v4648_v6  ;;  %v4649_v43 = vunpack.i.l.bf16 %v4648_v6  ;;  %v1751_v44 = vpack.c.bf16 %v1733_v38, %v1732_v57 }
 0x1a6   : > { %v1571_v33 = vsel %vm1540_vm5, %v9359_v42, %v9358_v8  ;;  %v1572_v62 = vsel %vm1540_vm5, %v9361_v35, %v9360_v53  ;;  %v9365_v11 = vunpack.i.h.bf16 %v9363_v47  ;;  %v4660_v18 = vunpack.i.h.bf16 %v4658_v19  ;;  %v2064_v53 = vld [vmem:[#allocation2 + $0x58] sm:$0xff] }
 0x1a7   : > { %v1604_v14 = vsel %vm1573_vm6, %v1571_v33, %v9364_v48  ;;  %v4659_v26 = vunpack.i.l.bf16 %v4658_v19  ;;  %v1752_v39 = vpack.c.bf16 %v1735_v59, %v1734_v15  ;;  %v4661_v6 = vpack.i.bf16 %v2055_v13, %v7510_v50 }
 0x1a8   : > { %v1605_v21 = vsel %vm1573_vm6, %v1572_v62, %v9365_v11  ;;  %v1637_v31 = vsel %vm1606_vm7, %v1604_v14, %v4419_v9  ;;  %3957 = vmatmul.mubr.msk.bf16.gmra.mxu0 %vm1775_vm11, %v1751_v44  ;;  %v2233_v2 = vrot.slane %v2055_v13, 1  ;;  %v2215_v3 = vrot.slane %v7510_v50, 1 }
 0x1a9   : > { %v1638_v5 = vsel %vm1606_vm7, %v1605_v21, %v4420_v63  ;;  %v1670_v25 = vsel %vm1639_vm8, %v1637_v31, %v4499_v7  ;;  %3960 = vmatprep.mubr.msk.bf16.mxu0 %vm1775_vm11, %v1752_v39  ;;  %v2251_v61 = vrot.slane %v2056_v17, 1  ;;  %4662 = vrot.lane.b32.xlu0 %v4661_v6, %s5321_s25  ;;  %v2161_v23 = vrot.slane %v2055_v13, 7 }
 0x1aa   : > { %v1671_v40 = vsel %vm1639_vm8, %v1638_v5, %v4500_v4  ;;  %v1703_v27 = vsel %vm1672_vm9, %v1670_v25, %v4649_v43  ;;  %v2287_v52 = vsel %vm564_vm2, %v2215_v3, %v2233_v2  ;;  %v9070_v29 = vrot.slane %v7510_v50, 7  ;;  %v2061_v25 = vld [vmem:[#allocation2 + $0x40] sm:$0xff] }
 0x1ab   : > { %v1704_v32 = vsel %vm1672_vm9, %v1671_v40, %v4650_v56  ;;  %v1736_v34 = vsel %vm1705_vm10, %v1703_v27, %v4659_v26  ;;  %v2269_v49 = vsel %vm564_vm2, %v2233_v2, %v2251_v61  ;;  %v2253_v43 = vrot.slane %v2064_v53, 1 }
 0x1ac   : > { %v1737_v10 = vsel %vm1705_vm10, %v1704_v32, %v4660_v18  ;;  %v4666_v45 = vpack.i.bf16 %v2269_v49, %v2287_v52  ;;  %v7525_v55 = vsel %vm473_vm1, %v9070_v29, %v2161_v23  ;;  %v2127_v6 = vrot.slane %v2061_v25, 7  ;;  %v2057_v49 = vld [vmem:[#allocation2 + $0x20] sm:$0xff] }
 0x1ad   : > { %v1753_v16 = vpack.c.bf16 %v1737_v10, %v1736_v34 }
 0x1ae   : > { %4667 = vrot.lane.b32.xlu0 %v4666_v45, %s5322_s26 }
 0x1b0   : > { %3961 = vmatmul.mubr.msk.bf16.gmra.mxu0 %vm1775_vm11, %v1753_v16 }
 0x238   : > { %v3934_v0 = vpop.f32.mrf.mxu0 }
 0x239   : > { %v1871_v1 = vadd.f32 %v3934_v0, %v7530_v30 }
 0x23a   : > { %v1862_v51 = vpop.f32.mrf.mxu0 }
 0x23b   : > { %v1991_v28 = vmax.f32 %v1871_v1, 0.0  ;;  %v1863_v37 = vadd.f32 %v7530_v30, %v1862_v51 }
 0x23c   : > { %v3935_v58 = vpop.f32.mrf.mxu0 }
 0x23d   : > { %2023 = vst.msk [vmem:[#allocation2 + $0x48] sm:$0xff] %vm238_vm0, %v1991_v28  ;;  %v1989_v24 = vmax.f32 %v1863_v37, 0.0  ;;  %v1874_v60 = vadd.f32 %v3935_v58, %v7530_v30  ;;  %v2126_v37 = vrot.slane %v2057_v49, 7 }
 0x23e   : > { %v1865_v36 = vpop.f32.mrf.mxu0 }
 0x23f   : > { %2021 = vst.msk [vmem:[#allocation2 + $0x28] sm:$0xff] %vm238_vm0, %v1989_v24  ;;  %v1992_v57 = vmax.f32 %v1874_v60, 0.0  ;;  %v1866_v38 = vadd.f32 %v7530_v30, %v1865_v36 }
 0x240   : > { %v3938_v20 = vpop.f32.mrf.mxu0 }
 0x241   : > { %2024 = vst.msk [vmem:[#allocation2 + $0x50] sm:$0xff] %vm238_vm0, %v1992_v57  ;;  %v1990_v46 = vmax.f32 %v1866_v38, 0.0  ;;  %v1887_v12 = vadd.f32 %v3938_v20, %v7530_v30 }
 0x242   : > { %v1878_v63 = vpop.f32.mrf.mxu0 }
 0x243   : > { %2022 = vst.msk [vmem:[#allocation2 + $0x30] sm:$0xff] %vm238_vm0, %v1990_v46  ;;  %v1995_v9 = vmax.f32 %v1887_v12, 0.0  ;;  %v1879_v15 = vadd.f32 %v7530_v30, %v1878_v63  ;;  %v2060_v12 = vld [vmem:[#allocation2 + $0x38] sm:$0xff] }
 0x244   : > { %v3939_v59 = vpop.f32.mrf.mxu0  ;;  %v2062_v62 = vld [vmem:[#allocation2 + $0x48] sm:$0xff] }
 0x245   : > { %2027 = vst.msk [vmem:[#allocation2 + $0x88] sm:$0xff] %vm238_vm0, %v1995_v9  ;;  %v1993_v19 = vmax.f32 %v1879_v15, 0.0  ;;  %v1890_v22 = vadd.f32 %v3939_v59, %v7530_v30  ;;  %v2217_v26 = vrot.slane %v2062_v62, 1  ;;  %v2145_v17 = vrot.slane %v2062_v62, 7 }
 0x246   : > { %v1881_v8 = vpop.f32.mrf.mxu0  ;;  %v7554_v18 = vld [vmem:[#allocation2 + $0x28] sm:$0xff] }
 0x247   : > { %2025 = vst.msk [vmem:[#allocation2 + $0x68] sm:$0xff] %vm238_vm0, %v1993_v19  ;;  %v1996_v42 = vmax.f32 %v1890_v22, 0.0  ;;  %v1882_v33 = vadd.f32 %v7530_v30, %v1881_v8  ;;  %v7581_v28 = vsel %vm473_vm1, %v2127_v6, %v2145_v17  ;;  %v2144_v58 = vrot.slane %v7554_v18, 7 }
 0x248   : > { %v3942_v35 = vpop.f32.mrf.mxu0  ;;  %v2063_v41 = vld [vmem:[#allocation2 + $0x50] sm:$0xff] }
 0x249   : > { %2028 = vst.msk [vmem:[#allocation2 + $0x90] sm:$0xff] %vm238_vm0, %v1996_v42  ;;  %v1994_v4 = vmax.f32 %v1882_v33, 0.0  ;;  %v1903_v7 = vadd.f32 %v3942_v35, %v7530_v30  ;;  %v4681_v47 = vpack.i.bf16 %v2063_v41, %v2062_v62  ;;  %v2235_v56 = vrot.slane %v2063_v41, 1 }
 0x24a   : > { %v1894_v48 = vpop.f32.mrf.mxu0  ;;  %v7548_v14 = vld [vmem:[#allocation2 + $0x30] sm:$0xff]  ;;  %v2163_v34 = vrot.slane %v2063_v41, 7  ;;  %v7598_v9 = vsel %vm473_vm1, %v2126_v37, %v2144_v58  ;;  %v2252_v33 = vrot.slane %v2060_v12, 1 }
 0x24b   : > { %2026 = vst.msk [vmem:[#allocation2 + $0x70] sm:$0xff] %vm238_vm0, %v1994_v4  ;;  %v1999_v44 = vmax.f32 %v1903_v7, 0.0  ;;  %v1895_v11 = vadd.f32 %v7530_v30, %v1894_v48  ;;  %4682 = vrot.lane.b32.xlu1 %v4681_v47, %s5327_s8  ;;  %4672 = vrot.lane.b32.xlu0 %v4681_v47, %s5321_s25  ;;  %v4686_v5 = vpack.i.bf16 %v7548_v14, %v7554_v18  ;;  %v2162_v23 = vrot.slane %v7548_v14, 7 }
 0x24c   : > { %v3943_v21 = vpop.f32.mrf.mxu0  ;;  %v2271_v27 = vsel %vm564_vm2, %v2235_v56, %v2253_v43  ;;  %v2289_v32 = vsel %vm564_vm2, %v2217_v26, %v2235_v56  ;;  %v7572_v45 = vsel %vm473_vm1, %v2145_v17, %v2163_v34  ;;  %v2234_v42 = vrot.slane %v7548_v14, 1  ;;  %v7611_v41 = vld [vmem:[#allocation2 + $0x88] sm:$0xff] }
 0x24d   : > { %2031 = vst.msk [vmem:[#allocation2 + $0xc8] sm:$0xff] %vm238_vm0, %v1999_v44  ;;  %v1997_v39 = vmax.f32 %v1895_v11, 0.0  ;;  %v1906_v31 = vadd.f32 %v3943_v21, %v7530_v30  ;;  %v4696_v61 = vpack.i.bf16 %v2271_v27, %v2289_v32  ;;  %v4701_v36 = vpack.i.bf16 %v7572_v45, %v7581_v28  ;;  %v2072_v21 = vld [vmem:[#allocation2 + $0x98] sm:$0xff] }
 0x24e   : > { %v1897_v40 = vpop.f32.mrf.mxu0  ;;  %v7590_v38 = vsel %vm473_vm1, %v2144_v58, %v2162_v23  ;;  %v2216_v4 = vrot.slane %v7554_v18, 1  ;;  %v2270_v56 = vsel %vm564_vm2, %v2234_v42, %v2252_v33  ;;  %v2255_v27 = vrot.slane %v2072_v21, 1 }
 0x24f   : > { %2029 = vst.msk [vmem:[#allocation2 + $0xa8] sm:$0xff] %vm238_vm0, %v1997_v39  ;;  %v2000_v10 = vmax.f32 %v1906_v31, 0.0  ;;  %v1898_v16 = vadd.f32 %v7530_v30, %v1897_v40  ;;  %4677 = vrot.lane.b32.xlu0 %v4681_v47, %s5324_s28  ;;  %4687 = vrot.lane.b32.xlu1 %v4686_v5, %s5321_s25  ;;  %v4726_v19 = vpack.i.bf16 %v7590_v38, %v7598_v9 }
 0x250   : > { %v3946_v13 = vpop.f32.mrf.mxu0  ;;  %v7604_v8 = vld [vmem:[#allocation2 + $0x90] sm:$0xff]  ;;  %v2288_v43 = vsel %vm564_vm2, %v2216_v4, %v2234_v42 }
 0x251   : > { %2032 = vst.msk [vmem:[#allocation2 + $0xd0] sm:$0xff] %vm238_vm0, %v2000_v10  ;;  %v1998_v2 = vmax.f32 %v1898_v16, 0.0  ;;  %v1919_v3 = vadd.f32 %v3946_v13, %v7530_v30  ;;  %v4736_v48 = vpack.i.bf16 %v7604_v8, %v7611_v41  ;;  %v4721_v31 = vpack.i.bf16 %v2270_v56, %v2288_v43  ;;  %v7635_v16 = vld [vmem:[#allocation2 + $0x68] sm:$0xff] }
 0x252   : > { %v1910_v52 = vpop.f32.mrf.mxu0  ;;  %v7628_v25 = vld [vmem:[#allocation2 + $0x70] sm:$0xff]  ;;  %v2237_v40 = vrot.slane %v7604_v8, 1  ;;  %v2219_v13 = vrot.slane %v7611_v41, 1  ;;  %v2165_v33 = vrot.slane %v7604_v8, 7 }
 0x253   : > { %2030 = vst.msk [vmem:[#allocation2 + $0xb0] sm:$0xff] %vm238_vm0, %v1998_v2  ;;  %v2003_v0 = vmax.f32 %v1919_v3, 0.0  ;;  %v1911_v1 = vadd.f32 %v7530_v30, %v1910_v52  ;;  %4697 = vrot.lane.b32.xlu0 %v4696_v61, %s5322_s26  ;;  %4692 = vrot.lane.b32.xlu1 %v4686_v5, %s5324_s28  ;;  %v4756_v2 = vpack.i.bf16 %v7628_v25, %v7635_v16 }
 0x254   : > { %v3947_v51 = vpop.f32.mrf.mxu0  ;;  %v2291_v49 = vsel %vm564_vm2, %v2219_v13, %v2237_v40 }
 0x255   : > { %2035 = vst.msk [vmem:[#allocation2 + $0x108] sm:$0xff] %vm238_vm0, %v2003_v0  ;;  %v2001_v24 = vmax.f32 %v1911_v1, 0.0  ;;  %v1922_v60 = vadd.f32 %v3947_v51, %v7530_v30  ;;  %v7653_v1 = vld [vmem:[%s8913_s3 + $0x10] ss:$0 sps:$4 sm:$0x33]  }
 0x256   : > { %v1913_v57 = vpop.f32.mrf.mxu0  ;;  %4003 = vmatprep.subr.msk.bf16.mxu1 %vm1824_vm3, %v7653_v1 }
 0x257   : > { %2033 = vst.msk [vmem:[#allocation2 + $0xe8] sm:$0xff] %vm238_vm0, %v2001_v24  ;;  %v2004_v20 = vmax.f32 %v1922_v60, 0.0  ;;  %v1914_v46 = vadd.f32 %v7530_v30, %v1913_v57  ;;  %4707 = vrot.lane.b32.xlu0 %v4696_v61, %s5325_s29  ;;  %4702 = vrot.lane.b32.xlu1 %v4701_v36, %s5323_s27  ;;  %v2065_v24 = vld [vmem:[#allocation2 + $0x60] sm:$0xff] }
 0x258   : > { %v3950_v63 = vpop.f32.mrf.mxu0  ;;  %v2128_v12 = vrot.slane %v2065_v24, 7  ;;  %v7733_v24 = vld [vmem:[#allocation2 + $0x1d8] sm:$0xff] }
 0x259   : > { %2036 = vst.msk [vmem:[#allocation2 + $0x110] sm:$0xff] %vm238_vm0, %v2004_v20  ;;  %v2002_v15 = vmax.f32 %v1914_v46, 0.0  ;;  %v1935_v59 = vadd.f32 %v3950_v63, %v7530_v30  ;;  %v2146_v63 = vrot.slane %v7635_v16, 7 }
 0x25a   : > { %v1926_v22 = vpop.f32.mrf.mxu0 }
 0x25b   : > { %2034 = vst.msk [vmem:[#allocation2 + $0xf0] sm:$0xff] %vm238_vm0, %v2002_v15  ;;  %v2007_v53 = vmax.f32 %v1935_v59, 0.0  ;;  %v1927_v35 = vadd.f32 %v7530_v30, %v1926_v22  ;;  %4712 = vrot.lane.b32.xlu1 %v4701_v36, %s5326_s30  ;;  %4727 = vrot.lane.b32.xlu0 %v4726_v19, %s5323_s27  ;;  %v2164_v36 = vrot.slane %v7628_v25, 7  ;;  %v2069_v19 = vld [vmem:[#allocation2 + $0x80] sm:$0xff] }
 0x25c   : > { %v3951_v62 = vpop.f32.mrf.mxu0 }
 0x25d   : > { %2039 = vst.msk [vmem:[#allocation2 + $0x148] sm:$0xff] %vm238_vm0, %v2007_v53  ;;  %v2005_v7 = vmax.f32 %v1927_v35, 0.0  ;;  %v1938_v47 = vadd.f32 %v3951_v62, %v7530_v30  ;;  %v7672_v42 = vsel %vm473_vm1, %v2146_v63, %v2164_v36  ;;  %v2068_v62 = vld [vmem:[#allocation2 + $0x78] sm:$0xff] }
 0x25e   : > { %v1929_v14 = vpop.f32.mrf.mxu0  ;;  %v2254_v21 = vrot.slane %v2068_v62, 1  ;;  %v2265_v62 = vrot.slane %v7733_v24, 1 }
 0x25f   : > { %2037 = vst.msk [vmem:[#allocation2 + $0x128] sm:$0xff] %vm238_vm0, %v2005_v7  ;;  %v2008_v44 = vmax.f32 %v1938_v47, 0.0  ;;  %v1930_v11 = vadd.f32 %v7530_v30, %v1929_v14  ;;  %4717 = vrot.lane.b32.xlu1 %v4696_v61, %s5328_s13  ;;  %4737 = vrot.lane.b32.xlu0 %v4736_v48, %s5321_s25  ;;  %v2273_v61 = vsel %vm564_vm2, %v2237_v40, %v2255_v27  ;;  %v2129_v47 = vrot.slane %v2069_v19, 7 }
 0x260   : > { %v3954_v18 = vpop.f32.mrf.mxu0  ;;  %v7657_v58 = vpack.i.bf16 %v2273_v61, %v2291_v49  ;;  %v7682_v7 = vsel %vm473_vm1, %v2128_v12, %v2146_v63  ;;  %v2088_v61 = vld [vmem:[#allocation2 + $0x118] sm:$0xff]  ;;  %v7745_v12 = vld [vmem:[#allocation2 + $0x108] sm:$0xff] }
 0x261   : > { %2040 = vst.msk [vmem:[#allocation2 + $0x150] sm:$0xff] %vm238_vm0, %v2008_v44  ;;  %v2006_v26 = vmax.f32 %v1930_v11, 0.0  ;;  %v1951_v39 = vadd.f32 %v3954_v18, %v7530_v30  ;;  %v4796_v56 = vpack.i.bf16 %v7672_v42, %v7682_v7  ;;  %v2236_v11 = vrot.slane %v7628_v25, 1  ;;  %v2096_v49 = vld [vmem:[#allocation2 + $0x158] sm:$0xff] }
 0x262   : > { %v1942_v5 = vpop.f32.mrf.mxu0  ;;  %v2259_v63 = vrot.slane %v2088_v61, 1 }
 0x263   : > { %2038 = vst.msk [vmem:[#allocation2 + $0x130] sm:$0xff] %vm238_vm0, %v2006_v26  ;;  %v2011_v32 = vmax.f32 %v1951_v39, 0.0  ;;  %v1943_v34 = vadd.f32 %v7530_v30, %v1942_v5  ;;  %4722 = vrot.lane.b32.xlu1 %v4721_v31, %s5322_s26  ;;  %4742 = vrot.lane.b32.xlu0 %v4736_v48, %s5324_s28 }
 0x264   : > { %v3955_v10 = vpop.f32.mrf.mxu0 }
 0x265   : > { %2043 = vst.msk [vmem:[#allocation2 + $0x188] sm:$0xff] %vm238_vm0, %v2011_v32  ;;  %v2009_v6 = vmax.f32 %v1943_v34, 0.0  ;;  %v1954_v17 = vadd.f32 %v3955_v10, %v7530_v30  ;;  %v2272_v32 = vsel %vm564_vm2, %v2236_v11, %v2254_v21 }
 0x266   : > { %v1945_v3 = vpop.f32.mrf.mxu0 }
 0x267   : > { %2041 = vst.msk [vmem:[#allocation2 + $0x168] sm:$0xff] %vm238_vm0, %v2009_v6  ;;  %v2012_v52 = vmax.f32 %v1954_v17, 0.0  ;;  %v1946_v23 = vadd.f32 %v7530_v30, %v1945_v3  ;;  %4732 = vrot.lane.b32.xlu1 %v4721_v31, %s5325_s29  ;;  %4757 = vrot.lane.b32.xlu0 %v4756_v2, %s5327_s8  ;;  %v2218_v31 = vrot.slane %v7635_v16, 1  ;;  %v7718_v17 = vld [vmem:[#allocation2 + $0xd0] sm:$0xff]  ;;  %v7720_v3 = vld [vmem:[#allocation2 + $0xa0] sm:$0xff] }
 0x268   : > { %v3958_v0 = vpop.f32.mrf.mxu0 }
 0x269   : > { %2044 = vst.msk [vmem:[#allocation2 + $0x190] sm:$0xff] %vm238_vm0, %v2012_v52  ;;  %v2010_v51 = vmax.f32 %v1946_v23, 0.0  ;;  %v1967_v37 = vadd.f32 %v3958_v0, %v7530_v30  ;;  %v2290_v34 = vsel %vm564_vm2, %v2218_v31, %v2236_v11  ;;  %v2104_v52 = vld [vmem:[#allocation2 + $0x198] sm:$0xff]  ;;  %v2239_v0 = vrot.slane %v7718_v17, 1 }
 0x26a   : > { %v1958_v60 = vpop.f32.mrf.mxu0  ;;  %v7716_v6 = vpack.i.bf16 %v2272_v32, %v2290_v34  ;;  %v7728_v23 = vld [vmem:[#allocation2 + $0x178] sm:$0xff]  ;;  %v2263_v19 = vrot.slane %v2104_v52, 1  ;;  %v3521_v52 = vsel %vm1824_vm3, %v7653_v1, 0 }
 0x26b   : > { %2042 = vst.msk [vmem:[#allocation2 + $0x170] sm:$0xff] %vm238_vm0, %v2010_v51  ;;  %v2015_v57 = vmax.f32 %v1967_v37, 0.0  ;;  %v1959_v20 = vadd.f32 %v7530_v30, %v1958_v60  ;;  %4747 = vrot.lane.b32.xlu1 %v4736_v48, %s5327_s8  ;;  %4767 = vrot.lane.b32.xlu0 %v7657_v58, %s5322_s26  ;;  %v2147_v48 = vrot.slane %v7611_v41, 7  ;;  %v7731_v37 = vld [vmem:[#allocation2 + $0x110] sm:$0xff]  ;;  %v7735_v60 = vld [vmem:[#allocation2 + $0x1b8] sm:$0xff] }
 0x26c   : > { %v3959_v46 = vpop.f32.mrf.mxu0  ;;  %3965 = vmatpush3.bf16.msra.mxu1 %v3521_v52  ;;  %v7818_v24 = vpack.i.bf16 %v7731_v37, %v7745_v12 }
 0x26d   : > { %2047 = vst.msk [vmem:[#allocation2 + $0x1c8] sm:$0xff] %vm238_vm0, %v2015_v57  ;;  %v2013_v15 = vmax.f32 %v1959_v20, 0.0  ;;  %v1970_v59 = vadd.f32 %v3959_v46, %v7530_v30  ;;  %v7691_v44 = vsel %vm473_vm1, %v2147_v48, %v2165_v33  ;;  %v7700_v39 = vsel %vm473_vm1, %v2129_v47, %v2147_v48  ;;  %v7742_v20 = vld [vmem:[#allocation2 + $0x1f8] sm:$0xff]  ;;  %v7761_v47 = vld [vmem:[#allocation2 + $0xa8] sm:$0xff] }
 0x26e   : > { %v1961_v22 = vpop.f32.mrf.mxu0  ;;  %9367 = vst [vmem:[#allocation67_spill] sm:$0xff] %v7700_v39  ;;  %v4771_v40 = vpack.i.bf16 %v7691_v44, %v7700_v39  ;;  %v2130_v57 = vrot.slane %v7720_v3, 7  ;;  %v2241_v33 = vrot.slane %v7731_v37, 1  ;;  %v7799_v34 = vld [vmem:[#allocation2 + $0x168] sm:$0xff] }
 0x26f   : > { %2045 = vst.msk [vmem:[#allocation2 + $0x1a8] sm:$0xff] %vm238_vm0, %v2013_v15  ;;  %v2016_v53 = vmax.f32 %v1970_v59, 0.0  ;;  %v1962_v35 = vadd.f32 %v7530_v30, %v1961_v22  ;;  %4752 = vrot.lane.b32.xlu1 %v4756_v2, %s5321_s25  ;;  %4777 = vrot.lane.b32.xlu0 %v7657_v58, %s5325_s29  ;;  %v7747_v15 = vld [vmem:[#allocation2 + $0x150] sm:$0xff]  ;;  %v2261_v59 = vrot.slane %v2096_v49, 1  ;;  %v2226_v1 = vrot.slane %v7799_v34, 1 }
 0x270   : > { %v3962_v4 = vpop.f32.mrf.mxu0  ;;  %v7753_v22 = vld [vmem:[#allocation2 + $0xb0] sm:$0xff] }
 0x271   : > { %2048 = vst.msk [vmem:[#allocation2 + $0x1d0] sm:$0xff] %vm238_vm0, %v2016_v53  ;;  %v2014_v8 = vmax.f32 %v1962_v35, 0.0  ;;  %v1983_v14 = vadd.f32 %v3962_v4, %v7530_v30  ;;  %v7756_v53 = vld [vmem:[#allocation2 + $0x190] sm:$0xff]  ;;  %v2262_v35 = vrot.slane %v7728_v23, 1  ;;  %v2264_v4 = vrot.slane %v7735_v60, 1 }
 0x272   : > { %v1974_v43 = vpop.f32.mrf.mxu0  ;;  %v7772_v11 = vld [vmem:[#allocation2 + $0x170] sm:$0xff] }
 0x273   : > { %2046 = vst.msk [vmem:[#allocation2 + $0x1b0] sm:$0xff] %vm238_vm0, %v2014_v8  ;;  %v2019_v18 = vmax.f32 %v1983_v14, 0.0  ;;  %v1975_v41 = vadd.f32 %v7530_v30, %v1974_v43  ;;  %4762 = vrot.lane.b32.xlu1 %v4756_v2, %s5324_s28  ;;  %4797 = vrot.lane.b32.xlu0 %v4796_v56, %s5323_s27  ;;  %v2080_v2 = vld [vmem:[#allocation2 + $0xd8] sm:$0xff]  ;;  %v2266_v8 = vrot.slane %v7742_v20, 1  ;;  %v2223_v14 = vrot.slane %v7745_v12, 1 }
 0x274   : > { %v3963_v26 = vpop.f32.mrf.mxu0  ;;  %v2257_v51 = vrot.slane %v2080_v2, 1  ;;  %v2243_v43 = vrot.slane %v7747_v15, 1 }
 0x275   : > { %2051 = vst.msk [vmem:[#allocation2 + $0x208] sm:$0xff] %vm238_vm0, %v2019_v18  ;;  %v2017_v5 = vmax.f32 %v1975_v41, 0.0  ;;  %v1986_v25 = vadd.f32 %v3963_v26, %v7530_v30  ;;  %v7778_v18 = vpack.i.bf16 %v7753_v22, %v7761_v47  ;;  %v7780_v41 = vld [vmem:[#allocation2 + $0x188] sm:$0xff]  ;;  %v2245_v26 = vrot.slane %v7756_v53, 1 }
 0x276   : > { %v1977_v27 = vpop.f32.mrf.mxu0  ;;  %v2295_v32 = vsel %vm564_vm2, %v2223_v14, %v2241_v33  ;;  %v7805_v2 = vld [vmem:[#allocation2 + $0x1a8] sm:$0xff]  ;;  %v2279_v23 = vsel %vm564_vm2, %v2243_v43, %v2261_v59  ;;  %v5306_v59 = vld [vmem:[%s8913_s3] sm:$0xff]  }
 0x277   : > { %2049 = vst.msk [vmem:[#allocation2 + $0x1e8] sm:$0xff] %vm238_vm0, %v2017_v5  ;;  %v2020_v10 = vmax.f32 %v1986_v25, 0.0  ;;  %v1978_v16 = vadd.f32 %v7530_v30, %v1977_v27  ;;  %4772 = vrot.lane.b32.xlu1 %v4771_v40, %s5323_s27  ;;  %4802 = vrot.lane.b32.xlu0 %v4796_v56, %s5326_s30  ;;  %v7726_v30 = vld [vmem:[#allocation2 + $0xc8] sm:$0xff]  ;;  %v2277_v27 = vsel %vm564_vm2, %v2241_v33, %v2259_v63  ;;  %v2228_v33 = vrot.slane %v7805_v2, 1 }
 0x278   : > { %v7739_v36 = vpack.i.bf16 %v7718_v17, %v7726_v30  ;;  %v2221_v46 = vrot.slane %v7726_v30, 1  ;;  %v7769_v56 = vld [vmem:[#allocation2 + $0x148] sm:$0xff]  ;;  %v7774_v21 = vld [vmem:[#allocation2 + $0x1d0] sm:$0xff]  ;;  %v2281_v20 = vsel %vm564_vm2, %v2245_v26, %v2263_v19 }
 0x279   : > { %2052 = vst.msk [vmem:[#allocation2 + $0x210] sm:$0xff] %vm238_vm0, %v2020_v10  ;;  %v2018_v13 = vmax.f32 %v1978_v16, 0.0  ;;  %v5305_v5 = vld [vmem:[%s8913_s3 + $0x8] sm:$0xff]   ;;  %v2225_v16 = vrot.slane %v7769_v56, 1  ;;  %v2247_v61 = vrot.slane %v7774_v21, 1 }
 0x27a   : > { %v2293_v48 = vsel %vm564_vm2, %v2221_v46, %v2239_v0  ;;  %v7783_v31 = vld [vmem:[#allocation2 + $0x1b0] sm:$0xff]  ;;  %v7801_v10 = vld [vmem:[#allocation2 + $0x1c8] sm:$0xff]  ;;  %3966 = vmatprep.subr.bf16.mxu1 %v5305_v5 }
 0x27b   : > { %2050 = vst.msk [vmem:[#allocation2 + $0x1f0] sm:$0xff] %vm238_vm0, %v2018_v13  ;;  %4782 = vrot.lane.b32.xlu1 %v4771_v40, %s5326_s30  ;;  %4807 = vrot.lane.b32.xlu0 %v7716_v6, %s5328_s13  ;;  %v2166_v40 = vrot.slane %v7753_v22, 7  ;;  %v2244_v13 = vrot.slane %v7772_v11, 1  ;;  %v2297_v60 = vsel %vm564_vm2, %v2225_v16, %v2243_v43  ;;  %v2229_v46 = vrot.slane %v7801_v10, 1 }
 0x27c   : > { %3967 = vmatpush3.bf16.msra.mxu1 %v5305_v5  ;;  %v2148_v5 = vrot.slane %v7761_v47, 7 }
 0x27d   : > { %v2280_v14 = vsel %vm564_vm2, %v2244_v13, %v2262_v35  ;;  %v2298_v43 = vsel %vm564_vm2, %v2226_v1, %v2244_v13  ;;  %v2301_v16 = vsel %vm564_vm2, %v2229_v46, %v2247_v61  ;;  %v7856_v35 = vpack.i.bf16 %v7747_v15, %v7769_v56  ;;  %3968 = vmatprep.subr.bf16.mxu1 %v5306_v59 }
 0x27e   : > { %v7826_v63 = vld [vmem:[#allocation2 + $0x1e8] sm:$0xff]  ;;  %v2167_v46 = vrot.slane %v7718_v17, 7 }
 0x27f   : > { %4787 = vrot.lane.b32.xlu1 %v7657_v58, %s5328_s13  ;;  %4817 = vrot.lane.b32.xlu0 %v7739_v36, %s5321_s25  ;;  %v2275_v58 = vsel %vm564_vm2, %v2239_v0, %v2257_v51  ;;  %v2227_v0 = vrot.slane %v7780_v41, 1  ;;  %v2246_v51 = vrot.slane %v7783_v31, 1 }
 0x280   : > { %v7792_v25 = vpack.i.bf16 %v2275_v58, %v2293_v48  ;;  %v7839_v48 = vpack.i.bf16 %v2277_v27, %v2295_v32  ;;  %v2230_v27 = vrot.slane %v7826_v63, 1  ;;  %v7858_v32 = vpack.i.bf16 %v2279_v23, %v2297_v60  ;;  %v2077_v60 = vld [vmem:[#allocation2 + $0xc0] sm:$0xff]  ;;  %3969 = vmatpush3.bf16.msra.mxu1 %v5306_v59  ;;  %v2076_v59 = vld [vmem:[#allocation2 + $0xb8] sm:$0xff] }
 0x281   : > { %v2299_v19 = vsel %vm564_vm2, %v2227_v0, %v2245_v26  ;;  %v2282_v26 = vsel %vm564_vm2, %v2246_v51, %v2264_v4  ;;  %v2300_v52 = vsel %vm564_vm2, %v2228_v33, %v2246_v51  ;;  %v7866_v4 = vpack.i.bf16 %v7772_v11, %v7799_v34 }
 0x282   : > { %v7808_v49 = vld [vmem:[#allocation2 + $0x1f0] sm:$0xff]  ;;  %v7868_v13 = vpack.i.bf16 %v2281_v20, %v2299_v19  ;;  %v7877_v23 = vpack.i.bf16 %v2280_v14, %v2298_v43  ;;  %v7883_v51 = vpack.i.bf16 %v7783_v31, %v7805_v2  ;;  %v7891_v1 = vpack.i.bf16 %v2282_v26, %v2300_v52 }
 0x283   : > { %4792 = vrot.lane.b32.xlu1 %v7716_v6, %s5322_s26  ;;  %4822 = vrot.lane.b32.xlu0 %v7739_v36, %s5324_s28  ;;  %v2248_v58 = vrot.slane %v7808_v49, 1  ;;  %v7900_v19 = vpack.i.bf16 %v7808_v49, %v7826_v63  ;;  %v2131_v17 = vrot.slane %v2077_v60, 7  ;;  %v2083_v52 = vld [vmem:[#allocation2 + $0xf0] sm:$0xff] }
 0x285   : > { %v2302_v0 = vsel %vm564_vm2, %v2230_v27, %v2248_v58 }
 0x287   : > { %4812 = vrot.lane.b32.xlu1 %v7716_v6, %s5325_s29  ;;  %4837 = vrot.lane.b32.xlu0 %v7778_v18, %s5327_s8  ;;  %v2283_v6 = vsel %vm564_vm2, %v2247_v61, %v2265_v62  ;;  %v7862_v62 = vpack.i.bf16 %v7756_v53, %v7780_v41  ;;  %v2284_v61 = vsel %vm564_vm2, %v2248_v58, %v2266_v8  ;;  %v2149_v58 = vrot.slane %v7726_v30, 7 }
 0x288   : > { %v7889_v20 = vpack.i.bf16 %v2283_v6, %v2301_v16  ;;  %v7895_v8 = vsel %vm473_vm1, %v2148_v5, %v2166_v40  ;;  %v7906_v33 = vpack.i.bf16 %v2284_v61, %v2302_v0  ;;  %v7912_v40 = vsel %vm473_vm1, %v2130_v57, %v2148_v5  ;;  %v2081_v5 = vld [vmem:[#allocation2 + $0xe0] sm:$0xff] }
 0x289   : > { %9369 = vst [vmem:[#allocation68_spill] sm:$0xff] %v7895_v8  ;;  %9370 = vst [vmem:[#allocation70_spill] sm:$0xff] %v7912_v40  ;;  %v4876_v14 = vpack.i.bf16 %v7895_v8, %v7912_v40  ;;  %v7919_v43 = vsel %vm473_vm1, %v2149_v58, %v2167_v46  ;;  %v2238_v6 = vrot.slane %v7753_v22, 1  ;;  %v2256_v16 = vrot.slane %v2076_v59, 1 }
 0x28a   : > { %9368 = vst [vmem:[#allocation69_spill] sm:$0xff] %v7889_v20  ;;  %v7927_v3 = vsel %vm473_vm1, %v2131_v17, %v2149_v58  ;;  %v2220_v30 = vrot.slane %v7761_v47, 1  ;;  %v2082_v47 = vld [vmem:[#allocation2 + $0xe8] sm:$0xff]  ;;  %v2168_v61 = vrot.slane %v2083_v52, 7  ;;  %v2132_v0 = vrot.slane %v2081_v5, 7  ;;  %v2085_v58 = vld [vmem:[#allocation2 + $0x100] sm:$0xff]  ;;  %v7983_v5 = vpop.permute.xlu0 %4662 }
 0x28b   : > { %4827 = vrot.lane.b32.xlu1 %v7739_v36, %s5327_s8  ;;  %4847 = vrot.lane.b32.xlu0 %v7792_v25, %s5322_s26  ;;  %v7887_v36 = vpack.i.bf16 %v7774_v21, %v7801_v10  ;;  %v4851_v57 = vpack.i.bf16 %v7919_v43, %v7927_v3  ;;  %v2274_v26 = vsel %vm564_vm2, %v2238_v6, %v2256_v16  ;;  %v2150_v60 = vrot.slane %v2082_v47, 7 }
 0x28c   : > { %v2292_v22 = vsel %vm564_vm2, %v2220_v30, %v2238_v6  ;;  %v4906_v27 = vpack.i.bf16 %v2083_v52, %v2082_v47  ;;  %v2240_v6 = vrot.slane %v2083_v52, 1  ;;  %v2133_v30 = vrot.slane %v2085_v58, 7 }
 0x28d   : > { %v7948_v46 = vsel %vm473_vm1, %v2150_v60, %v2168_v61  ;;  %v7955_v59 = vsel %vm473_vm1, %v2132_v0, %v2150_v60  ;;  %v2090_v61 = vld [vmem:[#allocation2 + $0x128] sm:$0xff]  ;;  %v2093_v0 = vld [vmem:[#allocation2 + $0x140] sm:$0xff]  ;;  %v2157_v8 = vrot.slane %v7801_v10, 7 }
 0x28e   : > { %9371 = vst [vmem:[#allocation71_spill] sm:$0xff] %v7948_v46  ;;  %9372 = vst [vmem:[#allocation72_spill] sm:$0xff] %v7955_v59  ;;  %v4931_v17 = vpack.i.bf16 %v7948_v46, %v7955_v59  ;;  %v2089_v60 = vld [vmem:[#allocation2 + $0x120] sm:$0xff]  ;;  %v7994_v58 = vpop.permute.xlu0 %4667 }
 0x28f   : > { %4832 = vrot.lane.b32.xlu1 %v7778_v18, %s5321_s25  ;;  %4857 = vrot.lane.b32.xlu0 %v7792_v25, %s5325_s29  ;;  %v2101_v59 = vld [vmem:[#allocation2 + $0x180] sm:$0xff] }
 0x290   : > { %v2097_v46 = vld [vmem:[#allocation2 + $0x160] sm:$0xff] }
 0x293   : > { %4842 = vrot.lane.b32.xlu1 %v7778_v18, %s5324_s28  ;;  %4877 = vrot.lane.b32.xlu0 %v4876_v14, %s5323_s27  ;;  %v4886_v18 = vpack.i.bf16 %v2274_v26, %v2292_v22  ;;  %v2222_v26 = vrot.slane %v2082_v47, 1 }
 0x297   : > { %4852 = vrot.lane.b32.xlu1 %v4851_v57, %s5323_s27  ;;  %4882 = vrot.lane.b32.xlu0 %v4876_v14, %s5326_s30  ;;  %v2169_v14 = vrot.slane %v7731_v37, 7  ;;  %v2294_v37 = vsel %vm564_vm2, %v2222_v26, %v2240_v6 }
 0x29b   : > { %4862 = vrot.lane.b32.xlu1 %v4851_v57, %s5326_s30  ;;  %4887 = vrot.lane.b32.xlu0 %v4886_v18, %s5328_s13  ;;  %v2151_v57 = vrot.slane %v7745_v12, 7 }
 0x29d   : > { %v7965_v22 = vsel %vm473_vm1, %v2151_v57, %v2169_v14  ;;  %v7975_v52 = vsel %vm473_vm1, %v2133_v30, %v2151_v57  ;;  %v2092_v14 = vld [vmem:[#allocation2 + $0x138] sm:$0xff]  ;;  %v2134_v30 = vrot.slane %v2089_v60, 7  ;;  %v2152_v57 = vrot.slane %v2090_v61, 7 }
 0x29e   : > { %9373 = vst [vmem:[#allocation73_spill] sm:$0xff] %v7965_v22  ;;  %9374 = vst [vmem:[#allocation75_spill] sm:$0xff] %v7975_v52  ;;  %v7979_v12 = vpack.i.bf16 %v7965_v22, %v7975_v52  ;;  %v2260_v29 = vrot.slane %v2092_v14, 1  ;;  %v2224_v60 = vrot.slane %v2090_v61, 1  ;;  %v2105_v52 = vld [vmem:[#allocation2 + $0x1a0] sm:$0xff]  ;;  %v4665_v22 = vunpack.i.h.bf16 %v7983_v5 }
 0x29f   : > { %4867 = vrot.lane.b32.xlu1 %v7792_v25, %s5328_s13  ;;  %4897 = vrot.lane.b32.xlu0 %v7818_v24, %s5321_s25  ;;  %v2084_v25 = vld [vmem:[#allocation2 + $0xf8] sm:$0xff] }
 0x2a0   : > { %v2258_v16 = vrot.slane %v2084_v25, 1  ;;  %v2171_v25 = vrot.slane %v7747_v15, 7  ;;  %v3180_v39 = vsel %vm238_vm0, %v7525_v55, %v4665_v22  ;;  %v2176_v55 = vrot.slane %v7808_v49, 7 }
 0x2a3   : > { %4872 = vrot.lane.b32.xlu1 %v4886_v18, %s5322_s26  ;;  %4907 = vrot.lane.b32.xlu0 %v4906_v27, %s5327_s8 }
 0x2a7   : > { %4892 = vrot.lane.b32.xlu1 %v4886_v18, %s5325_s29  ;;  %4917 = vrot.lane.b32.xlu0 %v7839_v48, %s5322_s26  ;;  %v2276_v18 = vsel %vm564_vm2, %v2240_v6, %v2258_v16  ;;  %v2135_v6 = vrot.slane %v2093_v0, 7  ;;  %v2153_v16 = vrot.slane %v7769_v56, 7  ;;  %v8017_v0 = vsel %vm473_vm1, %v2134_v30, %v2152_v57 }
 0x2a8   : > { %v7981_v47 = vpack.i.bf16 %v2276_v18, %v2294_v37  ;;  %9378 = vst [vmem:[#allocation44_spill] sm:$0xff] %v8017_v0 }
 0x2a9   : > { %v8001_v15 = vsel %vm473_vm1, %v2153_v16, %v2171_v25  ;;  %v8013_v56 = vsel %vm473_vm1, %v2135_v6, %v2153_v16 }
 0x2aa   : > { %9375 = vst [vmem:[#allocation43_spill] sm:$0xff] %v8001_v15  ;;  %9377 = vst [vmem:[#allocation76_spill] sm:$0xff] %v8013_v56 }
 0x2ab   : > { %4902 = vrot.lane.b32.xlu1 %v4906_v27, %s5321_s25  ;;  %4932 = vrot.lane.b32.xlu0 %v4931_v17, %s5323_s27 }
 0x2af   : > { %4912 = vrot.lane.b32.xlu1 %v4906_v27, %s5324_s28  ;;  %4937 = vrot.lane.b32.xlu0 %v4931_v17, %s5326_s30  ;;  %v2091_v27 = vld [vmem:[#allocation2 + $0x130] sm:$0xff] }
 0x2b0   : > { %v2170_v17 = vrot.slane %v2091_v27, 7  ;;  %v7997_v26 = vpack.i.bf16 %v2091_v27, %v2090_v61  ;;  %v2242_v37 = vrot.slane %v2091_v27, 1  ;;  %v8025_v27 = vpack.i.bf16 %v8001_v15, %v8013_v56 }
 0x2b1   : > { %v2154_v56 = vrot.slane %v7799_v34, 7 }
 0x2b2   : > { %v8005_v18 = vsel %vm473_vm1, %v2152_v57, %v2170_v17  ;;  %v2278_v6 = vsel %vm564_vm2, %v2242_v37, %v2260_v29  ;;  %v2296_v16 = vsel %vm564_vm2, %v2224_v60, %v2242_v37  ;;  %v2172_v29 = vrot.slane %v7772_v11, 7 }
 0x2b3   : > { %4922 = vrot.lane.b32.xlu1 %v7979_v12, %s5323_s27  ;;  %4942 = vrot.lane.b32.xlu0 %v7981_v47, %s5328_s13  ;;  %9376 = vst [vmem:[#allocation74_spill] sm:$0xff] %v8005_v18  ;;  %v8029_v14 = vpack.i.bf16 %v8005_v18, %v8017_v0  ;;  %v8043_v57 = vpack.i.bf16 %v2278_v6, %v2296_v16  ;;  %v2173_v0 = vrot.slane %v7756_v53, 7  ;;  %v2137_v37 = vrot.slane %v2101_v59, 7 }
 0x2b4   : > { %v2155_v60 = vrot.slane %v7780_v41, 7  ;;  %v2136_v18 = vrot.slane %v2097_v46, 7  ;;  %v8063_v11 = vsel %vm473_vm1, %v2154_v56, %v2172_v29  ;;  %v2053_v46 = vld [vmem:[#allocation2] sm:$0xff] }
 0x2b5   : > { %9380 = vst [vmem:[#allocation45_spill] sm:$0xff] %v8063_v11 }
 0x2b6   : > { %v8059_v53 = vsel %vm473_vm1, %v2155_v60, %v2173_v0  ;;  %v8071_v41 = vsel %vm473_vm1, %v2137_v37, %v2155_v60  ;;  %v8075_v34 = vsel %vm473_vm1, %v2136_v18, %v2154_v56  ;;  %v2125_v18 = vrot.slane %v2053_v46, 7  ;;  %v2109_v56 = vld [vmem:[#allocation2 + $0x1c0] sm:$0xff] }
 0x2b7   : > { %4927 = vrot.lane.b32.xlu1 %v7981_v47, %s5322_s26  ;;  %4947 = vrot.lane.b32.xlu0 %v7856_v35, %s5321_s25  ;;  %9379 = vst [vmem:[#allocation77_spill] sm:$0xff] %v8059_v53  ;;  %9381 = vst [vmem:[#allocation49_spill] sm:$0xff] %v8071_v41  ;;  %v8083_v29 = vpack.i.bf16 %v8059_v53, %v8071_v41  ;;  %v8087_v15 = vpack.i.bf16 %v8063_v11, %v8075_v34  ;;  %v2175_v41 = vrot.slane %v7774_v21, 7 }
 0x2b8   : > { %9382 = vst [vmem:[#allocation46_spill] sm:$0xff] %v8075_v34  ;;  %v2174_v53 = vrot.slane %v7783_v31, 7  ;;  %v4664_v34 = vunpack.i.l.bf16 %v7983_v5  ;;  %v2139_v46 = vrot.slane %v2109_v56, 7  ;;  %v9384_v11 = vrot.slane %v7510_v50, 7 }
 0x2b9   : > { %9383 = vst [vmem:[#allocation78_spill] sm:$0xff] %v8083_v29  ;;  %v2156_v21 = vrot.slane %v7805_v2, 7  ;;  %v8117_v56 = vsel %vm473_vm1, %v2157_v8, %v2175_v41  ;;  %v4670_v2 = vunpack.i.h.bf16 %v7994_v58 }
 0x2ba   : > { %v2197_v40 = vsel %vm473_vm1, %v2125_v18, %v9384_v11  ;;  %v2113_v11 = vld [vmem:[#allocation2 + $0x1e0] sm:$0xff] }
 0x2bb   : > { %4952 = vrot.lane.b32.xlu1 %v7997_v26, %s5321_s25  ;;  %4957 = vrot.lane.b32.xlu0 %v7858_v32, %s5322_s26  ;;  %v8121_v50 = vsel %vm473_vm1, %v2156_v21, %v2174_v53  ;;  %v3179_v10 = vsel %vm238_vm0, %v2197_v40, %v4664_v34  ;;  %v8133_v53 = vsel %vm473_vm1, %v2139_v46, %v2157_v8 }
 0x2bc   : > { %9385 = vst [vmem:[#allocation79_spill] sm:$0xff] %v8121_v50  ;;  %9386 = vst [vmem:[#allocation50_spill] sm:$0xff] %v8133_v53  ;;  %v8143_v18 = vpack.i.bf16 %v8117_v56, %v8133_v53  ;;  %v3212_v46 = vsel %vm1507_vm4, %v3180_v39, %v4670_v2 }
 0x2bd   : > { %v8019_v25 = vpop.permute.xlu1 %4682  ;;  %v8021_v17 = vpop.permute.xlu0 %4672 }
 0x2bf   : > { %4962 = vrot.lane.b32.xlu1 %v8025_v27, %s5323_s27  ;;  %4972 = vrot.lane.b32.xlu0 %v8029_v14, %s5323_s27 }
 0x2c1   : > { %v8039_v61 = vpop.permute.xlu0 %4677  ;;  %v8041_v30 = vpop.permute.xlu1 %4687 }
 0x2c3   : > { %4967 = vrot.lane.b32.xlu1 %v8043_v57, %s5322_s26  ;;  %4977 = vrot.lane.b32.xlu0 %v7862_v62, %s5321_s25 }
 0x2c5   : > { %v8053_v6 = vpop.permute.xlu0 %4697  ;;  %v8055_v16 = vpop.permute.xlu1 %4692 }
 0x2c7   : > { %4982 = vrot.lane.b32.xlu1 %v7866_v4, %s5321_s25  ;;  %4987 = vrot.lane.b32.xlu0 %v7868_v13, %s5322_s26 }
 0x2c9   : > { %v8077_v59 = vpop.permute.xlu0 %4707  ;;  %v8079_v0 = vpop.permute.xlu1 %4702 }
 0x2cb   : > { %4992 = vrot.lane.b32.xlu1 %v8083_v29, %s5323_s27  ;;  %5002 = vrot.lane.b32.xlu0 %v8087_v15, %s5323_s27  ;;  %v2138_v29 = vrot.slane %v2105_v52, 7  ;;  %v4669_v52 = vunpack.i.l.bf16 %v7994_v58 }
 0x2cd   : > { %v8093_v37 = vpop.permute.xlu1 %4712  ;;  %v4728_v60 = vpop.permute.xlu0 %4727  ;;  %v8137_v40 = vsel %vm473_vm1, %v2138_v29, %v2156_v21  ;;  %v3211_v8 = vsel %vm1507_vm4, %v3179_v10, %v4669_v52  ;;  %v4694_v10 = vunpack.i.l.bf16 %v8055_v16 }
 0x2ce   : > { %v4730_v22 = vunpack.i.h.bf16 %v4728_v60  ;;  %v4729_v41 = vunpack.i.l.bf16 %v4728_v60  ;;  %9387 = vst [vmem:[#allocation51_spill] sm:$0xff] %v8137_v40  ;;  %v8147_v49 = vpack.i.bf16 %v8121_v50, %v8137_v40  ;;  %v2140_v60 = vrot.slane %v2113_v11, 7 }
 0x2cf   : > { %4997 = vrot.lane.b32.xlu1 %v7877_v23, %s5322_s26  ;;  %5007 = vrot.lane.b32.xlu0 %v7887_v36, %s5321_s25 }
 0x2d0   : > { %v3244_v21 = vsel %vm1540_vm5, %v3212_v46, %v4730_v22  ;;  %v3243_v11 = vsel %vm1540_vm5, %v3211_v8, %v4729_v41  ;;  %v4715_v22 = vunpack.i.h.bf16 %v8093_v37  ;;  %v4714_v41 = vunpack.i.l.bf16 %v8093_v37 }
 0x2d1   : > { %v8109_v31 = vpop.permute.xlu1 %4717  ;;  %v8111_v5 = vpop.permute.xlu0 %4737  ;;  %v3275_v8 = vsel %vm1573_vm6, %v3243_v11, %v4694_v10  ;;  %v4690_v37 = vunpack.i.h.bf16 %v8041_v30  ;;  %v4689_v11 = vunpack.i.l.bf16 %v8041_v30 }
 0x2d3   : > { %5012 = vrot.lane.b32.xlu1 %v7883_v51, %s5321_s25  ;;  %5017 = vrot.lane.b32.xlu0 %v7889_v20, %s5322_s26  ;;  %v2158_v20 = vrot.slane %v7826_v63, 7  ;;  %v4695_v63 = vunpack.i.h.bf16 %v8055_v16 }
 0x2d5   : > { %v4723_v34 = vpop.permute.xlu1 %4722  ;;  %v8139_v58 = vpop.permute.xlu0 %4742  ;;  %v8158_v29 = vsel %vm473_vm1, %v2158_v20, %v2176_v55  ;;  %v8168_v2 = vsel %vm473_vm1, %v2140_v60, %v2158_v20  ;;  %v3276_v16 = vsel %vm1573_vm6, %v3244_v21, %v4695_v63  ;;  %v4685_v20 = vunpack.i.h.bf16 %v8019_v25 }
 0x2d6   : > { %9388 = vst [vmem:[#allocation52_spill] sm:$0xff] %v8158_v29  ;;  %9389 = vst [vmem:[#allocation80_spill] sm:$0xff] %v8168_v2  ;;  %v8172_v55 = vpack.i.bf16 %v8158_v29, %v8168_v2  ;;  %v4684_v60 = vunpack.i.l.bf16 %v8019_v25  ;;  %v4720_v29 = vunpack.i.h.bf16 %v8109_v31  ;;  %v4719_v25 = vunpack.i.l.bf16 %v8109_v31 }
 0x2d7   : > { %5022 = vrot.lane.b32.xlu1 %v8143_v18, %s5323_s27  ;;  %5032 = vrot.lane.b32.xlu0 %v8147_v49, %s5323_s27  ;;  %v4725_v53 = vunpack.i.h.bf16 %v4723_v34  ;;  %v3182_v31 = vsel %vm238_vm0, %v7590_v38, %v4690_v37  ;;  %v4679_v37 = vunpack.i.l.bf16 %v8039_v61 }
 0x2d9   : > { %v4733_v52 = vpop.permute.xlu1 %4732  ;;  %v8164_v39 = vpop.permute.xlu0 %4757 }
 0x2da   : > { %v4735_v40 = vunpack.i.h.bf16 %v4733_v52  ;;  %v4734_v50 = vunpack.i.l.bf16 %v4733_v52 }
 0x2db   : > { %5027 = vrot.lane.b32.xlu1 %v7891_v1, %s5322_s26  ;;  %5037 = vrot.lane.b32.xlu0 %v7818_v24, %s5324_s28 }
 0x2dc   : > { %v3307_v46 = vsel %vm1606_vm7, %v3275_v8, %v4734_v50  ;;  %v3308_v52 = vsel %vm1606_vm7, %v3276_v16, %v4735_v40  ;;  %v4724_v50 = vunpack.i.l.bf16 %v4723_v34  ;;  %v3181_v8 = vsel %vm238_vm0, %v7598_v9, %v4689_v11 }
 0x2dd   : > { %v8188_v10 = vpop.permute.xlu1 %4747  ;;  %v8190_v21 = vpop.permute.xlu0 %4767  ;;  %v3339_v63 = vsel %vm1639_vm8, %v3307_v46, %v4714_v41  ;;  %v3340_v2 = vsel %vm1639_vm8, %v3308_v52, %v4715_v22 }
 0x2de   : > { %v3371_v30 = vsel %vm1672_vm9, %v3339_v63, %v4684_v60  ;;  %v3372_v40 = vsel %vm1672_vm9, %v3340_v2, %v4685_v20  ;;  %v3213_v46 = vsel %vm1507_vm4, %v3181_v8, %v4724_v50  ;;  %v3214_v60 = vsel %vm1507_vm4, %v3182_v31, %v4725_v53 }
 0x2df   : > { %5042 = vrot.lane.b32.xlu1 %v7981_v47, %s5325_s29  ;;  %5057 = vrot.lane.b32.xlu0 %v8172_v55, %s5323_s27  ;;  %v3403_v41 = vsel %vm1705_vm10, %v3371_v30, %v4719_v25  ;;  %v3404_v22 = vsel %vm1705_vm10, %v3372_v40, %v4720_v29  ;;  %v4705_v2 = vunpack.i.h.bf16 %v8079_v0  ;;  %v4704_v20 = vunpack.i.l.bf16 %v8079_v0 }
 0x2e0   : > { %v3435_v16 = vpack.c.bf16 %v3404_v22, %v3403_v41  ;;  %v4680_v53 = vunpack.i.h.bf16 %v8039_v61  ;;  %v4710_v63 = vunpack.i.h.bf16 %v8077_v59  ;;  %v4709_v25 = vunpack.i.l.bf16 %v8077_v59 }
 0x2e1   : > { %v8208_v34 = vpop.permute.xlu1 %4752  ;;  %v8210_v47 = vpop.permute.xlu0 %4777  ;;  %v3245_v38 = vsel %vm1540_vm5, %v3213_v46, %v4704_v20  ;;  %v3246_v9 = vsel %vm1540_vm5, %v3214_v60, %v4705_v2  ;;  %v4760_v59 = vunpack.i.h.bf16 %v8164_v39  ;;  %v4759_v31 = vunpack.i.l.bf16 %v8164_v39 }
 0x2e2   : > { %3970 = vmatprep.mubr.msk.bf16.mxu1 %vm1775_vm11, %v3435_v16  ;;  %v3277_v0 = vsel %vm1573_vm6, %v3245_v38, %v4679_v37  ;;  %v3278_v11 = vsel %vm1573_vm6, %v3246_v9, %v4680_v53  ;;  %v4675_v39 = vunpack.i.h.bf16 %v8021_v17  ;;  %v4674_v53 = vunpack.i.l.bf16 %v8021_v17 }
 0x2e3   : > { %5047 = vrot.lane.b32.xlu1 %v7900_v19, %s5321_s25  ;;  %5062 = vrot.lane.b32.xlu0 %v7839_v48, %s5325_s29  ;;  %v3309_v61 = vsel %vm1606_vm7, %v3277_v0, %v4709_v25  ;;  %v3310_v22 = vsel %vm1606_vm7, %v3278_v11, %v4710_v63  ;;  %v4700_v63 = vunpack.i.h.bf16 %v8053_v6  ;;  %v4699_v25 = vunpack.i.l.bf16 %v8053_v6 }
 0x2e4   : > { %v3183_v17 = vsel %vm238_vm0, %v7581_v28, %v4674_v53  ;;  %v4749_v28 = vunpack.i.l.bf16 %v8188_v10 }
 0x2e5   : > { %v8223_v29 = vpop.permute.xlu1 %4762  ;;  %v4798_v52 = vpop.permute.xlu0 %4797  ;;  %v3215_v6 = vsel %vm1507_vm4, %v3183_v17, %v4699_v25 }
 0x2e7   : > { %5052 = vrot.lane.b32.xlu1 %v7906_v33, %s5322_s26  ;;  %5072 = vrot.lane.b32.xlu0 %v8029_v14, %s5326_s30 }
 0x2e9   : > { %v8235_v50 = vpop.permute.xlu1 %4772  ;;  %v4803_v30 = vpop.permute.xlu0 %4802 }
 0x2ea   : > { %v4805_v40 = vunpack.i.h.bf16 %v4803_v30  ;;  %v4804_v41 = vunpack.i.l.bf16 %v4803_v30  ;;  %v4800_v30 = vunpack.i.h.bf16 %v4798_v52 }
 0x2eb   : > { %5067 = vrot.lane.b32.xlu1 %v7979_v12, %s5326_s30  ;;  %5082 = vrot.lane.b32.xlu0 %v7997_v26, %s5327_s8 }
 0x2ec   : > { %v3341_v14 = vsel %vm1639_vm8, %v3309_v61, %v4804_v41  ;;  %v3342_v8 = vsel %vm1639_vm8, %v3310_v22, %v4805_v40  ;;  %v3184_v40 = vsel %vm238_vm0, %v7572_v45, %v4675_v39  ;;  %v4764_v22 = vunpack.i.l.bf16 %v8223_v29 }
 0x2ed   : > { %v4783_v16 = vpop.permute.xlu1 %4782  ;;  %v4808_v46 = vpop.permute.xlu0 %4807  ;;  %v3373_v20 = vsel %vm1672_vm9, %v3341_v14, %v4759_v31  ;;  %v3374_v38 = vsel %vm1672_vm9, %v3342_v8, %v4760_v59  ;;  %v4750_v45 = vunpack.i.h.bf16 %v8188_v10  ;;  %v4754_v10 = vunpack.i.l.bf16 %v8208_v34 }
 0x2ee   : > { %v4810_v60 = vunpack.i.h.bf16 %v4808_v46  ;;  %v4809_v2 = vunpack.i.l.bf16 %v4808_v46 }
 0x2ef   : > { %5077 = vrot.lane.b32.xlu1 %v7818_v24, %s5327_s8  ;;  %5092 = vrot.lane.b32.xlu0 %v8043_v57, %s5328_s13  ;;  %v4799_v24 = vunpack.i.l.bf16 %v4798_v52  ;;  %v3216_v52 = vsel %vm1507_vm4, %v3184_v40, %v4700_v63 }
 0x2f0   : > { %v3405_v12 = vsel %vm1705_vm10, %v3373_v20, %v4809_v2  ;;  %v3406_v9 = vsel %vm1705_vm10, %v3374_v38, %v4810_v60  ;;  %v3248_v14 = vsel %vm1540_vm5, %v3216_v52, %v4800_v30  ;;  %v4785_v20 = vunpack.i.h.bf16 %v4783_v16 }
 0x2f1   : > { %v4788_v37 = vpop.permute.xlu1 %4787  ;;  %v4818_v0 = vpop.permute.xlu0 %4817  ;;  %v3436_v11 = vpack.c.bf16 %v3406_v9, %v3405_v12  ;;  %v3247_v8 = vsel %vm1540_vm5, %v3215_v6, %v4799_v24  ;;  %v4784_v38 = vunpack.i.l.bf16 %v4783_v16  ;;  %v4755_v9 = vunpack.i.h.bf16 %v8208_v34 }
 0x2f2   : > { %v4820_v12 = vunpack.i.h.bf16 %v4818_v0  ;;  %v4789_v63 = vunpack.i.l.bf16 %v4788_v37 }
 0x2f3   : > { %5087 = vrot.lane.b32.xlu1 %v7839_v48, %s5328_s13  ;;  %3971 = vmatmul.mubr.msk.bf16.vlgmr.msra.gmra.mxu1 %vm1775_vm11, %v3436_v11  ;;  %v4765_v48 = vunpack.i.h.bf16 %v8223_v29  ;;  %v3279_v29 = vsel %vm1573_vm6, %v3247_v8, %v4764_v22  ;;  %v4790_v11 = vunpack.i.h.bf16 %v4788_v37 }
 0x2f4   : > { %5102 = vrot.lane.b32.xlu0 %v7856_v35, %s5324_s28  ;;  %v3192_v40 = vsel %vm238_vm0, %v7919_v43, %v4820_v12  ;;  %v4779_v12 = vunpack.i.l.bf16 %v8210_v47 }
 0x2f5   : > { %v4793_v41 = vpop.permute.xlu1 %4792  ;;  %v8268_v61 = vpop.permute.xlu0 %4822  ;;  %v3280_v2 = vsel %vm1573_vm6, %v3248_v14, %v4765_v48  ;;  %v3185_v48 = vsel %vm238_vm0, %v7682_v7, %v4754_v10 }
 0x2f6   : > { %v4795_v30 = vunpack.i.h.bf16 %v4793_v41  ;;  %v4794_v24 = vunpack.i.l.bf16 %v4793_v41 }
 0x2f7   : > { %5097 = vrot.lane.b32.xlu1 %v7997_v26, %s5324_s28  ;;  %v4819_v26 = vunpack.i.l.bf16 %v4818_v0 }
 0x2f8   : > { %5112 = vrot.lane.b32.xlu0 %v7858_v32, %s5325_s29 }
 0x2f9   : > { %v4813_v59 = vpop.permute.xlu1 %4812  ;;  %v8282_v31 = vpop.permute.xlu0 %4837  ;;  %v3191_v6 = vsel %vm238_vm0, %v7927_v3, %v4819_v26 }
 0x2fa   : > { %v4815_v46 = vunpack.i.h.bf16 %v4813_v59  ;;  %v4814_v60 = vunpack.i.l.bf16 %v4813_v59  ;;  %v4775_v59 = vunpack.i.h.bf16 %v8235_v50 }
 0x2fb   : > { %5107 = vrot.lane.b32.xlu1 %v8043_v57, %s5325_s29 }
 0x2fc   : > { %v3311_v39 = vsel %vm1606_vm7, %v3279_v29, %v4814_v60  ;;  %v3312_v53 = vsel %vm1606_vm7, %v3280_v2, %v4815_v46  ;;  %5122 = vrot.lane.b32.xlu0 %v8087_v15, %s5326_s30  ;;  %v4774_v46 = vunpack.i.l.bf16 %v8235_v50  ;;  %v4745_v2 = vunpack.i.h.bf16 %v8139_v58 }
 0x2fd   : > { %v3343_v16 = vsel %vm1639_vm8, %v3311_v39, %v4784_v38  ;;  %v3344_v0 = vsel %vm1639_vm8, %v3312_v53, %v4785_v20  ;;  %v8296_v25 = vpop.permute.xlu1 %4827  ;;  %v4848_v57 = vpop.permute.xlu0 %4847  ;;  %v4744_v20 = vunpack.i.l.bf16 %v8139_v58  ;;  %v4780_v38 = vunpack.i.h.bf16 %v8210_v47 }
 0x2fe   : > { %v4850_v17 = vunpack.i.h.bf16 %v4848_v57  ;;  %v4849_v34 = vunpack.i.l.bf16 %v4848_v57  ;;  %v3375_v15 = vsel %vm1672_vm9, %v3343_v16, %v4749_v28  ;;  %v3376_v37 = vsel %vm1672_vm9, %v3344_v0, %v4750_v45 }
 0x2ff   : > { %5117 = vrot.lane.b32.xlu1 %v8025_v27, %s5326_s30  ;;  %v3407_v43 = vsel %vm1705_vm10, %v3375_v15, %v4789_v63  ;;  %v3408_v3 = vsel %vm1705_vm10, %v3376_v37, %v4790_v11  ;;  %v3186_v27 = vsel %vm238_vm0, %v7672_v42, %v4755_v9  ;;  %v3217_v45 = vsel %vm1507_vm4, %v3185_v48, %v4794_v24  ;;  %v9390_v48 = vld [vmem:[#allocation67_spill] sm:$0xff] }
 0x300   : > { %v8307_v52 = vsel %vm1507_vm4, %v3191_v6, %v4849_v34  ;;  %v8310_v41 = vsel %vm1507_vm4, %v3192_v40, %v4850_v17  ;;  %5132 = vrot.lane.b32.xlu0 %v7866_v4, %s5327_s8  ;;  %v3437_v8 = vpack.c.bf16 %v3408_v3, %v3407_v43  ;;  %v3218_v28 = vsel %vm1507_vm4, %v3186_v27, %v4795_v30 }
 0x301   : > { %v8320_v22 = vpop.permute.xlu1 %4832  ;;  %v8322_v14 = vpop.permute.xlu0 %4857  ;;  %v3249_v42 = vsel %vm1540_vm5, %v3217_v45, %v4774_v46  ;;  %v3250_v7 = vsel %vm1540_vm5, %v3218_v28, %v4775_v59  ;;  %v4840_v47 = vunpack.i.h.bf16 %v8282_v31  ;;  %v4839_v63 = vunpack.i.l.bf16 %v8282_v31  ;;  %v9391_v28 = vld [vmem:[#allocation78_spill] sm:$0xff] }
 0x302   : > { %3974 = vmatprep.mubr.msk.bf16.mxu1 %vm1775_vm11, %v3437_v8  ;;  %v3282_v50 = vsel %vm1573_vm6, %v3250_v7, %v4745_v2  ;;  %v4740_v57 = vunpack.i.h.bf16 %v8111_v5  ;;  %v4739_v30 = vunpack.i.l.bf16 %v8111_v5  ;;  %v4770_v17 = vunpack.i.h.bf16 %v8190_v21 }
 0x303   : > { %5127 = vrot.lane.b32.xlu1 %v7856_v35, %s5327_s8  ;;  %v3281_v35 = vsel %vm1573_vm6, %v3249_v42, %v4744_v20  ;;  %v4769_v34 = vunpack.i.l.bf16 %v8190_v21  ;;  %v4834_v59 = vunpack.i.l.bf16 %v8320_v22 }
 0x304   : > { %5142 = vrot.lane.b32.xlu0 %v7877_v23, %s5328_s13  ;;  %v3313_v58 = vsel %vm1606_vm7, %v3281_v35, %v4779_v12  ;;  %v3188_v27 = vsel %vm238_vm0, %v7691_v44, %v4740_v57  ;;  %v3187_v8 = vsel %vm238_vm0, %v9390_v48, %v4739_v30 }
 0x305   : > { %v8335_v60 = vpop.permute.xlu1 %4842  ;;  %v4878_v29 = vpop.permute.xlu0 %4877  ;;  %v3220_v45 = vsel %vm1507_vm4, %v3188_v27, %v4770_v17 }
 0x306   : > { %v4880_v5 = vunpack.i.h.bf16 %v4878_v29  ;;  %v4879_v37 = vunpack.i.l.bf16 %v4878_v29  ;;  %v4845_v46 = vunpack.i.h.bf16 %v8335_v60  ;;  %v4844_v44 = vunpack.i.l.bf16 %v8335_v60  ;;  %v9392_v60 = vld [vmem:[#allocation68_spill] sm:$0xff] }
 0x307   : > { %5137 = vrot.lane.b32.xlu1 %v7858_v32, %s5328_s13  ;;  %v3314_v32 = vsel %vm1606_vm7, %v3282_v50, %v4780_v38  ;;  %v4830_v50 = vunpack.i.h.bf16 %v8296_v25 }
 0x308   : > { %5152 = vrot.lane.b32.xlu0 %v7862_v62, %s5324_s28  ;;  %v3252_v7 = vsel %vm1540_vm5, %v3220_v45, %v4880_v5 }
 0x309   : > { %v8347_v26 = vpop.permute.xlu1 %4852  ;;  %v4883_v9 = vpop.permute.xlu0 %4882 }
 0x30a   : > { %v4885_v10 = vunpack.i.h.bf16 %v4883_v9  ;;  %v4884_v39 = vunpack.i.l.bf16 %v4883_v9 }
 0x30b   : > { %5147 = vrot.lane.b32.xlu1 %v7866_v4, %s5324_s28 }
 0x30c   : > { %v3345_v53 = vsel %vm1639_vm8, %v3313_v58, %v4884_v39  ;;  %v3346_v11 = vsel %vm1639_vm8, %v3314_v32, %v4885_v10  ;;  %5162 = vrot.lane.b32.xlu0 %v7868_v13, %s5325_s29  ;;  %v9393_v10 = vld [vmem:[#allocation70_spill] sm:$0xff]  ;;  %v3284_v32 = vsel %vm1573_vm6, %v3252_v7, %v4845_v46 }
 0x30d   : > { %v8359_v16 = vpop.permute.xlu1 %4862  ;;  %v4888_v0 = vpop.permute.xlu0 %4887  ;;  %v3377_v40 = vsel %vm1672_vm9, %v3345_v53, %v4839_v63  ;;  %v3378_v6 = vsel %vm1672_vm9, %v3346_v11, %v4840_v47  ;;  %v3189_v39 = vsel %vm238_vm0, %v9393_v10, %v4834_v59  ;;  %v4854_v53 = vunpack.i.l.bf16 %v8347_v26 }
 0x30e   : > { %v4890_v24 = vunpack.i.h.bf16 %v4888_v0  ;;  %v4889_v4 = vunpack.i.l.bf16 %v4888_v0  ;;  %v4864_v17 = vunpack.i.l.bf16 %v8359_v16 }
 0x30f   : > { %5157 = vrot.lane.b32.xlu1 %v7877_v23, %s5325_s29  ;;  %v3219_v23 = vsel %vm1507_vm4, %v3187_v8, %v4769_v34  ;;  %v9394_v34 = vld [vmem:[#allocation73_spill] sm:$0xff]  ;;  %v4825_v8 = vunpack.i.h.bf16 %v8268_v61 }
 0x310   : > { %v3409_v31 = vsel %vm1705_vm10, %v3377_v40, %v4889_v4  ;;  %v3410_v15 = vsel %vm1705_vm10, %v3378_v6, %v4890_v24  ;;  %5172 = vrot.lane.b32.xlu0 %v8147_v49, %s5326_s30  ;;  %v4835_v49 = vunpack.i.h.bf16 %v8320_v22  ;;  %v3251_v42 = vsel %vm1540_vm5, %v3219_v23, %v4879_v37  ;;  %v9395_v6 = vld [vmem:[#allocation75_spill] sm:$0xff] }
 0x311   : > { %v3438_v43 = vpack.c.bf16 %v3410_v15, %v3409_v31  ;;  %v8373_v3 = vpop.permute.xlu1 %4867  ;;  %v4898_v21 = vpop.permute.xlu0 %4897  ;;  %v4829_v22 = vunpack.i.l.bf16 %v8296_v25  ;;  %v3283_v58 = vsel %vm1573_vm6, %v3251_v42, %v4844_v44  ;;  %v4855_v25 = vunpack.i.h.bf16 %v8347_v26 }
 0x312   : > { %v4900_v38 = vunpack.i.h.bf16 %v4898_v21  ;;  %v4899_v12 = vunpack.i.l.bf16 %v4898_v21  ;;  %v3190_v9 = vsel %vm238_vm0, %v9392_v60, %v4835_v49  ;;  %v4865_v4 = vunpack.i.h.bf16 %v8359_v16 }
 0x313   : > { %5167 = vrot.lane.b32.xlu1 %v9391_v28, %s5326_s30  ;;  %3975 = vmatmul.mubr.msk.bf16.gmra.mxu1 %vm1775_vm11, %v3438_v43  ;;  %v4824_v23 = vunpack.i.l.bf16 %v8268_v61  ;;  %v4870_v49 = vunpack.i.h.bf16 %v8373_v3  ;;  %v4869_v59 = vunpack.i.l.bf16 %v8373_v3  ;;  %v9396_v61 = vld [vmem:[#allocation69_spill] sm:$0xff] }
 0x314   : > { %5182 = vrot.lane.b32.xlu0 %v7883_v51, %s5327_s8  ;;  %v3196_v40 = vsel %vm238_vm0, %v9394_v34, %v4900_v38  ;;  %v3195_v26 = vsel %vm238_vm0, %v9395_v6, %v4899_v12 }
 0x315   : > { %v4873_v29 = vpop.permute.xlu1 %4872  ;;  %v8392_v2 = vpop.permute.xlu0 %4907 }
 0x316   : > { %v4875_v20 = vunpack.i.h.bf16 %v4873_v29  ;;  %v4874_v35 = vunpack.i.l.bf16 %v4873_v29 }
 0x317   : > { %5177 = vrot.lane.b32.xlu1 %v7862_v62, %s5327_s8 }
 0x318   : > { %5192 = vrot.lane.b32.xlu0 %v7891_v1, %s5328_s13  ;;  %v3221_v11 = vsel %vm1507_vm4, %v3189_v39, %v4874_v35  ;;  %v3222_v62 = vsel %vm1507_vm4, %v3190_v9, %v4875_v20  ;;  %v4860_v20 = vunpack.i.h.bf16 %v8322_v14 }
 0x319   : > { %v4893_v47 = vpop.permute.xlu1 %4892  ;;  %v4918_v63 = vpop.permute.xlu0 %4917  ;;  %v3253_v16 = vsel %vm1540_vm5, %v3221_v11, %v4854_v53  ;;  %v3254_v43 = vsel %vm1540_vm5, %v3222_v62, %v4855_v25  ;;  %v4910_v53 = vunpack.i.h.bf16 %v8392_v2  ;;  %v4909_v11 = vunpack.i.l.bf16 %v8392_v2  ;;  %v2117_v2 = vld [vmem:[#allocation2 + $0x200] sm:$0xff] }
 0x31a   : > { %v4895_v0 = vunpack.i.h.bf16 %v4893_v47  ;;  %v4894_v57 = vunpack.i.l.bf16 %v4893_v47  ;;  %v4920_v30 = vunpack.i.h.bf16 %v4918_v63  ;;  %v4919_v24 = vunpack.i.l.bf16 %v4918_v63 }
 0x31b   : > { %5187 = vrot.lane.b32.xlu1 %v7868_v13, %s5328_s13  ;;  %v3285_v29 = vsel %vm1573_vm6, %v3253_v16, %v4824_v23  ;;  %v3286_v3 = vsel %vm1573_vm6, %v3254_v43, %v4825_v8 }
 0x31c   : > { %v3315_v31 = vsel %vm1606_vm7, %v3283_v58, %v4894_v57  ;;  %v3316_v15 = vsel %vm1606_vm7, %v3284_v32, %v4895_v0  ;;  %v8421_v5 = vsel %vm1507_vm4, %v3195_v26, %v4919_v24  ;;  %v8424_v37 = vsel %vm1507_vm4, %v3196_v40, %v4920_v30  ;;  %5202 = vrot.lane.b32.xlu0 %v7887_v36, %s5324_s28  ;;  %v2119_v0 = vld [vmem:[#allocation2 + $0x210] sm:$0xff]  ;;  %v2120_v26 = vld [vmem:[#allocation2 + $0x218] sm:$0xff] }
 0x31d   : > { %v3347_v21 = vsel %vm1639_vm8, %v3315_v31, %v4864_v17  ;;  %v3348_v13 = vsel %vm1639_vm8, %v3316_v15, %v4865_v4  ;;  %v8432_v27 = vpop.permute.xlu1 %4902  ;;  %v4933_v48 = vpop.permute.xlu0 %4932  ;;  %v3318_v10 = vsel %vm1606_vm7, %v3286_v3, %v4860_v20  ;;  %v2118_v4 = vld [vmem:[#allocation2 + $0x208] sm:$0xff]  ;;  %v2177_v6 = vrot.slane %v2119_v0, 7 }
 0x31e   : > { %v4935_v45 = vunpack.i.h.bf16 %v4933_v48  ;;  %v4934_v28 = vunpack.i.l.bf16 %v4933_v48  ;;  %v3379_v46 = vsel %vm1672_vm9, %v3347_v21, %v4829_v22  ;;  %v3380_v44 = vsel %vm1672_vm9, %v3348_v13, %v4830_v50 }
 0x31f   : > { %5197 = vrot.lane.b32.xlu1 %v7883_v51, %s5324_s28  ;;  %v4859_v51 = vunpack.i.l.bf16 %v8322_v14  ;;  %v3411_v50 = vsel %vm1705_vm10, %v3379_v46, %v4869_v59  ;;  %v2159_v16 = vrot.slane %v2118_v4, 7  ;;  %v2249_v48 = vrot.slane %v2119_v0, 1  ;;  %v9398_v46 = vld [vmem:[#allocation76_spill] sm:$0xff] }
 0x320   : > { %v3255_v42 = vsel %vm1540_vm5, %v8307_v52, %v4934_v28  ;;  %v3256_v7 = vsel %vm1540_vm5, %v8310_v41, %v4935_v45  ;;  %5212 = vrot.lane.b32.xlu0 %v9396_v61, %s5325_s29  ;;  %v3412_v52 = vsel %vm1705_vm10, %v3380_v44, %v4870_v49  ;;  %v2267_v8 = vrot.slane %v2120_v26, 1  ;;  %v8490_v28 = vld [vmem:[#allocation2 + $0x228] sm:$0xff]  ;;  %v8492_v49 = vld [vmem:[#allocation2 + $0x230] sm:$0xff] }
 0x321   : > { %v4913_v35 = vpop.permute.xlu1 %4912  ;;  %v4938_v22 = vpop.permute.xlu0 %4937  ;;  %v3317_v9 = vsel %vm1606_vm7, %v3285_v29, %v4859_v51  ;;  %v3439_v39 = vpack.c.bf16 %v3412_v52, %v3411_v50  ;;  %v2195_v13 = vsel %vm473_vm1, %v2159_v16, %v2177_v6  ;;  %v2121_v50 = vld [vmem:[#allocation2 + $0x220] sm:$0xff]  ;;  %v2160_v52 = vrot.slane %v8490_v28, 7 }
 0x322   : > { %v4915_v38 = vunpack.i.h.bf16 %v4913_v35  ;;  %v4914_v12 = vunpack.i.l.bf16 %v4913_v35  ;;  %v4940_v41 = vunpack.i.h.bf16 %v4938_v22  ;;  %v4939_v60 = vunpack.i.l.bf16 %v4938_v22 }
 0x323   : > { %5207 = vrot.lane.b32.xlu1 %v7891_v1, %s5325_s29  ;;  %3978 = vmatprep.mubr.msk.bf16.mxu1 %vm1775_vm11, %v3439_v39  ;;  %v2285_v22 = vsel %vm564_vm2, %v2249_v48, %v2267_v8  ;;  %v2142_v39 = vrot.slane %v2121_v50, 7  ;;  %v2232_v6 = vrot.slane %v8490_v28, 1  ;;  %v5286_v50 = vpack.i.bf16 %v8492_v49, %v8490_v28 }
 0x324   : > { %v8459_v14 = vsel %vm1573_vm6, %v3255_v42, %v4914_v12  ;;  %v8462_v58 = vsel %vm1573_vm6, %v3256_v7, %v4915_v38  ;;  %v3349_v32 = vsel %vm1639_vm8, %v3317_v9, %v4939_v60  ;;  %v3350_v25 = vsel %vm1639_vm8, %v3318_v10, %v4940_v41  ;;  %5222 = vrot.lane.b32.xlu0 %v8172_v55, %s5326_s30 }
 0x325   : > { %v8471_v1 = vpop.permute.xlu1 %4922  ;;  %v4943_v62 = vpop.permute.xlu0 %4942  ;;  %v3381_v57 = vsel %vm1672_vm9, %v3349_v32, %v4909_v11  ;;  %v3382_v30 = vsel %vm1672_vm9, %v3350_v25, %v4910_v53  ;;  %v2231_v7 = vrot.slane %v2118_v4, 1  ;;  %v2178_v38 = vrot.slane %v8492_v49, 7 }
 0x326   : > { %v4945_v47 = vunpack.i.h.bf16 %v4943_v62  ;;  %v4944_v63 = vunpack.i.l.bf16 %v4943_v62  ;;  %v5256_v53 = vpack.i.bf16 %v2119_v0, %v2118_v4 }
 0x327   : > { %5217 = vrot.lane.b32.xlu1 %v8143_v18, %s5326_s30  ;;  %v2141_v18 = vrot.slane %v2117_v2, 7  ;;  %v2196_v62 = vsel %vm473_vm1, %v2160_v52, %v2178_v38 }
 0x328   : > { %v3413_v55 = vsel %vm1705_vm10, %v3381_v57, %v4944_v63  ;;  %v3414_v24 = vsel %vm1705_vm10, %v3382_v30, %v4945_v47  ;;  %5232 = vrot.lane.b32.xlu0 %v7900_v19, %s5327_s8  ;;  %v9399_v47 = vld [vmem:[#allocation74_spill] sm:$0xff] }
 0x329   : > { %v3440_v17 = vpack.c.bf16 %v3414_v24, %v3413_v55  ;;  %v8481_v34 = vpop.permute.xlu1 %4927  ;;  %v4948_v40 = vpop.permute.xlu0 %4947  ;;  %v2213_v42 = vsel %vm473_vm1, %v2141_v18, %v2159_v16  ;;  %v2124_v55 = vld [vmem:[#allocation2 + $0x238] sm:$0xff] }
 0x32a   : > { %v4950_v31 = vunpack.i.h.bf16 %v4948_v40  ;;  %v4949_v15 = vunpack.i.l.bf16 %v4948_v40  ;;  %v5246_v20 = vpack.i.bf16 %v2195_v13, %v2213_v42  ;;  %v2214_v40 = vsel %vm473_vm1, %v2142_v39, %v2160_v52  ;;  %v9404_v39 = vld [vmem:[#allocation46_spill] sm:$0xff] }
 0x32b   : > { %5227 = vrot.lane.b32.xlu1 %v7887_v36, %s5327_s8  ;;  %3979 = vmatmul.mubr.msk.bf16.gmra.mxu1 %vm1775_vm11, %v3440_v17  ;;  %v9397_v36 = vld [vmem:[#allocation43_spill] sm:$0xff]  ;;  %v2268_v18 = vrot.slane %v2124_v55, 1 }
 0x32c   : > { %5242 = vrot.lane.b32.xlu0 %v7906_v33, %s5328_s13  ;;  %v3200_v59 = vsel %vm238_vm0, %v9397_v36, %v4950_v31  ;;  %v3199_v44 = vsel %vm238_vm0, %v9398_v46, %v4949_v15  ;;  %v2250_v15 = vrot.slane %v8492_v49, 1  ;;  %v5276_v36 = vpack.i.bf16 %v2196_v62, %v2214_v40 }
 0x32d   : > { %v4953_v43 = vpop.permute.xlu1 %4952  ;;  %v4958_v21 = vpop.permute.xlu0 %4957 }
 0x32e   : > { %v4960_v23 = vunpack.i.h.bf16 %v4958_v21  ;;  %v4959_v45 = vunpack.i.l.bf16 %v4958_v21  ;;  %v4955_v12 = vunpack.i.h.bf16 %v4953_v43  ;;  %v4954_v41 = vunpack.i.l.bf16 %v4953_v43 }
 0x32f   : > { %5237 = vrot.lane.b32.xlu1 %v9396_v61, %s5328_s13  ;;  %v2303_v61 = vsel %vm564_vm2, %v2231_v7, %v2249_v48  ;;  %v9401_v48 = vld [vmem:[#allocation77_spill] sm:$0xff]  ;;  %v2286_v7 = vsel %vm564_vm2, %v2250_v15, %v2268_v18 }
 0x330   : > { %v8503_v29 = vsel %vm1507_vm4, %v3199_v44, %v4959_v45  ;;  %v8506_v3 = vsel %vm1507_vm4, %v3200_v59, %v4960_v23  ;;  %5252 = vrot.lane.b32.xlu0 %v7900_v19, %s5324_s28  ;;  %v5266_v11 = vpack.i.bf16 %v2285_v22, %v2303_v61  ;;  %v3198_v63 = vsel %vm238_vm0, %v9399_v47, %v4955_v12  ;;  %v9402_v23 = vld [vmem:[#allocation49_spill] sm:$0xff] }
 0x331   : > { %v4963_v51 = vpop.permute.xlu1 %4962  ;;  %v4973_v35 = vpop.permute.xlu0 %4972 }
 0x332   : > { %v4975_v60 = vunpack.i.h.bf16 %v4973_v35  ;;  %v4974_v9 = vunpack.i.l.bf16 %v4973_v35  ;;  %v4965_v24 = vunpack.i.h.bf16 %v4963_v51  ;;  %v4964_v2 = vunpack.i.l.bf16 %v4963_v51 }
 0x333   : > { %5247 = vrot.lane.b32.xlu1 %v5246_v20, %s5323_s27 }
 0x334   : > { %v8519_v19 = vsel %vm1540_vm5, %v8421_v5, %v4974_v9  ;;  %v8523_v10 = vsel %vm1540_vm5, %v8424_v37, %v4975_v60  ;;  %5262 = vrot.lane.b32.xlu0 %v7906_v33, %s5325_s29  ;;  %v9400_v5 = vld [vmem:[#allocation44_spill] sm:$0xff]  ;;  %v9403_v60 = vld [vmem:[#allocation45_spill] sm:$0xff] }
 0x335   : > { %v4968_v32 = vpop.permute.xlu1 %4967  ;;  %v4978_v25 = vpop.permute.xlu0 %4977  ;;  %v3197_v57 = vsel %vm238_vm0, %v9400_v5, %v4954_v41 }
 0x336   : > { %v4970_v30 = vunpack.i.h.bf16 %v4968_v32  ;;  %v4969_v37 = vunpack.i.l.bf16 %v4968_v32  ;;  %v4980_v33 = vunpack.i.h.bf16 %v4978_v25  ;;  %v4979_v17 = vunpack.i.l.bf16 %v4978_v25 }
 0x337   : > { %5257 = vrot.lane.b32.xlu1 %v5256_v53, %s5324_s28 }
 0x338   : > { %v3229_v0 = vsel %vm1507_vm4, %v3197_v57, %v4969_v37  ;;  %v3230_v4 = vsel %vm1507_vm4, %v3198_v63, %v4970_v30  ;;  %5272 = vrot.lane.b32.xlu0 %v5246_v20, %s5326_s30  ;;  %v3204_v8 = vsel %vm238_vm0, %v9401_v48, %v4980_v33  ;;  %v3203_v45 = vsel %vm238_vm0, %v9402_v23, %v4979_v17 }
 0x339   : > { %v4983_v26 = vpop.permute.xlu1 %4982  ;;  %v4988_v31 = vpop.permute.xlu0 %4987  ;;  %v8542_v16 = vsel %vm1540_vm5, %v3229_v0, %v4964_v2  ;;  %v8545_v43 = vsel %vm1540_vm5, %v3230_v4, %v4965_v24  ;;  %v2304_v20 = vsel %vm564_vm2, %v2232_v6, %v2250_v15  ;;  %v9405_v24 = vld [vmem:[#allocation50_spill] sm:$0xff] }
 0x33a   : > { %v4990_v21 = vunpack.i.h.bf16 %v4988_v31  ;;  %v4989_v13 = vunpack.i.l.bf16 %v4988_v31  ;;  %v4985_v51 = vunpack.i.h.bf16 %v4983_v26  ;;  %v4984_v35 = vunpack.i.l.bf16 %v4983_v26 }
 0x33b   : > { %5267 = vrot.lane.b32.xlu1 %v5266_v11, %s5325_s29  ;;  %v5296_v41 = vpack.i.bf16 %v2286_v7, %v2304_v20  ;;  %s8769_s29 = scalar_lea.vmem %s8915_s5, %s3886_s21 }
 0x33c   : > { %v3235_v59 = vsel %vm1507_vm4, %v3203_v45, %v4989_v13  ;;  %v3236_v46 = vsel %vm1507_vm4, %v3204_v8, %v4990_v21  ;;  %5282 = vrot.lane.b32.xlu0 %v5256_v53, %s5327_s8  ;;  %v3202_v9 = vsel %vm238_vm0, %v9403_v60, %v4985_v51  ;;  %v3201_v32 = vsel %vm238_vm0, %v9404_v39, %v4984_v35  ;;  %v9406_v8 = vld [vmem:[#allocation79_spill] sm:$0xff] }
 0x33d   : > { %v4993_v44 = vpop.permute.xlu1 %4992  ;;  %v5003_v42 = vpop.permute.xlu0 %5002  ;;  %v9407_v45 = vld [vmem:[#allocation51_spill] sm:$0xff]  ;;  %v4905_v60 = vunpack.i.h.bf16 %v8432_v27 }
 0x33e   : > { %v5005_v22 = vunpack.i.h.bf16 %v5003_v42  ;;  %v5004_v61 = vunpack.i.l.bf16 %v5003_v42  ;;  %v4995_v25 = vunpack.i.h.bf16 %v4993_v44 }
 0x33f   : > { %5277 = vrot.lane.b32.xlu1 %v5276_v36, %s5326_s30 }
 0x340   : > { %v8564_v52 = vsel %vm1540_vm5, %v8503_v29, %v5004_v61  ;;  %v8568_v38 = vsel %vm1540_vm5, %v8506_v3, %v5005_v22  ;;  %5292 = vrot.lane.b32.xlu0 %v5266_v11, %s5328_s13  ;;  %v4994_v29 = vunpack.i.l.bf16 %v4993_v44 }
 0x341   : > { %v4998_v54 = vpop.permute.xlu1 %4997  ;;  %v5008_v12 = vpop.permute.xlu0 %5007 }
 0x342   : > { %v5000_v28 = vunpack.i.h.bf16 %v4998_v54  ;;  %v4999_v49 = vunpack.i.l.bf16 %v4998_v54  ;;  %v5010_v53 = vunpack.i.h.bf16 %v5008_v12  ;;  %v5009_v62 = vunpack.i.l.bf16 %v5008_v12 }
 0x343   : > { %5287 = vrot.lane.b32.xlu1 %v5286_v50, %s5327_s8 }
 0x344   : > { %v3233_v3 = vsel %vm1507_vm4, %v3201_v32, %v4999_v49  ;;  %v3234_v11 = vsel %vm1507_vm4, %v3202_v9, %v5000_v28  ;;  %v3208_v55 = vsel %vm238_vm0, %v8117_v56, %v5010_v53  ;;  %v3207_v2 = vsel %vm238_vm0, %v9405_v24, %v5009_v62 }
 0x345   : > { %v5013_v47 = vpop.permute.xlu1 %5012  ;;  %v5018_v63 = vpop.permute.xlu0 %5017  ;;  %v8579_v5 = vsel %vm1540_vm5, %v3233_v3, %v4994_v29  ;;  %v8582_v57 = vsel %vm1540_vm5, %v3234_v11, %v4995_v25  ;;  %v4904_v9 = vunpack.i.l.bf16 %v8432_v27  ;;  %v4930_v28 = vunpack.i.h.bf16 %v8481_v34  ;;  %v9408_v3 = vld [vmem:[#allocation71_spill] sm:$0xff]  ;;  %v9411_v27 = vld [vmem:[#allocation80_spill] sm:$0xff] }
 0x346   : > { %v5020_v30 = vunpack.i.h.bf16 %v5018_v63  ;;  %v5019_v37 = vunpack.i.l.bf16 %v5018_v63  ;;  %v5015_v26 = vunpack.i.h.bf16 %v5013_v47  ;;  %v5014_v31 = vunpack.i.l.bf16 %v5013_v47  ;;  %v9409_v47 = vld [vmem:[#allocation72_spill] sm:$0xff] }
 0x347   : > { %5297 = vrot.lane.b32.xlu1 %v5296_v41, %s5328_s13  ;;  %v4929_v49 = vunpack.i.l.bf16 %v8481_v34  ;;  %v3194_v11 = vsel %vm238_vm0, %v9408_v3, %v4905_v60  ;;  %v3193_v63 = vsel %vm238_vm0, %v9409_v47, %v4904_v9 }
 0x348   : > { %v3239_v33 = vsel %vm1507_vm4, %v3207_v2, %v5019_v37  ;;  %v3240_v17 = vsel %vm1507_vm4, %v3208_v55, %v5020_v30  ;;  %v3206_v23 = vsel %vm238_vm0, %v9406_v8, %v5015_v26  ;;  %v3205_v36 = vsel %vm238_vm0, %v9407_v45, %v5014_v31  ;;  %v9410_v30 = vld [vmem:[#allocation52_spill] sm:$0xff] }
 0x349   : > { %v5023_v0 = vpop.permute.xlu1 %5022  ;;  %v5033_v4 = vpop.permute.xlu0 %5032  ;;  %v3225_v24 = vsel %vm1507_vm4, %v3193_v63, %v4929_v49  ;;  %v3226_v34 = vsel %vm1507_vm4, %v3194_v11, %v4930_v28 }
 0x34a   : > { %v5035_v40 = vunpack.i.h.bf16 %v5033_v4  ;;  %v5034_v6 = vunpack.i.l.bf16 %v5033_v4  ;;  %v5025_v44 = vunpack.i.h.bf16 %v5023_v0  ;;  %v5024_v42 = vunpack.i.l.bf16 %v5023_v0 }
 0x34b   : > { %v4924_v0 = vunpack.i.l.bf16 %v8471_v1 }
 0x34c   : > { %v8592_v15 = vsel %vm1540_vm5, %v3235_v59, %v5034_v6  ;;  %v8595_v56 = vsel %vm1540_vm5, %v3236_v46, %v5035_v40 }
 0x34d   : > { %v5028_v18 = vpop.permute.xlu1 %5027  ;;  %v5038_v21 = vpop.permute.xlu0 %5037  ;;  %v3257_v31 = vsel %vm1540_vm5, %v3225_v24, %v4924_v0 }
 0x34e   : > { %v5030_v13 = vunpack.i.h.bf16 %v5028_v18  ;;  %v5029_v48 = vunpack.i.l.bf16 %v5028_v18  ;;  %v5040_v40 = vunpack.i.h.bf16 %v5038_v21  ;;  %v5039_v6 = vunpack.i.l.bf16 %v5038_v21 }
 0x350   : > { %v3237_v7 = vsel %vm1507_vm4, %v3205_v36, %v5029_v48  ;;  %v3238_v59 = vsel %vm1507_vm4, %v3206_v23, %v5030_v13 }
 0x351   : > { %v5043_v20 = vpop.permute.xlu1 %5042  ;;  %v5058_v51 = vpop.permute.xlu0 %5057  ;;  %v8604_v46 = vsel %vm1540_vm5, %v3237_v7, %v5024_v42  ;;  %v8607_v35 = vsel %vm1540_vm5, %v3238_v59, %v5025_v44 }
 0x352   : > { %v5060_v22 = vunpack.i.h.bf16 %v5058_v51  ;;  %v5059_v61 = vunpack.i.l.bf16 %v5058_v51  ;;  %v5045_v13 = vunpack.i.h.bf16 %v5043_v20  ;;  %v5044_v48 = vunpack.i.l.bf16 %v5043_v20 }
 0x354   : > { %v8610_v50 = vsel %vm1540_vm5, %v3239_v33, %v5059_v61  ;;  %v8613_v54 = vsel %vm1540_vm5, %v3240_v17, %v5060_v22  ;;  %v4925_v17 = vunpack.i.h.bf16 %v8471_v1  ;;  %v3289_v1 = vsel %vm1573_vm6, %v3257_v31, %v5039_v6 }
 0x355   : > { %v5048_v12 = vpop.permute.xlu1 %5047  ;;  %v5063_v41 = vpop.permute.xlu0 %5062  ;;  %v3319_v20 = vsel %vm1606_vm7, %v8459_v14, %v5044_v48 }
 0x356   : > { %v5050_v39 = vunpack.i.h.bf16 %v5048_v12  ;;  %v5049_v32 = vunpack.i.l.bf16 %v5048_v12  ;;  %v3258_v18 = vsel %vm1540_vm5, %v3226_v34, %v4925_v17  ;;  %v5065_v8 = vunpack.i.h.bf16 %v5063_v41 }
 0x357   : > { %v5064_v23 = vunpack.i.l.bf16 %v5063_v41  ;;  %v3290_v59 = vsel %vm1573_vm6, %v3258_v18, %v5040_v40  ;;  %v3320_v41 = vsel %vm1606_vm7, %v8462_v58, %v5045_v13 }
 0x358   : > { %v3210_v37 = vsel %vm238_vm0, %v9410_v30, %v5050_v39  ;;  %v3209_v55 = vsel %vm238_vm0, %v9411_v27, %v5049_v32  ;;  %v3322_v32 = vsel %vm1606_vm7, %v3290_v59, %v5065_v8 }
 0x359   : > { %v5053_v25 = vpop.permute.xlu1 %5052  ;;  %v5073_v62 = vpop.permute.xlu0 %5072  ;;  %v3321_v39 = vsel %vm1606_vm7, %v3289_v1, %v5064_v23 }
 0x35a   : > { %v5055_v29 = vunpack.i.h.bf16 %v5053_v25  ;;  %v5054_v53 = vunpack.i.l.bf16 %v5053_v25  ;;  %v5075_v45 = vunpack.i.h.bf16 %v5073_v62  ;;  %v5074_v36 = vunpack.i.l.bf16 %v5073_v62 }
 0x35c   : > { %v8630_v2 = vsel %vm1507_vm4, %v3209_v55, %v5054_v53  ;;  %v8633_v33 = vsel %vm1507_vm4, %v3210_v37, %v5055_v29  ;;  %v3353_v28 = vsel %vm1639_vm8, %v3321_v39, %v5074_v36  ;;  %v3354_v49 = vsel %vm1639_vm8, %v3322_v32, %v5075_v45 }
 0x35d   : > { %v5068_v4 = vpop.permute.xlu1 %5067  ;;  %v5083_v26 = vpop.permute.xlu0 %5082 }
 0x35e   : > { %v5070_v44 = vunpack.i.h.bf16 %v5068_v4  ;;  %v5069_v42 = vunpack.i.l.bf16 %v5068_v4  ;;  %v5085_v51 = vunpack.i.h.bf16 %v5083_v26  ;;  %v5084_v21 = vunpack.i.l.bf16 %v5083_v26 }
 0x360   : > { %v3351_v25 = vsel %vm1639_vm8, %v3319_v20, %v5069_v42  ;;  %v3352_v29 = vsel %vm1639_vm8, %v3320_v41, %v5070_v44  ;;  %v3385_v62 = vsel %vm1672_vm9, %v3353_v28, %v5084_v21  ;;  %v3386_v14 = vsel %vm1672_vm9, %v3354_v49, %v5085_v51 }
 0x361   : > { %v5078_v7 = vpop.permute.xlu1 %5077  ;;  %v5093_v22 = vpop.permute.xlu0 %5092 }
 0x362   : > { %v5080_v61 = vunpack.i.h.bf16 %v5078_v7  ;;  %v5079_v12 = vunpack.i.l.bf16 %v5078_v7  ;;  %v5095_v60 = vunpack.i.h.bf16 %v5093_v22  ;;  %v5094_v9 = vunpack.i.l.bf16 %v5093_v22 }
 0x364   : > { %v3383_v47 = vsel %vm1672_vm9, %v3351_v25, %v5079_v12  ;;  %v3384_v63 = vsel %vm1672_vm9, %v3352_v29, %v5080_v61  ;;  %v3417_v30 = vsel %vm1705_vm10, %v3385_v62, %v5094_v9  ;;  %v3418_v37 = vsel %vm1705_vm10, %v3386_v14, %v5095_v60 }
 0x365   : > { %v5088_v53 = vpop.permute.xlu1 %5087  ;;  %v3442_v17 = vpack.c.bf16 %v3418_v37, %v3417_v30 }
 0x366   : > { %v5090_v3 = vunpack.i.h.bf16 %v5088_v53  ;;  %v5089_v11 = vunpack.i.l.bf16 %v5088_v53  ;;  %v5103_v58 = vpop.permute.xlu0 %5102 }
 0x367   : > { %v5105_v6 = vunpack.i.h.bf16 %v5103_v58  ;;  %v5104_v26 = vunpack.i.l.bf16 %v5103_v58 }
 0x368   : > { %v3415_v27 = vsel %vm1705_vm10, %v3383_v47, %v5089_v11  ;;  %v3416_v55 = vsel %vm1705_vm10, %v3384_v63, %v5090_v3 }
 0x369   : > { %v3441_v24 = vpack.c.bf16 %v3416_v55, %v3415_v27  ;;  %v5098_v34 = vpop.permute.xlu1 %5097  ;;  %v3294_v36 = vsel %vm1573_vm6, %v8545_v43, %v5105_v6  ;;  %v3293_v44 = vsel %vm1573_vm6, %v8542_v16, %v5104_v26 }
 0x36a   : > { %v5113_v0 = vpop.permute.xlu0 %5112  ;;  %v5099_v48 = vunpack.i.l.bf16 %v5098_v34  ;;  %v5100_v42 = vunpack.i.h.bf16 %v5098_v34 }
 0x36b   : > { %3982 = vmatprep.mubr.msk.bf16.mxu1 %vm1775_vm11, %v3441_v24  ;;  %v5115_v31 = vunpack.i.h.bf16 %v5113_v0  ;;  %v5114_v18 = vunpack.i.l.bf16 %v5113_v0 }
 0x36c   : > { %3983 = vmatmul.mubr.msk.bf16.gmra.mxu1 %vm1775_vm11, %v3442_v17  ;;  %v3291_v60 = vsel %vm1573_vm6, %v8519_v19, %v5099_v48  ;;  %v3292_v49 = vsel %vm1573_vm6, %v8523_v10, %v5100_v42 }
 0x36d   : > { %v5108_v4 = vpop.permute.xlu1 %5107  ;;  %v3325_v51 = vsel %vm1606_vm7, %v3293_v44, %v5114_v18  ;;  %v3326_v21 = vsel %vm1606_vm7, %v3294_v36, %v5115_v31 }
 0x36e   : > { %v5123_v40 = vpop.permute.xlu0 %5122  ;;  %v5109_v7 = vunpack.i.l.bf16 %v5108_v4  ;;  %v5110_v22 = vunpack.i.h.bf16 %v5108_v4 }
 0x36f   : > { %v5125_v8 = vunpack.i.h.bf16 %v5123_v40  ;;  %v5124_v23 = vunpack.i.l.bf16 %v5123_v40 }
 0x370   : > { %v3323_v25 = vsel %vm1606_vm7, %v3291_v60, %v5109_v7  ;;  %v3324_v19 = vsel %vm1606_vm7, %v3292_v49, %v5110_v22 }
 0x371   : > { %v5118_v13 = vpop.permute.xlu1 %5117  ;;  %v3357_v9 = vsel %vm1639_vm8, %v3325_v51, %v5124_v23  ;;  %v3358_v43 = vsel %vm1639_vm8, %v3326_v21, %v5125_v8 }
 0x372   : > { %v5133_v45 = vpop.permute.xlu0 %5132  ;;  %v5119_v61 = vunpack.i.l.bf16 %v5118_v13  ;;  %v5120_v20 = vunpack.i.h.bf16 %v5118_v13 }
 0x373   : > { %v5135_v59 = vunpack.i.h.bf16 %v5133_v45  ;;  %v5134_v1 = vunpack.i.l.bf16 %v5133_v45 }
 0x374   : > { %v3355_v62 = vsel %vm1639_vm8, %v3323_v25, %v5119_v61  ;;  %v3356_v58 = vsel %vm1639_vm8, %v3324_v19, %v5120_v20 }
 0x375   : > { %v5128_v12 = vpop.permute.xlu1 %5127  ;;  %v3389_v29 = vsel %vm1672_vm9, %v3357_v9, %v5134_v1  ;;  %v3390_v53 = vsel %vm1672_vm9, %v3358_v43, %v5135_v59 }
 0x376   : > { %v5143_v16 = vpop.permute.xlu0 %5142  ;;  %v5130_v41 = vunpack.i.h.bf16 %v5128_v12  ;;  %v5129_v39 = vunpack.i.l.bf16 %v5128_v12 }
 0x377   : > { %v5145_v32 = vunpack.i.h.bf16 %v5143_v16  ;;  %v5144_v28 = vunpack.i.l.bf16 %v5143_v16 }
 0x378   : > { %v3387_v37 = vsel %vm1672_vm9, %v3355_v62, %v5129_v39  ;;  %v3388_v27 = vsel %vm1672_vm9, %v3356_v58, %v5130_v41 }
 0x379   : > { %v3421_v14 = vsel %vm1705_vm10, %v3389_v29, %v5144_v28  ;;  %v3422_v3 = vsel %vm1705_vm10, %v3390_v53, %v5145_v32  ;;  %v5138_v11 = vpop.permute.xlu1 %5137 }
 0x37a   : > { %v3444_v47 = vpack.c.bf16 %v3422_v3, %v3421_v14  ;;  %v5140_v63 = vunpack.i.h.bf16 %v5138_v11  ;;  %v5139_v10 = vunpack.i.l.bf16 %v5138_v11  ;;  %v5153_v30 = vpop.permute.xlu0 %5152 }
 0x37b   : > { %v5155_v6 = vunpack.i.h.bf16 %v5153_v30  ;;  %v5154_v26 = vunpack.i.l.bf16 %v5153_v30 }
 0x37c   : > { %v3419_v55 = vsel %vm1705_vm10, %v3387_v37, %v5139_v10  ;;  %v3420_v24 = vsel %vm1705_vm10, %v3388_v27, %v5140_v63 }
 0x37d   : > { %v3443_v34 = vpack.c.bf16 %v3420_v24, %v3419_v55  ;;  %v5148_v17 = vpop.permute.xlu1 %5147  ;;  %v3298_v36 = vsel %vm1573_vm6, %v8582_v57, %v5155_v6  ;;  %v3297_v44 = vsel %vm1573_vm6, %v8579_v5, %v5154_v26 }
 0x37e   : > { %v5163_v0 = vpop.permute.xlu0 %5162  ;;  %v5149_v48 = vunpack.i.l.bf16 %v5148_v17  ;;  %v5150_v42 = vunpack.i.h.bf16 %v5148_v17 }
 0x37f   : > { %3986 = vmatprep.mubr.msk.bf16.mxu1 %vm1775_vm11, %v3443_v34  ;;  %v5165_v31 = vunpack.i.h.bf16 %v5163_v0  ;;  %v5164_v18 = vunpack.i.l.bf16 %v5163_v0 }
 0x380   : > { %3987 = vmatmul.mubr.msk.bf16.gmra.mxu1 %vm1775_vm11, %v3444_v47  ;;  %v3295_v60 = vsel %vm1573_vm6, %v8564_v52, %v5149_v48  ;;  %v3296_v32 = vsel %vm1573_vm6, %v8568_v38, %v5150_v42 }
 0x381   : > { %v5158_v4 = vpop.permute.xlu1 %5157  ;;  %v3329_v51 = vsel %vm1606_vm7, %v3297_v44, %v5164_v18  ;;  %v3330_v21 = vsel %vm1606_vm7, %v3298_v36, %v5165_v31 }
 0x382   : > { %v5173_v40 = vpop.permute.xlu0 %5172  ;;  %v5159_v7 = vunpack.i.l.bf16 %v5158_v4  ;;  %v5160_v22 = vunpack.i.h.bf16 %v5158_v4 }
 0x383   : > { %v5175_v8 = vunpack.i.h.bf16 %v5173_v40  ;;  %v5174_v23 = vunpack.i.l.bf16 %v5173_v40 }
 0x384   : > { %v3327_v28 = vsel %vm1606_vm7, %v3295_v60, %v5159_v7  ;;  %v3328_v52 = vsel %vm1606_vm7, %v3296_v32, %v5160_v22 }
 0x385   : > { %v5168_v13 = vpop.permute.xlu1 %5167  ;;  %v3361_v9 = vsel %vm1639_vm8, %v3329_v51, %v5174_v23  ;;  %v3362_v57 = vsel %vm1639_vm8, %v3330_v21, %v5175_v8 }
 0x386   : > { %v5183_v45 = vpop.permute.xlu0 %5182  ;;  %v5169_v61 = vunpack.i.l.bf16 %v5168_v13  ;;  %v5170_v43 = vunpack.i.h.bf16 %v5168_v13 }
 0x387   : > { %v5185_v59 = vunpack.i.h.bf16 %v5183_v45  ;;  %v5184_v1 = vunpack.i.l.bf16 %v5183_v45 }
 0x388   : > { %v3359_v29 = vsel %vm1639_vm8, %v3327_v28, %v5169_v61  ;;  %v3360_v14 = vsel %vm1639_vm8, %v3328_v52, %v5170_v43 }
 0x389   : > { %v5178_v12 = vpop.permute.xlu1 %5177  ;;  %v3393_v49 = vsel %vm1672_vm9, %v3361_v9, %v5184_v1  ;;  %v3394_v25 = vsel %vm1672_vm9, %v3362_v57, %v5185_v59 }
 0x38a   : > { %v5193_v5 = vpop.permute.xlu0 %5192  ;;  %v5180_v20 = vunpack.i.h.bf16 %v5178_v12  ;;  %v5179_v16 = vunpack.i.l.bf16 %v5178_v12 }
 0x38b   : > { %v5195_v41 = vunpack.i.h.bf16 %v5193_v5  ;;  %v5194_v39 = vunpack.i.l.bf16 %v5193_v5 }
 0x38c   : > { %v3391_v47 = vsel %vm1672_vm9, %v3359_v29, %v5179_v16  ;;  %v3392_v63 = vsel %vm1672_vm9, %v3360_v14, %v5180_v20 }
 0x38d   : > { %v3425_v53 = vsel %vm1705_vm10, %v3393_v49, %v5194_v39  ;;  %v3426_v19 = vsel %vm1705_vm10, %v3394_v25, %v5195_v41  ;;  %v5188_v62 = vpop.permute.xlu1 %5187 }
 0x38e   : > { %v3446_v3 = vpack.c.bf16 %v3426_v19, %v3425_v53  ;;  %v5190_v11 = vunpack.i.h.bf16 %v5188_v62  ;;  %v5189_v38 = vunpack.i.l.bf16 %v5188_v62  ;;  %v5203_v58 = vpop.permute.xlu0 %5202 }
 0x38f   : > { %v5205_v17 = vunpack.i.h.bf16 %v5203_v58  ;;  %v5204_v0 = vunpack.i.l.bf16 %v5203_v58 }
 0x390   : > { %v3423_v10 = vsel %vm1705_vm10, %v3391_v47, %v5189_v38  ;;  %v3424_v30 = vsel %vm1705_vm10, %v3392_v63, %v5190_v11 }
 0x391   : > { %v3445_v37 = vpack.c.bf16 %v3424_v30, %v3423_v10  ;;  %v5198_v27 = vpop.permute.xlu1 %5197  ;;  %v3302_v48 = vsel %vm1573_vm6, %v8607_v35, %v5205_v17  ;;  %v3301_v8 = vsel %vm1573_vm6, %v8604_v46, %v5204_v0 }
 0x392   : > { %v5213_v55 = vpop.permute.xlu0 %5212  ;;  %v5199_v26 = vunpack.i.l.bf16 %v5198_v27  ;;  %v5200_v23 = vunpack.i.h.bf16 %v5198_v27 }
 0x393   : > { %3990 = vmatprep.mubr.msk.bf16.mxu1 %vm1775_vm11, %v3445_v37  ;;  %v5215_v4 = vunpack.i.h.bf16 %v5213_v55  ;;  %v5214_v40 = vunpack.i.l.bf16 %v5213_v55 }
 0x394   : > { %3991 = vmatmul.mubr.msk.bf16.gmra.mxu1 %vm1775_vm11, %v3446_v3  ;;  %v3299_v21 = vsel %vm1573_vm6, %v8592_v15, %v5199_v26  ;;  %v3300_v43 = vsel %vm1573_vm6, %v8595_v56, %v5200_v23 }
 0x395   : > { %v5208_v24 = vpop.permute.xlu1 %5207  ;;  %v3333_v42 = vsel %vm1606_vm7, %v3301_v8, %v5214_v40  ;;  %v3334_v7 = vsel %vm1606_vm7, %v3302_v48, %v5215_v4  ;;  %v8749_v48 = vld [vmem:[%s8914_s4] ss:$0 sm:$0xff] }
 0x396   : > { %v5223_v34 = vpop.permute.xlu0 %5222  ;;  %v5209_v45 = vunpack.i.l.bf16 %v5208_v24  ;;  %v5210_v59 = vunpack.i.h.bf16 %v5208_v24 }
 0x397   : > { %v5225_v31 = vunpack.i.h.bf16 %v5223_v34  ;;  %v5224_v18 = vunpack.i.l.bf16 %v5223_v34 }
 0x398   : > { %v3331_v5 = vsel %vm1606_vm7, %v3299_v21, %v5209_v45  ;;  %v3332_v15 = vsel %vm1606_vm7, %v3300_v43, %v5210_v59 }
 0x399   : > { %v5218_v6 = vpop.permute.xlu1 %5217  ;;  %v3365_v22 = vsel %vm1639_vm8, %v3333_v42, %v5224_v18  ;;  %v3366_v35 = vsel %vm1639_vm8, %v3334_v7, %v5225_v31 }
 0x39a   : > { %v5233_v13 = vpop.permute.xlu0 %5232  ;;  %v5219_v1 = vunpack.i.l.bf16 %v5218_v6  ;;  %v5220_v61 = vunpack.i.h.bf16 %v5218_v6 }
 0x39b   : > { %v5235_v36 = vunpack.i.h.bf16 %v5233_v13  ;;  %v5234_v44 = vunpack.i.l.bf16 %v5233_v13 }
 0x39c   : > { %v3363_v41 = vsel %vm1639_vm8, %v3331_v5, %v5219_v1  ;;  %v3364_v49 = vsel %vm1639_vm8, %v3332_v15, %v5220_v61  ;;  %v9412_v5 = vld [vmem:[#allocation3_spill] sm:$0xff] }
 0x39d   : > { %v5228_v51 = vpop.permute.xlu1 %5227  ;;  %v3397_v20 = vsel %vm1672_vm9, %v3365_v22, %v5234_v44  ;;  %v3398_v16 = vsel %vm1672_vm9, %v3366_v35, %v5235_v36 }
 0x39e   : > { %v5243_v46 = vpop.permute.xlu0 %5242  ;;  %v5230_v12 = vunpack.i.h.bf16 %v5228_v51  ;;  %v5229_v60 = vunpack.i.l.bf16 %v5228_v51 }
 0x39f   : > { %v5245_v9 = vunpack.i.h.bf16 %v5243_v46  ;;  %v5244_v57 = vunpack.i.l.bf16 %v5243_v46 }
 0x3a0   : > { %v3395_v53 = vsel %vm1672_vm9, %v3363_v41, %v5229_v60  ;;  %v3396_v19 = vsel %vm1672_vm9, %v3364_v49, %v5230_v12 }
 0x3a1   : > { %v3429_v39 = vsel %vm1705_vm10, %v3397_v20, %v5244_v57  ;;  %v3430_v32 = vsel %vm1705_vm10, %v3398_v16, %v5245_v9  ;;  %v5238_v28 = vpop.permute.xlu1 %5237 }
 0x3a2   : > { %v3448_v25 = vpack.c.bf16 %v3430_v32, %v3429_v39  ;;  %v5240_v52 = vunpack.i.h.bf16 %v5238_v28  ;;  %v5239_v56 = vunpack.i.l.bf16 %v5238_v28  ;;  %v5253_v29 = vpop.permute.xlu0 %5252 }
 0x3a3   : > { %v5254_v63 = vunpack.i.l.bf16 %v5253_v29  ;;  %v5255_v10 = vunpack.i.h.bf16 %v5253_v29  ;;  %v9413_v29 = vld [vmem:[#allocation5_spill] sm:$0xff] }
 0x3a4   : > { %v3427_v62 = vsel %vm1705_vm10, %v3395_v53, %v5239_v56  ;;  %v3428_v14 = vsel %vm1705_vm10, %v3396_v19, %v5240_v52 }
 0x3a5   : > { %v3447_v3 = vpack.c.bf16 %v3428_v14, %v3427_v62  ;;  %v5248_v11 = vpop.permute.xlu1 %5247  ;;  %v3303_v0 = vsel %vm1573_vm6, %v8610_v50, %v5254_v63  ;;  %v3304_v6 = vsel %vm1573_vm6, %v8613_v54, %v5255_v10  ;;  %v9414_v14 = vld [vmem:[#allocation4_spill] sm:$0xff] }
 0x3a6   : > { %v5263_v38 = vpop.permute.xlu0 %5262  ;;  %v5249_v30 = vunpack.i.l.bf16 %v5248_v11  ;;  %v5250_v26 = vunpack.i.h.bf16 %v5248_v11 }
 0x3a7   : > { %3994 = vmatprep.mubr.msk.bf16.mxu1 %vm1775_vm11, %v3447_v3  ;;  %v5264_v37 = vunpack.i.l.bf16 %v5263_v38  ;;  %v5265_v55 = vunpack.i.h.bf16 %v5263_v38 }
 0x3a8   : > { %3995 = vmatmul.mubr.msk.bf16.gmra.mxu1 %vm1775_vm11, %v3448_v25  ;;  %v3273_v31 = vsel %vm1540_vm5, %v8630_v2, %v5249_v30  ;;  %v3274_v9 = vsel %vm1540_vm5, %v8633_v33, %v5250_v26 }
 0x3a9   : > { %v5258_v58 = vpop.permute.xlu1 %5257  ;;  %v3335_v18 = vsel %vm1606_vm7, %v3303_v0, %v5264_v37  ;;  %v3336_v8 = vsel %vm1606_vm7, %v3304_v6, %v5265_v55  ;;  %v9415_v55 = vld [vmem:[#allocation6_spill] sm:$0xff] }
 0x3aa   : > { %v5273_v47 = vpop.permute.xlu0 %5272  ;;  %v5260_v50 = vunpack.i.h.bf16 %v5258_v58  ;;  %v5259_v23 = vunpack.i.l.bf16 %v5258_v58  ;;  %v9416_v6 = vld [vmem:[#allocation10_spill] sm:$0xff] }
 0x3ab   : > { %v5274_v24 = vunpack.i.l.bf16 %v5273_v47  ;;  %v5275_v17 = vunpack.i.h.bf16 %v5273_v47 }
 0x3ac   : > { %v3305_v57 = vsel %vm1573_vm6, %v3273_v31, %v5259_v23  ;;  %v3306_v16 = vsel %vm1573_vm6, %v3274_v9, %v5260_v50  ;;  %v9421_v9 = vld [vmem:[#allocation13_spill] sm:$0xff] }
 0x3ad   : > { %v5268_v27 = vpop.permute.xlu1 %5267  ;;  %v3367_v45 = vsel %vm1639_vm8, %v3335_v18, %v5274_v24  ;;  %v3368_v54 = vsel %vm1639_vm8, %v3336_v8, %v5275_v17  ;;  %v9417_v8 = vld [vmem:[#allocation7_spill] sm:$0xff] }
 0x3ae   : > { %v5283_v34 = vpop.permute.xlu0 %5282  ;;  %v5270_v44 = vunpack.i.h.bf16 %v5268_v27  ;;  %v5269_v59 = vunpack.i.l.bf16 %v5268_v27 }
 0x3af   : > { %v5285_v4 = vunpack.i.h.bf16 %v5283_v34  ;;  %v5284_v40 = vunpack.i.l.bf16 %v5283_v34 }
 0x3b0   : > { %v3337_v33 = vsel %vm1606_vm7, %v3305_v57, %v5269_v59  ;;  %v3338_v28 = vsel %vm1606_vm7, %v3306_v16, %v5270_v44  ;;  %v9422_v16 = vld [vmem:[#allocation16_spill] sm:$0xff] }
 0x3b1   : > { %v5278_v13 = vpop.permute.xlu1 %5277  ;;  %v3399_v1 = vsel %vm1672_vm9, %v3367_v45, %v5284_v40  ;;  %v3400_v51 = vsel %vm1672_vm9, %v3368_v54, %v5285_v4  ;;  %v9418_v54 = vld [vmem:[#allocation12_spill] sm:$0xff] }
 0x3b2   : > { %v5293_v36 = vpop.permute.xlu0 %5292  ;;  %v5280_v22 = vunpack.i.h.bf16 %v5278_v13  ;;  %v5279_v35 = vunpack.i.l.bf16 %v5278_v13 }
 0x3b3   : > { %v5295_v42 = vunpack.i.h.bf16 %v5293_v36  ;;  %v5294_v2 = vunpack.i.l.bf16 %v5293_v36  ;;  %v3972_v7 = vpop.f32.mrf.mxu1 }
 0x3b4   : > { %v3566_v21 = vadd.f32 %v3972_v7, %v8749_v48  ;;  %v3369_v52 = vsel %vm1639_vm8, %v3337_v33, %v5279_v35  ;;  %v3370_v56 = vsel %vm1639_vm8, %v3338_v28, %v5280_v22  ;;  %v9419_v7 = vld [vmem:[#allocation8_spill] sm:$0xff]  ;;  %v9420_v35 = vld [vmem:[#allocation15_spill] sm:$0xff] }
 0x3b5   : > { %v3431_v61 = vsel %vm1705_vm10, %v3399_v1, %v5294_v2  ;;  %v3432_v46 = vsel %vm1705_vm10, %v3400_v51, %v5295_v42  ;;  %v5288_v12 = vpop.permute.xlu1 %5287  ;;  %v3557_v60 = vpop.f32.mrf.mxu1 }
 0x3b6   : > { %v3449_v43 = vpack.c.bf16 %v3432_v46, %v3431_v61  ;;  %v3686_v20 = vadd.f32 %v3566_v21, %v9412_v5  ;;  %v5290_v15 = vunpack.i.h.bf16 %v5288_v12  ;;  %v5289_v41 = vunpack.i.l.bf16 %v5288_v12 }
 0x3b7   : > { %v3558_v39 = vadd.f32 %v8749_v48, %v3557_v60  ;;  %v3973_v32 = vpop.f32.mrf.mxu1 }
 0x3b8   : > { %v3718_v49 = vmax.f32 %v3686_v20, 0.0  ;;  %v3569_v25 = vadd.f32 %v3973_v32, %v8749_v48  ;;  %3998 = vmatprep.mubr.msk.bf16.mxu1 %vm1775_vm11, %v3449_v43  ;;  %v3401_v47 = vsel %vm1672_vm9, %v3369_v52, %v5289_v41  ;;  %v3402_v63 = vsel %vm1672_vm9, %v3370_v56, %v5290_v15  ;;  %v9423_v32 = vld [vmem:[#allocation14_spill] sm:$0xff]  ;;  %v9424_v56 = vld [vmem:[#allocation19_spill] sm:$0xff] }
 0x3b9   : > { %v3684_v53 = vadd.f32 %v3558_v39, %v9413_v29  ;;  %v5298_v19 = vpop.permute.xlu1 %5297  ;;  %v3560_v62 = vpop.f32.mrf.mxu1 }
 0x3ba   : > { %3750 = vst.msk [vmem:[%s8769_s29 + $0x10] sm:$0xff] %vm238_vm0, %v3718_v49  ;;  %v3687_v3 = vadd.f32 %v3569_v25, %v9414_v14  ;;  %v5300_v11 = vunpack.i.h.bf16 %v5298_v19  ;;  %v5299_v38 = vunpack.i.l.bf16 %v5298_v19  ;;  %v3561_v58 = vadd.f32 %v8749_v48, %v3560_v62  ;;  %v9425_v14 = vld [vmem:[#allocation17_spill] sm:$0xff] }
 0x3bb   : > { %v3716_v10 = vmax.f32 %v3684_v53, 0.0 }
 0x3bc   : > { %v3719_v30 = vmax.f32 %v3687_v3, 0.0  ;;  %v3433_v37 = vsel %vm1705_vm10, %v3401_v47, %v5299_v38  ;;  %v3434_v27 = vsel %vm1705_vm10, %v3402_v63, %v5300_v11  ;;  %v3685_v24 = vadd.f32 %v3561_v58, %v9415_v55  ;;  %v9426_v47 = vld [vmem:[#allocation20_spill] sm:$0xff] }
 0x3bd   : > { %3748 = vst.msk [vmem:[%s8769_s29] sm:$0xff] %vm238_vm0, %v3716_v10  ;;  %v3450_v34 = vpack.c.bf16 %v3434_v27, %v3433_v37  ;;  %v9427_v37 = vld [vmem:[#allocation18_spill] sm:$0xff] }
 0x3be   : > { %3751 = vst.msk [vmem:[%s8769_s29 + $0x18] sm:$0xff] %vm238_vm0, %v3719_v30  ;;  %v3717_v17 = vmax.f32 %v3685_v24, 0.0 }
 0x3bf   : > { %3999 = vmatmul.mubr.msk.bf16.gmra.mxu1 %vm1775_vm11, %v3450_v34 }
 0x3c0   : > { %3749 = vst.msk [vmem:[%s8769_s29 + $0x8] sm:$0xff] %vm238_vm0, %v3717_v17 }
 0x3d3   : > { %v3976_v0 = vpop.f32.mrf.mxu1 }
 0x3d4   : > { %v3582_v4 = vadd.f32 %v3976_v0, %v8749_v48  ;;  %v9428_v0 = vld [vmem:[#allocation24_spill] sm:$0xff] }
 0x3d5   : > { %v3573_v40 = vpop.f32.mrf.mxu1 }
 0x3d6   : > { %v3690_v26 = vadd.f32 %v3582_v4, %v9416_v6  ;;  %v3574_v31 = vadd.f32 %v8749_v48, %v3573_v40 }
 0x3d7   : > { %v3977_v18 = vpop.f32.mrf.mxu1 }
 0x3d8   : > { %v3722_v13 = vmax.f32 %v3690_v26, 0.0  ;;  %v3688_v50 = vadd.f32 %v3574_v31, %v9417_v8  ;;  %v3585_v23 = vadd.f32 %v3977_v18, %v8749_v48  ;;  %v9429_v31 = vld [vmem:[#allocation22_spill] sm:$0xff] }
 0x3d9   : > { %v3576_v45 = vpop.f32.mrf.mxu1 }
 0x3da   : > { %3754 = vst.msk [vmem:[%s8769_s29 + $0x30] sm:$0xff] %vm238_vm0, %v3722_v13  ;;  %v3720_v36 = vmax.f32 %v3688_v50, 0.0  ;;  %v3691_v44 = vadd.f32 %v3585_v23, %v9418_v54  ;;  %v3577_v42 = vadd.f32 %v8749_v48, %v3576_v45  ;;  %v9430_v23 = vld [vmem:[#allocation25_spill] sm:$0xff] }
 0x3dc   : > { %3752 = vst.msk [vmem:[%s8769_s29 + $0x20] sm:$0xff] %vm238_vm0, %v3720_v36  ;;  %v3723_v2 = vmax.f32 %v3691_v44, 0.0  ;;  %v3689_v59 = vadd.f32 %v3577_v42, %v9419_v7  ;;  %v9431_v44 = vld [vmem:[#allocation23_spill] sm:$0xff] }
 0x3de   : > { %3755 = vst.msk [vmem:[%s8769_s29 + $0x38] sm:$0xff] %vm238_vm0, %v3723_v2  ;;  %v3721_v1 = vmax.f32 %v3689_v59, 0.0 }
 0x3e0   : > { %3753 = vst.msk [vmem:[%s8769_s29 + $0x28] sm:$0xff] %vm238_vm0, %v3721_v1 }
 0x3eb   : > { %v3980_v51 = vpop.f32.mrf.mxu1 }
 0x3ec   : > { %v3598_v21 = vadd.f32 %v3980_v51, %v8749_v48  ;;  %v9432_v51 = vld [vmem:[#allocation28_spill] sm:$0xff] }
 0x3ed   : > { %v3589_v22 = vpop.f32.mrf.mxu1 }
 0x3ee   : > { %v3694_v61 = vadd.f32 %v3598_v21, %v9420_v35  ;;  %v3590_v46 = vadd.f32 %v8749_v48, %v3589_v22 }
 0x3ef   : > { %v3981_v12 = vpop.f32.mrf.mxu1 }
 0x3f0   : > { %v3726_v60 = vmax.f32 %v3694_v61, 0.0  ;;  %v3692_v57 = vadd.f32 %v3590_v46, %v9421_v9  ;;  %v3601_v43 = vadd.f32 %v3981_v12, %v8749_v48  ;;  %v9433_v46 = vld [vmem:[#allocation26_spill] sm:$0xff] }
 0x3f1   : > { %v3592_v5 = vpop.f32.mrf.mxu1 }
 0x3f2   : > { %3758 = vst.msk [vmem:[%s8769_s29 + $0x50] sm:$0xff] %vm238_vm0, %v3726_v60  ;;  %v3724_v20 = vmax.f32 %v3692_v57, 0.0  ;;  %v3695_v15 = vadd.f32 %v3601_v43, %v9422_v16  ;;  %v3593_v41 = vadd.f32 %v8749_v48, %v3592_v5  ;;  %v9434_v43 = vld [vmem:[#allocation29_spill] sm:$0xff] }
 0x3f4   : > { %3756 = vst.msk [vmem:[%s8769_s29 + $0x40] sm:$0xff] %vm238_vm0, %v3724_v20  ;;  %v3727_v39 = vmax.f32 %v3695_v15, 0.0  ;;  %v3693_v33 = vadd.f32 %v3593_v41, %v9423_v32  ;;  %v9435_v15 = vld [vmem:[#allocation27_spill] sm:$0xff] }
 0x3f6   : > { %3759 = vst.msk [vmem:[%s8769_s29 + $0x58] sm:$0xff] %vm238_vm0, %v3727_v39  ;;  %v3725_v28 = vmax.f32 %v3693_v33, 0.0 }
 0x3f8   : > { %3757 = vst.msk [vmem:[%s8769_s29 + $0x48] sm:$0xff] %vm238_vm0, %v3725_v28 }
 0x42c   : > { %v3984_v49 = vpop.f32.mrf.mxu1 }
 0x42d   : > { %v3614_v25 = vadd.f32 %v3984_v49, %v8749_v48  ;;  %v9436_v49 = vld [vmem:[#allocation36_spill] sm:$0xff] }
 0x42e   : > { %v3605_v52 = vpop.f32.mrf.mxu1 }
 0x42f   : > { %v3698_v29 = vadd.f32 %v3614_v25, %v9424_v56  ;;  %v3606_v53 = vadd.f32 %v8749_v48, %v3605_v52 }
 0x430   : > { %v3985_v19 = vpop.f32.mrf.mxu1 }
 0x431   : > { %v3730_v62 = vmax.f32 %v3698_v29, 0.0  ;;  %v3696_v3 = vadd.f32 %v3606_v53, %v9425_v14  ;;  %v3617_v11 = vadd.f32 %v3985_v19, %v8749_v48  ;;  %v9437_v53 = vld [vmem:[#allocation34_spill] sm:$0xff] }
 0x432   : > { %v3608_v38 = vpop.f32.mrf.mxu1 }
 0x433   : > { %3762 = vst.msk [vmem:[%s8769_s29 + $0x70] sm:$0xff] %vm238_vm0, %v3730_v62  ;;  %v3728_v58 = vmax.f32 %v3696_v3, 0.0  ;;  %v3699_v63 = vadd.f32 %v3617_v11, %v9426_v47  ;;  %v3609_v10 = vadd.f32 %v8749_v48, %v3608_v38  ;;  %v9438_v11 = vld [vmem:[#allocation37_spill] sm:$0xff] }
 0x435   : > { %3760 = vst.msk [vmem:[%s8769_s29 + $0x60] sm:$0xff] %vm238_vm0, %v3728_v58  ;;  %v3731_v30 = vmax.f32 %v3699_v63, 0.0  ;;  %v3697_v27 = vadd.f32 %v3609_v10, %v9427_v37  ;;  %v9439_v63 = vld [vmem:[#allocation35_spill] sm:$0xff] }
 0x437   : > { %3763 = vst.msk [vmem:[%s8769_s29 + $0x78] sm:$0xff] %vm238_vm0, %v3731_v30  ;;  %v3729_v55 = vmax.f32 %v3697_v27, 0.0 }
 0x439   : > { %3761 = vst.msk [vmem:[%s8769_s29 + $0x68] sm:$0xff] %vm238_vm0, %v3729_v55 }
 0x440   : > { %v3988_v24 = vpop.f32.mrf.mxu1 }
 0x441   : > { %v3630_v34 = vadd.f32 %v3988_v24, %v8749_v48  ;;  %v9440_v24 = vld [vmem:[#allocation47_spill] sm:$0xff] }
 0x442   : > { %v3621_v17 = vpop.f32.mrf.mxu1 }
 0x443   : > { %v3702_v4 = vadd.f32 %v3630_v34, %v9428_v0  ;;  %v3622_v40 = vadd.f32 %v8749_v48, %v3621_v17 }
 0x444   : > { %v3989_v6 = vpop.f32.mrf.mxu1 }
 0x445   : > { %v3734_v26 = vmax.f32 %v3702_v4, 0.0  ;;  %v3700_v18 = vadd.f32 %v3622_v40, %v9429_v31  ;;  %v3633_v13 = vadd.f32 %v3989_v6, %v8749_v48  ;;  %v9441_v40 = vld [vmem:[#allocation38_spill] sm:$0xff] }
 0x446   : > { %v3624_v8 = vpop.f32.mrf.mxu1 }
 0x447   : > { %3766 = vst.msk [vmem:[%s8769_s29 + $0x90] sm:$0xff] %vm238_vm0, %v3734_v26  ;;  %v3732_v50 = vmax.f32 %v3700_v18, 0.0  ;;  %v3703_v45 = vadd.f32 %v3633_v13, %v9430_v23  ;;  %v3625_v36 = vadd.f32 %v8749_v48, %v3624_v8  ;;  %v9442_v13 = vld [vmem:[#allocation48_spill] sm:$0xff] }
 0x449   : > { %3764 = vst.msk [vmem:[%s8769_s29 + $0x80] sm:$0xff] %vm238_vm0, %v3732_v50  ;;  %v3735_v54 = vmax.f32 %v3703_v45, 0.0  ;;  %v3701_v42 = vadd.f32 %v3625_v36, %v9431_v44  ;;  %v9443_v45 = vld [vmem:[#allocation39_spill] sm:$0xff] }
 0x44b   : > { %3767 = vst.msk [vmem:[%s8769_s29 + $0x98] sm:$0xff] %vm238_vm0, %v3735_v54  ;;  %v3733_v2 = vmax.f32 %v3701_v42, 0.0 }
 0x44d   : > { %3765 = vst.msk [vmem:[%s8769_s29 + $0x88] sm:$0xff] %vm238_vm0, %v3733_v2 }
 0x454   : > { %v3992_v7 = vpop.f32.mrf.mxu1 }
 0x455   : > { %v3646_v59 = vadd.f32 %v3992_v7, %v8749_v48 }
 0x456   : > { %v3637_v1 = vpop.f32.mrf.mxu1 }
 0x457   : > { %v3706_v21 = vadd.f32 %v3646_v59, %v9432_v51  ;;  %v3638_v22 = vadd.f32 %v8749_v48, %v3637_v1 }
 0x458   : > { %v3993_v35 = vpop.f32.mrf.mxu1 }
 0x459   : > { %v3738_v61 = vmax.f32 %v3706_v21, 0.0  ;;  %v3704_v12 = vadd.f32 %v3638_v22, %v9433_v46  ;;  %v3649_v60 = vadd.f32 %v3993_v35, %v8749_v48 }
 0x45a   : > { %v3640_v9 = vpop.f32.mrf.mxu1 }
 0x45b   : > { %3770 = vst.msk [vmem:[%s8769_s29 + $0xb0] sm:$0xff] %vm238_vm0, %v3738_v61  ;;  %v3736_v57 = vmax.f32 %v3704_v12, 0.0  ;;  %v3707_v5 = vadd.f32 %v3649_v60, %v9434_v43  ;;  %v3641_v20 = vadd.f32 %v8749_v48, %v3640_v9 }
 0x45d   : > { %3768 = vst.msk [vmem:[%s8769_s29 + $0xa0] sm:$0xff] %vm238_vm0, %v3736_v57  ;;  %v3739_v16 = vmax.f32 %v3707_v5, 0.0  ;;  %v3705_v41 = vadd.f32 %v3641_v20, %v9435_v15 }
 0x45f   : > { %3771 = vst.msk [vmem:[%s8769_s29 + $0xb8] sm:$0xff] %vm238_vm0, %v3739_v16  ;;  %v3737_v39 = vmax.f32 %v3705_v41, 0.0 }
 0x461   : > { %3769 = vst.msk [vmem:[%s8769_s29 + $0xa8] sm:$0xff] %vm238_vm0, %v3737_v39 }
 0x468   : > { %v3996_v32 = vpop.f32.mrf.mxu1 }
 0x469   : > { %v3662_v33 = vadd.f32 %v3996_v32, %v8749_v48 }
 0x46a   : > { %v3653_v28 = vpop.f32.mrf.mxu1 }
 0x46b   : > { %v3710_v25 = vadd.f32 %v3662_v33, %v9436_v49  ;;  %v3654_v52 = vadd.f32 %v8749_v48, %v3653_v28 }
 0x46c   : > { %v3997_v56 = vpop.f32.mrf.mxu1 }
 0x46d   : > { %v3742_v29 = vmax.f32 %v3710_v25, 0.0  ;;  %v3708_v19 = vadd.f32 %v3654_v52, %v9437_v53  ;;  %v3665_v62 = vadd.f32 %v3997_v56, %v8749_v48 }
 0x46e   : > { %v3656_v14 = vpop.f32.mrf.mxu1 }
 0x46f   : > { %3774 = vst.msk [vmem:[%s8769_s29 + $0xd0] sm:$0xff] %vm238_vm0, %v3742_v29  ;;  %v3740_v3 = vmax.f32 %v3708_v19, 0.0  ;;  %v3711_v38 = vadd.f32 %v3665_v62, %v9438_v11  ;;  %v3657_v58 = vadd.f32 %v8749_v48, %v3656_v14 }
 0x471   : > { %3772 = vst.msk [vmem:[%s8769_s29 + $0xc0] sm:$0xff] %vm238_vm0, %v3740_v3  ;;  %v3743_v47 = vmax.f32 %v3711_v38, 0.0  ;;  %v3709_v10 = vadd.f32 %v3657_v58, %v9439_v63 }
 0x473   : > { %3775 = vst.msk [vmem:[%s8769_s29 + $0xd8] sm:$0xff] %vm238_vm0, %v3743_v47  ;;  %v3741_v30 = vmax.f32 %v3709_v10, 0.0 }
 0x475   : > { %3773 = vst.msk [vmem:[%s8769_s29 + $0xc8] sm:$0xff] %vm238_vm0, %v3741_v30 }
 0x47f   : > { %v4000_v37 = vpop.f32.mrf.mxu1 }
 0x480   : > { %v3678_v27 = vadd.f32 %v4000_v37, %v8749_v48 }
 0x481   : > { %v3669_v55 = vpop.f32.mrf.mxu1 }
 0x482   : > { %v3714_v34 = vadd.f32 %v3678_v27, %v9440_v24  ;;  %v3670_v17 = vadd.f32 %v8749_v48, %v3669_v55 }
 0x483   : > { %v4001_v0 = vpop.f32.mrf.mxu1 }
 0x484   : > { %v3746_v4 = vmax.f32 %v3714_v34, 0.0  ;;  %v3712_v6 = vadd.f32 %v3670_v17, %v9441_v40  ;;  %v3681_v26 = vadd.f32 %v4001_v0, %v8749_v48 }
 0x485   : > { %v3672_v31 = vpop.f32.mrf.mxu1 }
 0x486   : > { %3778 = vst.msk [vmem:[%s8769_s29 + $0xf0] sm:$0xff] %vm238_vm0, %v3746_v4  ;;  %v3744_v18 = vmax.f32 %v3712_v6, 0.0  ;;  %v3715_v8 = vadd.f32 %v3681_v26, %v9442_v13  ;;  %v3673_v50 = vadd.f32 %v8749_v48, %v3672_v31 }
 0x488   : > { %3776 = vst.msk [vmem:[%s8769_s29 + $0xe0] sm:$0xff] %vm238_vm0, %v3744_v18  ;;  %v3747_v23 = vmax.f32 %v3715_v8, 0.0  ;;  %v3713_v36 = vadd.f32 %v3673_v50, %v9443_v45 }
 0x48a   : > { %3779 = vst.msk [vmem:[%s8769_s29 + $0xf8] sm:$0xff] %vm238_vm0, %v3747_v23  ;;  %v3745_v54 = vmax.f32 %v3713_v36, 0.0 }
 0x48c   : > { %3777 = vst.msk [vmem:[%s8769_s29 + $0xe8] sm:$0xff] %vm238_vm0, %v3745_v54 }
 0x48d PF: > { %s15_s18 = sadd.s32 1, %s5318_s18  }
 0x48e   : > { %p12_p4 = scmp.ge.s32.totalorder %s15_s18, 4  }
 0x490   :  { %14 = sbr.rel (!%p12_p4) target bundleno = 1 (0x1), region = 72 }

</bundles_post_ra>
